<compile_context>
chip_gen: v6e
topology: v6e:2x2x1
jax: 0.10.0
libtpu: 0.0.40
codegen_flags: <defaults>
</compile_context>

<pallas_src>
import functools

import jax
import jax.numpy as jnp
import numpy as np
from jax.experimental import pallas as pl
from jax.experimental.pallas import tpu as pltpu

_VMEM_LIMIT = 32 * 1024 * 1024  # explicit scoped-VMEM budget (safe on v5e/v6e/v7x)


# ----------------------------------------------------------------------------
# Pallas kernels
# ----------------------------------------------------------------------------
def _mm_bias_relu_kernel(p_ref, w_ref, b_ref, o_ref):
    # p_ref: [TM, K] im2col patch tile, w_ref: [K, Cout] (resident),
    # b_ref: [1, Cout] (resident), o_ref: [TM, Cout]
    acc = jnp.dot(p_ref[...], w_ref[...], preferred_element_type=jnp.float32)
    o_ref[...] = jnp.maximum(acc + b_ref[...], 0.0)


def _head_kernel(t_ref, x_ref, w1_ref, b1_ref, wh_ref, bh_ref,
                 probs_ref, logp_ref, val_ref, *, num_actions):
    # x_ref: [TB, 2592]; w1: [2592, 256]; wh: [256, A+1] (policy || value)
    h = jnp.dot(x_ref[...], w1_ref[...],
                preferred_element_type=jnp.float32) + b1_ref[...]
    out = jnp.dot(h, wh_ref[...],
                  preferred_element_type=jnp.float32) + bh_ref[...]

    logits = out[:, :num_actions]                       # [TB, A]
    val_ref[...] = out[:, num_actions:num_actions + 1]  # [TB, 1]

    # Shared shift for both the tempered softmax and log_softmax.
    zmax = jnp.max(logits, axis=-1, keepdims=True)
    shifted = logits - zmax

    # log_softmax(logits)
    lse = jnp.log(jnp.sum(jnp.exp(shifted), axis=-1, keepdims=True))
    logp_ref[...] = shifted - lse

    # softmax(logits / t) == softmax((logits - zmax) / t)
    scale = 1.0 / t_ref[0]
    ez = jnp.exp(shifted * scale)
    probs_ref[...] = ez / jnp.sum(ez, axis=-1, keepdims=True)


# ----------------------------------------------------------------------------
# Tiled pallas_call wrappers
# ----------------------------------------------------------------------------
def _tiled_mm_bias_relu(patches, w_mat, b_row, *, tm=1024):
    """relu(patches @ w_mat + b_row), tiled over rows of `patches`."""
    M, K = patches.shape
    N = w_mat.shape[1]
    tm = min(tm, M)
    grid = (pl.cdiv(M, tm),)
    return pl.pallas_call(
        _mm_bias_relu_kernel,
        out_shape=jax.ShapeDtypeStruct((M, N), jnp.float32),
        grid_spec=pltpu.PrefetchScalarGridSpec(
            num_scalar_prefetch=0,
            grid=grid,
            in_specs=[
                pl.BlockSpec((tm, K), lambda i: (i, 0)),   # pipelined patch tiles
                pl.BlockSpec((K, N), lambda i: (0, 0)),    # resident weights
                pl.BlockSpec((1, N), lambda i: (0, 0)),    # resident bias
            ],
            out_specs=pl.BlockSpec((tm, N), lambda i: (i, 0)),
        ),
        compiler_params=pltpu.CompilerParams(
            dimension_semantics=("parallel",),
            vmem_limit_bytes=_VMEM_LIMIT,
        ),
    )(patches, w_mat, b_row)


def _head(flat, prep, t, *, tb=256):
    B, D = flat.shape
    A = prep["head_w"].shape[1] - 1
    tb = min(tb, B)
    grid = (pl.cdiv(B, tb),)
    t_arr = jnp.asarray(t, jnp.float32).reshape(1)
    probs, logp, val = pl.pallas_call(
        functools.partial(_head_kernel, num_actions=A),
        out_shape=(
            jax.ShapeDtypeStruct((B, A), jnp.float32),
            jax.ShapeDtypeStruct((B, A), jnp.float32),
            jax.ShapeDtypeStruct((B, 1), jnp.float32),
        ),
        grid_spec=pltpu.PrefetchScalarGridSpec(
            num_scalar_prefetch=0,
            grid=grid,
            in_specs=[
                pl.BlockSpec(memory_space=pltpu.MemorySpace.SMEM),      # t scalar
                pl.BlockSpec((tb, D), lambda i: (i, 0)),                # features
                pl.BlockSpec(prep["linear1_w"].shape, lambda i: (0, 0)),
                pl.BlockSpec((1, prep["linear1_b"].shape[1]), lambda i: (0, 0)),
                pl.BlockSpec(prep["head_w"].shape, lambda i: (0, 0)),
                pl.BlockSpec((1, prep["head_b"].shape[1]), lambda i: (0, 0)),
            ],
            out_specs=(
                pl.BlockSpec((tb, A), lambda i: (i, 0)),
                pl.BlockSpec((tb, A), lambda i: (i, 0)),
                pl.BlockSpec((tb, 1), lambda i: (i, 0)),
            ),
        ),
        compiler_params=pltpu.CompilerParams(
            dimension_semantics=("parallel",),
            vmem_limit_bytes=_VMEM_LIMIT,
        ),
    )(t_arr, flat, prep["linear1_w"], prep["linear1_b"],
      prep["head_w"], prep["head_b"])
    return probs, logp, val


# ----------------------------------------------------------------------------
# Glue (plain JAX): NHWC im2col + one-time parameter packing
# ----------------------------------------------------------------------------
def _im2col_nhwc(x, k, stride):
    """x: [B,H,W,C] -> patches [B*OH*OW, kh*kw*C] (column order = (kh, kw, c))."""
    B, H, W, C = x.shape
    oh = (H - k) // stride + 1
    ow = (W - k) // stride + 1
    cols = []
    for i in range(k):
        for j in range(k):
            cols.append(x[:, i: i + stride * (oh - 1) + 1: stride,
                          j: j + stride * (ow - 1) + 1: stride, :])  # [B,oh,ow,C]
    patches = jnp.concatenate(cols, axis=-1)  # [B, oh, ow, k*k*C]
    return patches.reshape(B * oh * ow, k * k * C), oh, ow


def prepare_params(params):
    """Pack PyTorch-layout params into kernel layouts. Call ONCE, reuse."""
    def conv_w_mat(w):  # [O, C, kh, kw] -> [kh*kw*C, O]  (matches _im2col_nhwc)
        O, C, kh, kw = w.shape
        return jnp.transpose(w, (2, 3, 1, 0)).reshape(kh * kw * C, O)

    # linear1_w columns are indexed (c, h, w) in PyTorch; permute to NHWC
    # flatten order (h, w, c) once, then transpose to [2592, 256].
    l1w = params["linear1_w"].reshape(256, 32, 9, 9)
    l1w = jnp.transpose(l1w, (0, 2, 3, 1)).reshape(256, 32 * 9 * 9)
    l1w = jnp.transpose(l1w)

    head_w = jnp.concatenate(
        [jnp.transpose(params["policy_w"]), jnp.transpose(params["value_w"])],
        axis=1)                                              # [256, A+1]
    head_b = jnp.concatenate(
        [params["policy_b"], params["value_b"]]).reshape(1, -1)

    return {
        "conv1_w": conv_w_mat(params["conv1_w"]),
        "conv1_b": params["conv1_b"].reshape(1, -1),
        "conv2_w": conv_w_mat(params["conv2_w"]),
        "conv2_b": params["conv2_b"].reshape(1, -1),
        "linear1_w": l1w,
        "linear1_b": params["linear1_b"].reshape(1, -1),
        "head_w": head_w,
        "head_b": head_b,
    }


def actor_critic_forward(x_nchw, prep, t=1.0):
    """x_nchw: [B, num_inputs, 84, 84] float32 (NCHW, as in PyTorch)."""
    B = x_nchw.shape[0]
    x = jnp.transpose(x_nchw, (0, 2, 3, 1))                  # single NCHW->NHWC

    p1, oh1, ow1 = _im2col_nhwc(x, 8, 4)                     # [B*400, 256]
    c1 = _tiled_mm_bias_relu(p1, prep["conv1_w"], prep["conv1_b"])
    c1 = c1.reshape(B, oh1, ow1, prep["conv1_w"].shape[1])   # NHWC, no transpose

    p2, oh2, ow2 = _im2col_nhwc(c1, 3, 2)                    # [B*81, 144]
    c2 = _tiled_mm_bias_relu(p2, prep["conv2_w"], prep["conv2_b"])
    flat = c2.reshape(B, oh2 * ow2 * prep["conv2_w"].shape[1])  # NHWC flatten

    probs, logp, val = _head(flat, prep, t)
    return probs, logp, val.squeeze(-1)


# ----------------------------------------------------------------------------
# Pure-JAX reference (for correctness check, uses original PyTorch layout)
# ----------------------------------------------------------------------------
def _ref_forward(x, p, t=1.0):
    dn = ("NCHW", "OIHW", "NCHW")
    c1 = jax.lax.conv_general_dilated(x, p["conv1_w"], (4, 4), "VALID",
                                      dimension_numbers=dn)
    c1 = jax.nn.relu(c1 + p["conv1_b"][None, :, None, None])
    c2 = jax.lax.conv_general_dilated(c1, p["conv2_w"], (2, 2), "VALID",
                                      dimension_numbers=dn)
    c2 = jax.nn.relu(c2 + p["conv2_b"][None, :, None, None])
    flat = c2.reshape(x.shape[0], -1)
    h = flat @ p["linear1_w"].T + p["linear1_b"]
    logits = h @ p["policy_w"].T + p["policy_b"]
    val = (h @ p["value_w"].T + p["value_b"]).squeeze(-1)
    return (jax.nn.softmax(logits / t, axis=-1),
            jax.nn.log_softmax(logits, axis=-1),
            val)


# ----------------------------------------------------------------------------
def _init_params(key, num_inputs, num_actions):
    keys = jax.random.split(key, 10)

    def _w(k, shape, fan_in):
        return jax.random.normal(k, shape, jnp.float32) / np.sqrt(fan_in)

    return {
        "conv1_w": _w(keys[0], (16, num_inputs, 8, 8), num_inputs * 64),
        "conv1_b": _w(keys[1], (16,), 16),
        "conv2_w": _w(keys[2], (32, 16, 3, 3), 16 * 9),
        "conv2_b": _w(keys[3], (32,), 32),
        "linear1_w": _w(keys[4], (256, 32 * 9 * 9), 32 * 9 * 9),
        "linear1_b": _w(keys[5], (256,), 256),
        "policy_w": _w(keys[6], (num_actions, 256), 256),
        "policy_b": _w(keys[7], (num_actions,), 256),
        "value_w": _w(keys[8], (1, 256), 256),
        "value_b": _w(keys[9], (1,), 256),
    }


if __name__ == "__main__":
    B, num_inputs, num_actions = 2, 4, 6
    key = jax.random.PRNGKey(0)
    kx, kp = jax.random.split(key)
    # 84x84 spatial size is required by linear1's 32*9*9 input dimension.
    x = jax.random.normal(kx, (B, num_inputs, 84, 84), jnp.float32)
    params = _init_params(kp, num_inputs, num_actions)

    prep = prepare_params(params)          # one-time weight packing
    fwd = jax.jit(actor_critic_forward)

    probs, log_probs, value = jax.block_until_ready(fwd(x, prep, 1.0))

    ref_probs, ref_logp, ref_val = _ref_forward(x, params, t=1.0)
    np.testing.assert_allclose(np.asarray(probs), np.asarray(ref_probs),
                               rtol=1e-4, atol=1e-4)
    np.testing.assert_allclose(np.asarray(log_probs), np.asarray(ref_logp),
                               rtol=1e-4, atol=1e-4)
    np.testing.assert_allclose(np.asarray(value), np.asarray(ref_val),
                               rtol=1e-4, atol=1e-4)
    assert probs.shape == (B, num_actions) and value.shape == (B,)

    print("KERNEL_OK")
</pallas_src>

<mosaic_0001>
module attributes {stable_mosaic.version = 11 : i64} {
  func.func @_mm_bias_relu_kernel(%arg0: i32, %arg1: memref<800x256xf32, #tpu.memory_space<vmem>>, %arg2: memref<256x16xf32, #tpu.memory_space<vmem>>, %arg3: memref<1x16xf32, #tpu.memory_space<vmem>>, %arg4: memref<800x16xf32, #tpu.memory_space<vmem>>) attributes {dimension_semantics = [#tpu.dimension_semantics<parallel>], iteration_bounds = array<i64: 1>, scalar_prefetch = 0 : i64, scratch_operands = 0 : i64, tpu.core_type = #tpu.core_type<tc>, window_params = [{transform_indices = @transform_0, window_bounds = array<i64: 800, 256>}, {pipeline_mode = #tpu.pipeline_mode<synchronous>, transform_indices = @transform_1, window_bounds = array<i64: 256, 16>}, {pipeline_mode = #tpu.pipeline_mode<synchronous>, transform_indices = @transform_2, window_bounds = array<i64: 1, 16>}, {transform_indices = @transform_3, window_bounds = array<i64: 800, 16>}]} {
    %c0 = arith.constant 0 : index
    %c0_0 = arith.constant 0 : index
    %0 = vector.load %arg1[%c0, %c0_0] : memref<800x256xf32, #tpu.memory_space<vmem>>, vector<800x256xf32>
    %c0_1 = arith.constant 0 : index
    %c0_2 = arith.constant 0 : index
    %1 = vector.load %arg2[%c0_1, %c0_2] : memref<256x16xf32, #tpu.memory_space<vmem>>, vector<256x16xf32>
    %cst = arith.constant dense<0.000000e+00> : vector<800x16xf32>
    %2 = tpu.matmul %0, %1, %cst {dimension_numbers = #tpu.dot_dimension_numbers<[1], [0], [0], [1], [0, 0, 1, 1], [], []>} : vector<800x256xf32>, vector<256x16xf32>, vector<800x16xf32> -> vector<800x16xf32>
    %c0_3 = arith.constant 0 : index
    %c0_4 = arith.constant 0 : index
    %3 = vector.load %arg3[%c0_3, %c0_4] : memref<1x16xf32, #tpu.memory_space<vmem>>, vector<1x16xf32>
    %4 = vector.broadcast %3 : vector<1x16xf32> to vector<800x16xf32>
    %5 = arith.addf %2, %4 : vector<800x16xf32>
    %cst_5 = arith.constant 0.000000e+00 : f32
    %6 = vector.broadcast %cst_5 : f32 to vector<800x16xf32>
    %7 = arith.maximumf %5, %6 : vector<800x16xf32>
    %c0_6 = arith.constant 0 : index
    %c0_7 = arith.constant 0 : index
    %8 = vector.load %arg4[%c0_6, %c0_7] : memref<800x16xf32, #tpu.memory_space<vmem>>, vector<800x16xf32>
    tpu.vector_store %arg4[%c0_6, %c0_7], %7 {strides = array<i32>} : memref<800x16xf32, #tpu.memory_space<vmem>>, vector<800x16xf32>,
    return
  }
  func.func @transform_0(%arg0: i32) -> (i32, i32) {
    %c0_i32 = arith.constant 0 : i32
    %c0_i32_0 = arith.constant 0 : i32
    return %arg0, %c0_i32 : i32, i32
  }
  func.func @transform_1(%arg0: i32) -> (i32, i32) {
    %c0_i32 = arith.constant 0 : i32
    %c0_i32_0 = arith.constant 0 : i32
    %c0_i32_1 = arith.constant 0 : i32
    return %c0_i32, %c0_i32_0 : i32, i32
  }
  func.func @transform_2(%arg0: i32) -> (i32, i32) {
    %c0_i32 = arith.constant 0 : i32
    %c0_i32_0 = arith.constant 0 : i32
    %c0_i32_1 = arith.constant 0 : i32
    return %c0_i32, %c0_i32_0 : i32, i32
  }
  func.func @transform_3(%arg0: i32) -> (i32, i32) {
    %c0_i32 = arith.constant 0 : i32
    %c0_i32_0 = arith.constant 0 : i32
    return %arg0, %c0_i32 : i32, i32
  }
}

module attributes {stable_mosaic.version = 11 : i64} {
  func.func @_mm_bias_relu_kernel(%arg0: i32, %arg1: memref<162x144xf32, #tpu.memory_space<vmem>>, %arg2: memref<144x32xf32, #tpu.memory_space<vmem>>, %arg3: memref<1x32xf32, #tpu.memory_space<vmem>>, %arg4: memref<162x32xf32, #tpu.memory_space<vmem>>) attributes {dimension_semantics = [#tpu.dimension_semantics<parallel>], iteration_bounds = array<i64: 1>, scalar_prefetch = 0 : i64, scratch_operands = 0 : i64, tpu.core_type = #tpu.core_type<tc>, window_params = [{transform_indices = @transform_0, window_bounds = array<i64: 162, 144>}, {pipeline_mode = #tpu.pipeline_mode<synchronous>, transform_indices = @transform_1, window_bounds = array<i64: 144, 32>}, {pipeline_mode = #tpu.pipeline_mode<synchronous>, transform_indices = @transform_2, window_bounds = array<i64: 1, 32>}, {transform_indices = @transform_3, window_bounds = array<i64: 162, 32>}]} {
    %c0 = arith.constant 0 : index
    %c0_0 = arith.constant 0 : index
    %0 = vector.load %arg1[%c0, %c0_0] : memref<162x144xf32, #tpu.memory_space<vmem>>, vector<162x144xf32>
    %c0_1 = arith.constant 0 : index
    %c0_2 = arith.constant 0 : index
    %1 = vector.load %arg2[%c0_1, %c0_2] : memref<144x32xf32, #tpu.memory_space<vmem>>, vector<144x32xf32>
    %cst = arith.constant dense<0.000000e+00> : vector<162x32xf32>
    %2 = tpu.matmul %0, %1, %cst {dimension_numbers = #tpu.dot_dimension_numbers<[1], [0], [0], [1], [0, 0, 1, 1], [], []>} : vector<162x144xf32>, vector<144x32xf32>, vector<162x32xf32> -> vector<162x32xf32>
    %c0_3 = arith.constant 0 : index
    %c0_4 = arith.constant 0 : index
    %3 = vector.load %arg3[%c0_3, %c0_4] : memref<1x32xf32, #tpu.memory_space<vmem>>, vector<1x32xf32>
    %4 = vector.broadcast %3 : vector<1x32xf32> to vector<162x32xf32>
    %5 = arith.addf %2, %4 : vector<162x32xf32>
    %cst_5 = arith.constant 0.000000e+00 : f32
    %6 = vector.broadcast %cst_5 : f32 to vector<162x32xf32>
    %7 = arith.maximumf %5, %6 : vector<162x32xf32>
    %c0_6 = arith.constant 0 : index
    %c0_7 = arith.constant 0 : index
    %8 = vector.load %arg4[%c0_6, %c0_7] : memref<162x32xf32, #tpu.memory_space<vmem>>, vector<162x32xf32>
    tpu.vector_store %arg4[%c0_6, %c0_7], %7 {strides = array<i32>} : memref<162x32xf32, #tpu.memory_space<vmem>>, vector<162x32xf32>,
    return
  }
  func.func @transform_0(%arg0: i32) -> (i32, i32) {
    %c0_i32 = arith.constant 0 : i32
    %c0_i32_0 = arith.constant 0 : i32
    return %arg0, %c0_i32 : i32, i32
  }
  func.func @transform_1(%arg0: i32) -> (i32, i32) {
    %c0_i32 = arith.constant 0 : i32
    %c0_i32_0 = arith.constant 0 : i32
    %c0_i32_1 = arith.constant 0 : i32
    return %c0_i32, %c0_i32_0 : i32, i32
  }
  func.func @transform_2(%arg0: i32) -> (i32, i32) {
    %c0_i32 = arith.constant 0 : i32
    %c0_i32_0 = arith.constant 0 : i32
    %c0_i32_1 = arith.constant 0 : i32
    return %c0_i32, %c0_i32_0 : i32, i32
  }
  func.func @transform_3(%arg0: i32) -> (i32, i32) {
    %c0_i32 = arith.constant 0 : i32
    %c0_i32_0 = arith.constant 0 : i32
    return %arg0, %c0_i32 : i32, i32
  }
}

module attributes {stable_mosaic.version = 11 : i64} {
  func.func @_head_kernel(%arg0: i32, %arg1: memref<1xf32, #tpu.memory_space<smem>>, %arg2: memref<2x2592xf32, #tpu.memory_space<vmem>>, %arg3: memref<2592x256xf32, #tpu.memory_space<vmem>>, %arg4: memref<1x256xf32, #tpu.memory_space<vmem>>, %arg5: memref<256x7xf32, #tpu.memory_space<vmem>>, %arg6: memref<1x7xf32, #tpu.memory_space<vmem>>, %arg7: memref<2x6xf32, #tpu.memory_space<vmem>>, %arg8: memref<2x6xf32, #tpu.memory_space<vmem>>, %arg9: memref<2x1xf32, #tpu.memory_space<vmem>>) attributes {dimension_semantics = [#tpu.dimension_semantics<parallel>], iteration_bounds = array<i64: 1>, scalar_prefetch = 0 : i64, scratch_operands = 0 : i64, tpu.core_type = #tpu.core_type<tc>, window_params = [{transform_indices = @transform_0, window_bounds = array<i64: 1>}, {transform_indices = @transform_1, window_bounds = array<i64: 2, 2592>}, {pipeline_mode = #tpu.pipeline_mode<synchronous>, transform_indices = @transform_2, window_bounds = array<i64: 2592, 256>}, {pipeline_mode = #tpu.pipeline_mode<synchronous>, transform_indices = @transform_3, window_bounds = array<i64: 1, 256>}, {pipeline_mode = #tpu.pipeline_mode<synchronous>, transform_indices = @transform_4, window_bounds = array<i64: 256, 7>}, {pipeline_mode = #tpu.pipeline_mode<synchronous>, transform_indices = @transform_5, window_bounds = array<i64: 1, 7>}, {transform_indices = @transform_6, window_bounds = array<i64: 2, 6>}, {transform_indices = @transform_7, window_bounds = array<i64: 2, 6>}, {transform_indices = @transform_8, window_bounds = array<i64: 2, 1>}]} {
    %c0 = arith.constant 0 : index
    %c0_0 = arith.constant 0 : index
    %0 = vector.load %arg2[%c0, %c0_0] : memref<2x2592xf32, #tpu.memory_space<vmem>>, vector<2x2592xf32>
    %c0_1 = arith.constant 0 : index
    %c0_2 = arith.constant 0 : index
    %1 = vector.load %arg3[%c0_1, %c0_2] : memref<2592x256xf32, #tpu.memory_space<vmem>>, vector<2592x256xf32>
    %cst = arith.constant dense<0.000000e+00> : vector<2x256xf32>
    %2 = tpu.matmul %0, %1, %cst {dimension_numbers = #tpu.dot_dimension_numbers<[1], [0], [0], [1], [0, 0, 1, 1], [], []>} : vector<2x2592xf32>, vector<2592x256xf32>, vector<2x256xf32> -> vector<2x256xf32>
    %c0_3 = arith.constant 0 : index
    %c0_4 = arith.constant 0 : index
    %3 = vector.load %arg4[%c0_3, %c0_4] : memref<1x256xf32, #tpu.memory_space<vmem>>, vector<1x256xf32>
    %4 = vector.broadcast %3 : vector<1x256xf32> to vector<2x256xf32>
    %5 = arith.addf %2, %4 : vector<2x256xf32>
    %c0_5 = arith.constant 0 : index
    %c0_6 = arith.constant 0 : index
    %6 = vector.load %arg5[%c0_5, %c0_6] : memref<256x7xf32, #tpu.memory_space<vmem>>, vector<256x7xf32>
    %cst_7 = arith.constant dense<0.000000e+00> : vector<2x7xf32>
    %7 = tpu.matmul %5, %6, %cst_7 {dimension_numbers = #tpu.dot_dimension_numbers<[1], [0], [0], [1], [0, 0, 1, 1], [], []>} : vector<2x256xf32>, vector<256x7xf32>, vector<2x7xf32> -> vector<2x7xf32>
    %c0_8 = arith.constant 0 : index
    %c0_9 = arith.constant 0 : index
    %8 = vector.load %arg6[%c0_8, %c0_9] : memref<1x7xf32, #tpu.memory_space<vmem>>, vector<1x7xf32>
    %9 = vector.broadcast %8 : vector<1x7xf32> to vector<2x7xf32>
    %10 = arith.addf %7, %9 : vector<2x7xf32>
    %11 = vector.extract_strided_slice %10 {offsets = [0, 0], sizes = [2, 6], strides = [1, 1]} : vector<2x7xf32> to vector<2x6xf32>
    %12 = vector.extract_strided_slice %10 {offsets = [0, 6], sizes = [2, 1], strides = [1, 1]} : vector<2x7xf32> to vector<2x1xf32>
    %c0_10 = arith.constant 0 : index
    %c0_11 = arith.constant 0 : index
    %13 = vector.load %arg9[%c0_10, %c0_11] : memref<2x1xf32, #tpu.memory_space<vmem>>, vector<2x1xf32>
    tpu.vector_store %arg9[%c0_10, %c0_11], %12 {strides = array<i32>} : memref<2x1xf32, #tpu.memory_space<vmem>>, vector<2x1xf32>,
    %cst_12 = arith.constant dense<0xFF800000> : vector<2xf32>
    %14 = vector.multi_reduction <maximumf>, %11, %cst_12 [1] : vector<2x6xf32> to vector<2xf32>
    %15 = vector.shape_cast %14 : vector<2xf32> to vector<2x1xf32>
    %16 = vector.broadcast %15 : vector<2x1xf32> to vector<2x6xf32>
    %17 = arith.subf %11, %16 : vector<2x6xf32>
    %18 = math.exp %17 : vector<2x6xf32>
    %cst_13 = arith.constant dense<0.000000e+00> : vector<2xf32>
    %19 = vector.multi_reduction <add>, %18, %cst_13 [1] : vector<2x6xf32> to vector<2xf32>
    %20 = vector.shape_cast %19 : vector<2xf32> to vector<2x1xf32>
    %21 = math.log %20 : vector<2x1xf32>
    %22 = vector.broadcast %21 : vector<2x1xf32> to vector<2x6xf32>
    %23 = arith.subf %17, %22 : vector<2x6xf32>
    %c0_14 = arith.constant 0 : index
    %c0_15 = arith.constant 0 : index
    %24 = vector.load %arg8[%c0_14, %c0_15] : memref<2x6xf32, #tpu.memory_space<vmem>>, vector<2x6xf32>
    tpu.vector_store %arg8[%c0_14, %c0_15], %23 {strides = array<i32>} : memref<2x6xf32, #tpu.memory_space<vmem>>, vector<2x6xf32>,
    %c0_16 = arith.constant 0 : index
    %25 = memref.load %arg1[%c0_16] : memref<1xf32, #tpu.memory_space<smem>>
    %cst_17 = arith.constant 1.000000e+00 : f32
    %26 = arith.divf %cst_17, %25 : f32
    %27 = vector.broadcast %26 : f32 to vector<2x6xf32>
    %28 = arith.mulf %17, %27 : vector<2x6xf32>
    %29 = math.exp %28 : vector<2x6xf32>
    %cst_18 = arith.constant dense<0.000000e+00> : vector<2xf32>
    %30 = vector.multi_reduction <add>, %29, %cst_18 [1] : vector<2x6xf32> to vector<2xf32>
    %31 = vector.shape_cast %30 : vector<2xf32> to vector<2x1xf32>
    %32 = vector.broadcast %31 : vector<2x1xf32> to vector<2x6xf32>
    %33 = arith.divf %29, %32 : vector<2x6xf32>
    %c0_19 = arith.constant 0 : index
    %c0_20 = arith.constant 0 : index
    %34 = vector.load %arg7[%c0_19, %c0_20] : memref<2x6xf32, #tpu.memory_space<vmem>>, vector<2x6xf32>
    tpu.vector_store %arg7[%c0_19, %c0_20], %33 {strides = array<i32>} : memref<2x6xf32, #tpu.memory_space<vmem>>, vector<2x6xf32>,
    return
  }
  func.func @transform_0(%arg0: i32) -> i32 {
    %c0_i32 = arith.constant 0 : i32
    %c0_i32_0 = arith.constant 0 : i32
    return %c0_i32 : i32
  }
  func.func @transform_1(%arg0: i32) -> (i32, i32) {
    %c0_i32 = arith.constant 0 : i32
    %c0_i32_0 = arith.constant 0 : i32
    return %arg0, %c0_i32 : i32, i32
  }
  func.func @transform_2(%arg0: i32) -> (i32, i32) {
    %c0_i32 = arith.constant 0 : i32
    %c0_i32_0 = arith.constant 0 : i32
    %c0_i32_1 = arith.constant 0 : i32
    return %c0_i32, %c0_i32_0 : i32, i32
  }
  func.func @transform_3(%arg0: i32) -> (i32, i32) {
    %c0_i32 = arith.constant 0 : i32
    %c0_i32_0 = arith.constant 0 : i32
    %c0_i32_1 = arith.constant 0 : i32
    return %c0_i32, %c0_i32_0 : i32, i32
  }
  func.func @transform_4(%arg0: i32) -> (i32, i32) {
    %c0_i32 = arith.constant 0 : i32
    %c0_i32_0 = arith.constant 0 : i32
    %c0_i32_1 = arith.constant 0 : i32
    return %c0_i32, %c0_i32_0 : i32, i32
  }
  func.func @transform_5(%arg0: i32) -> (i32, i32) {
    %c0_i32 = arith.constant 0 : i32
    %c0_i32_0 = arith.constant 0 : i32
    %c0_i32_1 = arith.constant 0 : i32
    return %c0_i32, %c0_i32_0 : i32, i32
  }
  func.func @transform_6(%arg0: i32) -> (i32, i32) {
    %c0_i32 = arith.constant 0 : i32
    %c0_i32_0 = arith.constant 0 : i32
    return %arg0, %c0_i32 : i32, i32
  }
  func.func @transform_7(%arg0: i32) -> (i32, i32) {
    %c0_i32 = arith.constant 0 : i32
    %c0_i32_0 = arith.constant 0 : i32
    return %arg0, %c0_i32 : i32, i32
  }
  func.func @transform_8(%arg0: i32) -> (i32, i32) {
    %c0_i32 = arith.constant 0 : i32
    %c0_i32_0 = arith.constant 0 : i32
    return %arg0, %c0_i32 : i32, i32
  }
}

</mosaic_0001>

<bundles_post_ra>
// kernel: actor_critic_forward.3
= control target key start
LH: loop header
LB: loop body
LE: loop exit
PB: predicated region body
PF: predicated region fallthrough
CT: control target
= control target key end

     0   :  { %v1089_v0 = vmov 0.0   ;;  %vm918_vm0 = vcmask 130048   ;;  %s2375_s1 = inlined_call_operand.vmem [shape: f32[256,16], index: 1, kind: input, shape index: {}]   ;;  %s2376_s0 = inlined_call_operand.vmem [shape: f32[800,256], index: 0, kind: input, shape index: {}]   ;;  %s2377_s2 = inlined_call_operand.vmem [shape: f32[1,16], index: 2, kind: input, shape index: {}]   ;;  %s2378_s3 = inlined_call_operand.vmem [shape: f32[800,16], index: 3, kind: output, shape index: {}]  }
   0x1   :  { %253 = vmatprep.subr.mxu0 %v1089_v0  ;;  %1024 = vmatprep.subr.mxu1 %v1089_v0  ;;  %v229_v1 = vld [vmem:[%s2375_s1 + $0x78] sm:$0xff]  ;;  %v228_v2 = vld [vmem:[%s2375_s1 + $0x70] sm:$0xff]  ;;  %v227_v3 = vld [vmem:[%s2375_s1 + $0x68] sm:$0xff] }
   0x2   :  { %254 = vmatpush1.msra.mxu0 %v229_v1  ;;  %1056 = vmatpush1.msra.mxu1 %v229_v1  ;;  %v226_v4 = vld [vmem:[%s2375_s1 + $0x60] sm:$0xff]  ;;  %v225_v5 = vld [vmem:[%s2375_s1 + $0x58] sm:$0xff]  ;;  %v224_v6 = vld [vmem:[%s2375_s1 + $0x50] sm:$0xff] }
   0x3   :  { %255 = vmatprep.subr.mxu0 %v1089_v0  ;;  %1025 = vmatprep.subr.mxu1 %v1089_v0  ;;  %v223_v7 = vld [vmem:[%s2375_s1 + $0x48] sm:$0xff]  ;;  %v222_v8 = vld [vmem:[%s2375_s1 + $0x40] sm:$0xff]  ;;  %v221_v9 = vld [vmem:[%s2375_s1 + $0x38] sm:$0xff] }
   0x4   :  { %256 = vmatpush1.msra.mxu0 %v228_v2  ;;  %1057 = vmatpush1.msra.mxu1 %v228_v2  ;;  %v220_v10 = vld [vmem:[%s2375_s1 + $0x30] sm:$0xff]  ;;  %v219_v11 = vld [vmem:[%s2375_s1 + $0x28] sm:$0xff]  ;;  %v218_v12 = vld [vmem:[%s2375_s1 + $0x20] sm:$0xff] }
   0x5   :  { %257 = vmatprep.subr.mxu0 %v1089_v0  ;;  %1026 = vmatprep.subr.mxu1 %v1089_v0  ;;  %v217_v13 = vld [vmem:[%s2375_s1 + $0x18] sm:$0xff]  ;;  %v216_v14 = vld [vmem:[%s2375_s1 + $0x10] sm:$0xff]  ;;  %v215_v15 = vld [vmem:[%s2375_s1 + $0x8] sm:$0xff] }
   0x6   :  { %258 = vmatpush1.msra.mxu0 %v227_v3  ;;  %1058 = vmatpush1.msra.mxu1 %v227_v3  ;;  %v214_v16 = vld [vmem:[%s2375_s1] sm:$0xff]  ;;  %v245_v17 = vld [vmem:[%s2375_s1 + $0xf8] sm:$0xff]  ;;  %v244_v18 = vld [vmem:[%s2375_s1 + $0xf0] sm:$0xff] }
   0x7   :  { %259 = vmatprep.subr.mxu0 %v1089_v0  ;;  %1027 = vmatprep.subr.mxu1 %v1089_v0  ;;  %v243_v19 = vld [vmem:[%s2375_s1 + $0xe8] sm:$0xff]  ;;  %v242_v20 = vld [vmem:[%s2375_s1 + $0xe0] sm:$0xff]  ;;  %v241_v21 = vld [vmem:[%s2375_s1 + $0xd8] sm:$0xff] }
   0x8   :  { %260 = vmatpush1.msra.mxu0 %v226_v4  ;;  %1059 = vmatpush1.msra.mxu1 %v226_v4  ;;  %v240_v22 = vld [vmem:[%s2375_s1 + $0xd0] sm:$0xff]  ;;  %v239_v23 = vld [vmem:[%s2375_s1 + $0xc8] sm:$0xff]  ;;  %v238_v24 = vld [vmem:[%s2375_s1 + $0xc0] sm:$0xff] }
   0x9   :  { %261 = vmatprep.subr.mxu0 %v1089_v0  ;;  %1028 = vmatprep.subr.mxu1 %v1089_v0  ;;  %v237_v25 = vld [vmem:[%s2375_s1 + $0xb8] sm:$0xff]  ;;  %v236_v26 = vld [vmem:[%s2375_s1 + $0xb0] sm:$0xff]  ;;  %v235_v27 = vld [vmem:[%s2375_s1 + $0xa8] sm:$0xff] }
   0xa   :  { %262 = vmatpush1.msra.mxu0 %v225_v5  ;;  %1060 = vmatpush1.msra.mxu1 %v225_v5  ;;  %v234_v28 = vld [vmem:[%s2375_s1 + $0xa0] sm:$0xff]  ;;  %v233_v29 = vld [vmem:[%s2375_s1 + $0x98] sm:$0xff]  ;;  %v232_v30 = vld [vmem:[%s2375_s1 + $0x90] sm:$0xff] }
   0xb   :  { %263 = vmatprep.subr.mxu0 %v1089_v0  ;;  %1029 = vmatprep.subr.mxu1 %v1089_v0  ;;  %v231_v31 = vld [vmem:[%s2375_s1 + $0x88] sm:$0xff]  ;;  %v230_v32 = vld [vmem:[%s2375_s1 + $0x80] sm:$0xff]  ;;  %v17_v37 = vld [vmem:[%s2376_s0 + $0x18] sm:$0xff] }
   0xc   :  { %264 = vmatpush1.msra.mxu0 %v224_v6  ;;  %1061 = vmatpush1.msra.mxu1 %v224_v6  ;;  %v15_v33 = vld [vmem:[%s2376_s0 + $0x8] sm:$0xff]  ;;  %v14_v35 = vld [vmem:[%s2376_s0] sm:$0xff]  ;;  %v117_v38 = vld [vmem:[%s2376_s0 + $0x338] sm:$0xff] }
   0xd   :  { %265 = vmatprep.subr.mxu0 %v1089_v0  ;;  %1030 = vmatprep.subr.mxu1 %v1089_v0  ;;  %v115_v34 = vld [vmem:[%s2376_s0 + $0x328] sm:$0xff]  ;;  %v114_v36 = vld [vmem:[%s2376_s0 + $0x320] sm:$0xff]  ;;  %v16_v39 = vld [vmem:[%s2376_s0 + $0x10] sm:$0xff] }
   0xe   :  { %266 = vmatpush1.msra.mxu0 %v223_v7  ;;  %1062 = vmatpush1.msra.mxu1 %v223_v7  ;;  %v116_v40 = vld [vmem:[%s2376_s0 + $0x330] sm:$0xff]  ;;  %v19_v41 = vld [vmem:[%s2376_s0 + $0x28] sm:$0xff]  ;;  %v18_v43 = vld [vmem:[%s2376_s0 + $0x20] sm:$0xff] }
   0xf   :  { %267 = vmatprep.subr.mxu0 %v1089_v0  ;;  %1031 = vmatprep.subr.mxu1 %v1089_v0  ;;  %v119_v42 = vld [vmem:[%s2376_s0 + $0x348] sm:$0xff]  ;;  %v118_v44 = vld [vmem:[%s2376_s0 + $0x340] sm:$0xff]  ;;  %v21_v45 = vld [vmem:[%s2376_s0 + $0x38] sm:$0xff] }
  0x10   :  { %268 = vmatpush1.msra.mxu0 %v222_v8  ;;  %1063 = vmatpush1.msra.mxu1 %v222_v8  ;;  %v121_v46 = vld [vmem:[%s2376_s0 + $0x358] sm:$0xff]  ;;  %v20_v47 = vld [vmem:[%s2376_s0 + $0x30] sm:$0xff]  ;;  %v23_v49 = vld [vmem:[%s2376_s0 + $0x48] sm:$0xff] }
  0x11   :  { %269 = vmatprep.subr.mxu0 %v1089_v0  ;;  %1032 = vmatprep.subr.mxu1 %v1089_v0  ;;  %v120_v48 = vld [vmem:[%s2376_s0 + $0x350] sm:$0xff]  ;;  %v123_v50 = vld [vmem:[%s2376_s0 + $0x368] sm:$0xff]  ;;  %v22_v51 = vld [vmem:[%s2376_s0 + $0x40] sm:$0xff] }
  0x12   :  { %270 = vmatpush1.msra.mxu0 %v221_v9  ;;  %1064 = vmatpush1.msra.mxu1 %v221_v9  ;;  %v122_v52 = vld [vmem:[%s2376_s0 + $0x360] sm:$0xff]  ;;  %v25_v53 = vld [vmem:[%s2376_s0 + $0x58] sm:$0xff]  ;;  %v24_v55 = vld [vmem:[%s2376_s0 + $0x50] sm:$0xff] }
  0x13   :  { %271 = vmatprep.subr.mxu0 %v1089_v0  ;;  %1033 = vmatprep.subr.mxu1 %v1089_v0  ;;  %v125_v54 = vld [vmem:[%s2376_s0 + $0x378] sm:$0xff]  ;;  %v124_v56 = vld [vmem:[%s2376_s0 + $0x370] sm:$0xff]  ;;  %v27_v57 = vld [vmem:[%s2376_s0 + $0x68] sm:$0xff] }
  0x14   :  { %272 = vmatpush1.msra.mxu0 %v220_v10  ;;  %1065 = vmatpush1.msra.mxu1 %v220_v10  ;;  %v127_v58 = vld [vmem:[%s2376_s0 + $0x388] sm:$0xff]  ;;  %v26_v59 = vld [vmem:[%s2376_s0 + $0x60] sm:$0xff]  ;;  %v29_v61 = vld [vmem:[%s2376_s0 + $0x78] sm:$0xff] }
  0x15   :  { %273 = vmatprep.subr.mxu0 %v1089_v0  ;;  %1034 = vmatprep.subr.mxu1 %v1089_v0  ;;  %v126_v60 = vld [vmem:[%s2376_s0 + $0x380] sm:$0xff]  ;;  %v129_v62 = vld [vmem:[%s2376_s0 + $0x398] sm:$0xff]  ;;  %v28_v63 = vld [vmem:[%s2376_s0 + $0x70] sm:$0xff] }
  0x16   :  { %274 = vmatpush1.msra.mxu0 %v219_v11  ;;  %1066 = vmatpush1.msra.mxu1 %v219_v11  ;;  %v31_v1 = vld [vmem:[%s2376_s0 + $0x88] sm:$0xff]  ;;  %v30_v3 = vld [vmem:[%s2376_s0 + $0x80] sm:$0xff]  ;;  %v33_v5 = vld [vmem:[%s2376_s0 + $0x98] sm:$0xff] }
  0x17   :  { %275 = vmatprep.subr.mxu0 %v1089_v0  ;;  %1035 = vmatprep.subr.mxu1 %v1089_v0  ;;  %v131_v2 = vld [vmem:[%s2376_s0 + $0x3a8] sm:$0xff]  ;;  %v130_v4 = vld [vmem:[%s2376_s0 + $0x3a0] sm:$0xff]  ;;  %v133_v6 = vld [vmem:[%s2376_s0 + $0x3b8] sm:$0xff] }
  0x18   :  { %276 = vmatpush1.msra.mxu0 %v218_v12  ;;  %1067 = vmatpush1.msra.mxu1 %v218_v12  ;;  %v32_v7 = vld [vmem:[%s2376_s0 + $0x90] sm:$0xff]  ;;  %v35_v9 = vld [vmem:[%s2376_s0 + $0xa8] sm:$0xff]  ;;  %v34_v11 = vld [vmem:[%s2376_s0 + $0xa0] sm:$0xff] }
  0x19   :  { %277 = vmatprep.subr.mxu0 %v1089_v0  ;;  %1036 = vmatprep.subr.mxu1 %v1089_v0  ;;  %v132_v8 = vld [vmem:[%s2376_s0 + $0x3b0] sm:$0xff]  ;;  %v135_v10 = vld [vmem:[%s2376_s0 + $0x3c8] sm:$0xff]  ;;  %v134_v12 = vld [vmem:[%s2376_s0 + $0x3c0] sm:$0xff] }
  0x1a   :  { %278 = vmatpush1.msra.mxu0 %v217_v13  ;;  %1068 = vmatpush1.msra.mxu1 %v217_v13  ;;  %v37_v13 = vld [vmem:[%s2376_s0 + $0xb8] sm:$0xff] }
  0x1b   :  { %279 = vmatprep.subr.mxu0 %v1089_v0  ;;  %1037 = vmatprep.subr.mxu1 %v1089_v0 }
  0x1c   :  { %280 = vmatpush1.msra.mxu0 %v216_v14  ;;  %1069 = vmatpush1.msra.mxu1 %v216_v14  ;;  %v137_v14 = vld [vmem:[%s2376_s0 + $0x3d8] sm:$0xff] }
  0x1d   :  { %281 = vmatprep.subr.mxu0 %v1089_v0  ;;  %1038 = vmatprep.subr.mxu1 %v1089_v0 }
  0x1e   :  { %282 = vmatpush1.msra.mxu0 %v215_v15  ;;  %1070 = vmatpush1.msra.mxu1 %v215_v15  ;;  %v36_v15 = vld [vmem:[%s2376_s0 + $0xb0] sm:$0xff] }
  0x1f   :  { %283 = vmatprep.subr.mxu0 %v1089_v0  ;;  %1039 = vmatprep.subr.mxu1 %v1089_v0 }
  0x20   :  { %284 = vmatpush1.msra.mxu0 %v214_v16  ;;  %1071 = vmatpush1.msra.mxu1 %v214_v16  ;;  %v136_v16 = vld [vmem:[%s2376_s0 + $0x3d0] sm:$0xff] }
  0x21   :  { %285 = vmatprep.subr.mxu0 %v1089_v0  ;;  %1040 = vmatprep.subr.mxu1 %v1089_v0 }
  0x22   :  { %286 = vmatpush2.msra.mxu0 %v245_v17  ;;  %1072 = vmatpush2.msra.mxu1 %v245_v17  ;;  %v39_v17 = vld [vmem:[%s2376_s0 + $0xc8] sm:$0xff] }
  0x23   :  { %287 = vmatprep.subr.mxu0 %v1089_v0  ;;  %1041 = vmatprep.subr.mxu1 %v1089_v0 }
  0x24   :  { %288 = vmatpush2.msra.mxu0 %v244_v18  ;;  %1073 = vmatpush2.msra.mxu1 %v244_v18  ;;  %v139_v18 = vld [vmem:[%s2376_s0 + $0x3e8] sm:$0xff] }
  0x25   :  { %289 = vmatprep.subr.mxu0 %v1089_v0  ;;  %1042 = vmatprep.subr.mxu1 %v1089_v0 }
  0x26   :  { %290 = vmatpush2.msra.mxu0 %v243_v19  ;;  %1074 = vmatpush2.msra.mxu1 %v243_v19  ;;  %v38_v19 = vld [vmem:[%s2376_s0 + $0xc0] sm:$0xff] }
  0x27   :  { %291 = vmatprep.subr.mxu0 %v1089_v0  ;;  %1043 = vmatprep.subr.mxu1 %v1089_v0 }
  0x28   :  { %292 = vmatpush2.msra.mxu0 %v242_v20  ;;  %1075 = vmatpush2.msra.mxu1 %v242_v20  ;;  %v138_v20 = vld [vmem:[%s2376_s0 + $0x3e0] sm:$0xff] }
  0x29   :  { %293 = vmatprep.subr.mxu0 %v1089_v0  ;;  %1044 = vmatprep.subr.mxu1 %v1089_v0 }
  0x2a   :  { %294 = vmatpush2.msra.mxu0 %v241_v21  ;;  %1076 = vmatpush2.msra.mxu1 %v241_v21  ;;  %v41_v21 = vld [vmem:[%s2376_s0 + $0xd8] sm:$0xff] }
  0x2b   :  { %295 = vmatprep.subr.mxu0 %v1089_v0  ;;  %1045 = vmatprep.subr.mxu1 %v1089_v0 }
  0x2c   :  { %296 = vmatpush2.msra.mxu0 %v240_v22  ;;  %1077 = vmatpush2.msra.mxu1 %v240_v22  ;;  %v141_v22 = vld [vmem:[%s2376_s0 + $0x3f8] sm:$0xff] }
  0x2d   :  { %297 = vmatprep.subr.mxu0 %v1089_v0  ;;  %1046 = vmatprep.subr.mxu1 %v1089_v0 }
  0x2e   :  { %298 = vmatpush2.msra.mxu0 %v239_v23  ;;  %1078 = vmatpush2.msra.mxu1 %v239_v23  ;;  %v40_v23 = vld [vmem:[%s2376_s0 + $0xd0] sm:$0xff] }
  0x2f   :  { %299 = vmatprep.subr.mxu0 %v1089_v0  ;;  %1047 = vmatprep.subr.mxu1 %v1089_v0 }
  0x30   :  { %300 = vmatpush2.msra.mxu0 %v238_v24  ;;  %1079 = vmatpush2.msra.mxu1 %v238_v24  ;;  %v140_v24 = vld [vmem:[%s2376_s0 + $0x3f0] sm:$0xff] }
  0x31   :  { %301 = vmatprep.subr.mxu0 %v1089_v0  ;;  %1048 = vmatprep.subr.mxu1 %v1089_v0 }
  0x32   :  { %302 = vmatpush2.msra.mxu0 %v237_v25  ;;  %1080 = vmatpush2.msra.mxu1 %v237_v25  ;;  %v43_v25 = vld [vmem:[%s2376_s0 + $0xe8] sm:$0xff] }
  0x33   :  { %303 = vmatprep.subr.mxu0 %v1089_v0  ;;  %1049 = vmatprep.subr.mxu1 %v1089_v0 }
  0x34   :  { %304 = vmatpush2.msra.mxu0 %v236_v26  ;;  %1081 = vmatpush2.msra.mxu1 %v236_v26  ;;  %v143_v26 = vld [vmem:[%s2376_s0 + $0x408] sm:$0xff] }
  0x35   :  { %305 = vmatprep.subr.mxu0 %v1089_v0  ;;  %1050 = vmatprep.subr.mxu1 %v1089_v0 }
  0x36   :  { %306 = vmatpush2.msra.mxu0 %v235_v27  ;;  %1082 = vmatpush2.msra.mxu1 %v235_v27  ;;  %v42_v27 = vld [vmem:[%s2376_s0 + $0xe0] sm:$0xff] }
  0x37   :  { %307 = vmatprep.subr.mxu0 %v1089_v0  ;;  %1051 = vmatprep.subr.mxu1 %v1089_v0 }
  0x38   :  { %308 = vmatpush2.msra.mxu0 %v234_v28  ;;  %1083 = vmatpush2.msra.mxu1 %v234_v28  ;;  %v142_v28 = vld [vmem:[%s2376_s0 + $0x400] sm:$0xff] }
  0x39   :  { %309 = vmatprep.subr.mxu0 %v1089_v0  ;;  %1052 = vmatprep.subr.mxu1 %v1089_v0 }
  0x3a   :  { %310 = vmatpush2.msra.mxu0 %v233_v29  ;;  %1084 = vmatpush2.msra.mxu1 %v233_v29  ;;  %v45_v29 = vld [vmem:[%s2376_s0 + $0xf8] sm:$0xff] }
  0x3b   :  { %311 = vmatprep.subr.mxu0 %v1089_v0  ;;  %1053 = vmatprep.subr.mxu1 %v1089_v0 }
  0x3c   :  { %312 = vmatpush2.msra.mxu0 %v232_v30  ;;  %1085 = vmatpush2.msra.mxu1 %v232_v30  ;;  %v145_v30 = vld [vmem:[%s2376_s0 + $0x418] sm:$0xff] }
  0x3d   :  { %313 = vmatprep.subr.mxu0 %v1089_v0  ;;  %1054 = vmatprep.subr.mxu1 %v1089_v0 }
  0x3e   :  { %314 = vmatpush2.msra.mxu0 %v231_v31  ;;  %1086 = vmatpush2.msra.mxu1 %v231_v31  ;;  %v44_v31 = vld [vmem:[%s2376_s0 + $0xf0] sm:$0xff] }
  0x3f   :  { %315 = vmatprep.subr.mxu0 %v1089_v0  ;;  %1055 = vmatprep.subr.mxu1 %v1089_v0  ;;  %v128_v0 = vld [vmem:[%s2376_s0 + $0x390] sm:$0xff] }
  0x40   :  { %316 = vmatpush2.msra.mxu0 %v230_v32  ;;  %1087 = vmatpush2.msra.mxu1 %v230_v32  ;;  %v144_v32 = vld [vmem:[%s2376_s0 + $0x410] sm:$0xff] }
  0x41   :  { %317 = vmatprep.mubr.f32.mxu0 %v15_v33  ;;  %567 = vmatprep.mubr.f32.mxu1 %v115_v34  ;;  %v47_v33 = vld [vmem:[%s2376_s0 + $0x108] sm:$0xff] }
  0x42   :  { %318 = vmatmul.mubr.f32.vlgmr.msra.gmra.mxu0 %v14_v35  ;;  %568 = vmatmul.mubr.f32.vlgmr.msra.gmra.mxu1 %v114_v36  ;;  %v147_v34 = vld [vmem:[%s2376_s0 + $0x428] sm:$0xff]  ;;  %v46_v35 = vld [vmem:[%s2376_s0 + $0x100] sm:$0xff] }
  0x43   :  { %322 = vmatprep.mubr.f32.mxu0 %v17_v37  ;;  %572 = vmatprep.mubr.f32.mxu1 %v117_v38  ;;  %v146_v36 = vld [vmem:[%s2376_s0 + $0x420] sm:$0xff]  ;;  %v49_v37 = vld [vmem:[%s2376_s0 + $0x118] sm:$0xff] }
  0x44   :  { %v149_v38 = vld [vmem:[%s2376_s0 + $0x438] sm:$0xff] }
  0x46   :  { %323 = vmatmul.mubr.f32.gmra.mxu0 %v16_v39  ;;  %573 = vmatmul.mubr.f32.gmra.mxu1 %v116_v40  ;;  %v48_v39 = vld [vmem:[%s2376_s0 + $0x110] sm:$0xff] }
  0x47   :  { %327 = vmatprep.mubr.f32.mxu0 %v19_v41  ;;  %577 = vmatprep.mubr.f32.mxu1 %v119_v42  ;;  %v148_v40 = vld [vmem:[%s2376_s0 + $0x430] sm:$0xff]  ;;  %v51_v41 = vld [vmem:[%s2376_s0 + $0x128] sm:$0xff] }
  0x48   :  { %v151_v42 = vld [vmem:[%s2376_s0 + $0x448] sm:$0xff] }
  0x4a   :  { %328 = vmatmul.mubr.f32.gmra.mxu0 %v18_v43  ;;  %578 = vmatmul.mubr.f32.gmra.mxu1 %v118_v44  ;;  %v50_v43 = vld [vmem:[%s2376_s0 + $0x120] sm:$0xff] }
  0x4b   :  { %332 = vmatprep.mubr.f32.mxu0 %v21_v45  ;;  %582 = vmatprep.mubr.f32.mxu1 %v121_v46  ;;  %v150_v44 = vld [vmem:[%s2376_s0 + $0x440] sm:$0xff]  ;;  %v53_v45 = vld [vmem:[%s2376_s0 + $0x138] sm:$0xff] }
  0x4c   :  { %v153_v46 = vld [vmem:[%s2376_s0 + $0x458] sm:$0xff] }
  0x4e   :  { %333 = vmatmul.mubr.f32.gmra.mxu0 %v20_v47  ;;  %583 = vmatmul.mubr.f32.gmra.mxu1 %v120_v48  ;;  %v52_v47 = vld [vmem:[%s2376_s0 + $0x130] sm:$0xff] }
  0x4f   :  { %337 = vmatprep.mubr.f32.mxu0 %v23_v49  ;;  %587 = vmatprep.mubr.f32.mxu1 %v123_v50  ;;  %v152_v48 = vld [vmem:[%s2376_s0 + $0x450] sm:$0xff]  ;;  %v55_v49 = vld [vmem:[%s2376_s0 + $0x148] sm:$0xff] }
  0x50   :  { %v155_v50 = vld [vmem:[%s2376_s0 + $0x468] sm:$0xff] }
  0x52   :  { %338 = vmatmul.mubr.f32.gmra.mxu0 %v22_v51  ;;  %588 = vmatmul.mubr.f32.gmra.mxu1 %v122_v52  ;;  %v54_v51 = vld [vmem:[%s2376_s0 + $0x140] sm:$0xff] }
  0x53   :  { %342 = vmatprep.mubr.f32.mxu0 %v25_v53  ;;  %592 = vmatprep.mubr.f32.mxu1 %v125_v54  ;;  %v154_v52 = vld [vmem:[%s2376_s0 + $0x460] sm:$0xff]  ;;  %v57_v53 = vld [vmem:[%s2376_s0 + $0x158] sm:$0xff] }
  0x54   :  { %v157_v54 = vld [vmem:[%s2376_s0 + $0x478] sm:$0xff] }
  0x56   :  { %343 = vmatmul.mubr.f32.gmra.mxu0 %v24_v55  ;;  %593 = vmatmul.mubr.f32.gmra.mxu1 %v124_v56  ;;  %v56_v55 = vld [vmem:[%s2376_s0 + $0x150] sm:$0xff] }
  0x57   :  { %347 = vmatprep.mubr.f32.mxu0 %v27_v57  ;;  %597 = vmatprep.mubr.f32.mxu1 %v127_v58  ;;  %v156_v56 = vld [vmem:[%s2376_s0 + $0x470] sm:$0xff]  ;;  %v59_v57 = vld [vmem:[%s2376_s0 + $0x168] sm:$0xff] }
  0x58   :  { %v159_v58 = vld [vmem:[%s2376_s0 + $0x488] sm:$0xff] }
  0x5a   :  { %348 = vmatmul.mubr.f32.gmra.mxu0 %v26_v59  ;;  %598 = vmatmul.mubr.f32.gmra.mxu1 %v126_v60  ;;  %v58_v59 = vld [vmem:[%s2376_s0 + $0x160] sm:$0xff] }
  0x5b   :  { %352 = vmatprep.mubr.f32.mxu0 %v29_v61  ;;  %602 = vmatprep.mubr.f32.mxu1 %v129_v62  ;;  %v158_v60 = vld [vmem:[%s2376_s0 + $0x480] sm:$0xff]  ;;  %v61_v61 = vld [vmem:[%s2376_s0 + $0x178] sm:$0xff] }
  0x5c   :  { %v161_v62 = vld [vmem:[%s2376_s0 + $0x498] sm:$0xff] }
  0x5e   :  { %353 = vmatmul.mubr.f32.gmra.mxu0 %v28_v63  ;;  %603 = vmatmul.mubr.f32.gmra.mxu1 %v128_v0  ;;  %v60_v63 = vld [vmem:[%s2376_s0 + $0x170] sm:$0xff] }
  0x5f   :  { %357 = vmatprep.mubr.f32.mxu0 %v31_v1  ;;  %607 = vmatprep.mubr.f32.mxu1 %v131_v2  ;;  %v160_v0 = vld [vmem:[%s2376_s0 + $0x490] sm:$0xff]  ;;  %v63_v1 = vld [vmem:[%s2376_s0 + $0x188] sm:$0xff] }
  0x60   :  { %v163_v2 = vld [vmem:[%s2376_s0 + $0x4a8] sm:$0xff] }
  0x62   :  { %358 = vmatmul.mubr.f32.gmra.mxu0 %v30_v3  ;;  %608 = vmatmul.mubr.f32.gmra.mxu1 %v130_v4  ;;  %v62_v3 = vld [vmem:[%s2376_s0 + $0x180] sm:$0xff] }
  0x63   :  { %362 = vmatprep.mubr.f32.mxu0 %v33_v5  ;;  %612 = vmatprep.mubr.f32.mxu1 %v133_v6  ;;  %v162_v4 = vld [vmem:[%s2376_s0 + $0x4a0] sm:$0xff]  ;;  %v65_v5 = vld [vmem:[%s2376_s0 + $0x198] sm:$0xff] }
  0x64   :  { %v165_v6 = vld [vmem:[%s2376_s0 + $0x4b8] sm:$0xff] }
  0x66   :  { %363 = vmatmul.mubr.f32.gmra.mxu0 %v32_v7  ;;  %613 = vmatmul.mubr.f32.gmra.mxu1 %v132_v8  ;;  %v64_v7 = vld [vmem:[%s2376_s0 + $0x190] sm:$0xff] }
  0x67   :  { %367 = vmatprep.mubr.f32.mxu0 %v35_v9  ;;  %617 = vmatprep.mubr.f32.mxu1 %v135_v10  ;;  %v164_v8 = vld [vmem:[%s2376_s0 + $0x4b0] sm:$0xff]  ;;  %v67_v9 = vld [vmem:[%s2376_s0 + $0x1a8] sm:$0xff] }
  0x68   :  { %v167_v10 = vld [vmem:[%s2376_s0 + $0x4c8] sm:$0xff] }
  0x6a   :  { %368 = vmatmul.mubr.f32.gmra.mxu0 %v34_v11  ;;  %618 = vmatmul.mubr.f32.gmra.mxu1 %v134_v12  ;;  %v66_v11 = vld [vmem:[%s2376_s0 + $0x1a0] sm:$0xff] }
  0x6b   :  { %372 = vmatprep.mubr.f32.mxu0 %v37_v13  ;;  %622 = vmatprep.mubr.f32.mxu1 %v137_v14  ;;  %v166_v12 = vld [vmem:[%s2376_s0 + $0x4c0] sm:$0xff]  ;;  %v69_v13 = vld [vmem:[%s2376_s0 + $0x1b8] sm:$0xff] }
  0x6c   :  { %v169_v14 = vld [vmem:[%s2376_s0 + $0x4d8] sm:$0xff] }
  0x6e   :  { %373 = vmatmul.mubr.f32.gmra.mxu0 %v36_v15  ;;  %623 = vmatmul.mubr.f32.gmra.mxu1 %v136_v16  ;;  %v68_v15 = vld [vmem:[%s2376_s0 + $0x1b0] sm:$0xff] }
  0x6f   :  { %377 = vmatprep.mubr.f32.mxu0 %v39_v17  ;;  %627 = vmatprep.mubr.f32.mxu1 %v139_v18  ;;  %v168_v16 = vld [vmem:[%s2376_s0 + $0x4d0] sm:$0xff]  ;;  %v71_v17 = vld [vmem:[%s2376_s0 + $0x1c8] sm:$0xff] }
  0x70   :  { %v171_v18 = vld [vmem:[%s2376_s0 + $0x4e8] sm:$0xff] }
  0x72   :  { %378 = vmatmul.mubr.f32.gmra.mxu0 %v38_v19  ;;  %628 = vmatmul.mubr.f32.gmra.mxu1 %v138_v20  ;;  %v70_v19 = vld [vmem:[%s2376_s0 + $0x1c0] sm:$0xff] }
  0x73   :  { %382 = vmatprep.mubr.f32.mxu0 %v41_v21  ;;  %632 = vmatprep.mubr.f32.mxu1 %v141_v22  ;;  %v170_v20 = vld [vmem:[%s2376_s0 + $0x4e0] sm:$0xff]  ;;  %v73_v21 = vld [vmem:[%s2376_s0 + $0x1d8] sm:$0xff] }
  0x74   :  { %v173_v22 = vld [vmem:[%s2376_s0 + $0x4f8] sm:$0xff] }
  0x76   :  { %383 = vmatmul.mubr.f32.gmra.mxu0 %v40_v23  ;;  %633 = vmatmul.mubr.f32.gmra.mxu1 %v140_v24  ;;  %v72_v23 = vld [vmem:[%s2376_s0 + $0x1d0] sm:$0xff] }
  0x77   :  { %387 = vmatprep.mubr.f32.mxu0 %v43_v25  ;;  %637 = vmatprep.mubr.f32.mxu1 %v143_v26  ;;  %v172_v24 = vld [vmem:[%s2376_s0 + $0x4f0] sm:$0xff]  ;;  %v75_v25 = vld [vmem:[%s2376_s0 + $0x1e8] sm:$0xff] }
  0x78   :  { %v175_v26 = vld [vmem:[%s2376_s0 + $0x508] sm:$0xff] }
  0x7a   :  { %388 = vmatmul.mubr.f32.gmra.mxu0 %v42_v27  ;;  %638 = vmatmul.mubr.f32.gmra.mxu1 %v142_v28  ;;  %v74_v27 = vld [vmem:[%s2376_s0 + $0x1e0] sm:$0xff] }
  0x7b   :  { %392 = vmatprep.mubr.f32.mxu0 %v45_v29  ;;  %642 = vmatprep.mubr.f32.mxu1 %v145_v30  ;;  %v174_v28 = vld [vmem:[%s2376_s0 + $0x500] sm:$0xff]  ;;  %v77_v29 = vld [vmem:[%s2376_s0 + $0x1f8] sm:$0xff] }
  0x7c   :  { %v177_v30 = vld [vmem:[%s2376_s0 + $0x518] sm:$0xff] }
  0x7e   :  { %393 = vmatmul.mubr.f32.gmra.mxu0 %v44_v31  ;;  %643 = vmatmul.mubr.f32.gmra.mxu1 %v144_v32  ;;  %v76_v31 = vld [vmem:[%s2376_s0 + $0x1f0] sm:$0xff] }
  0x7f   :  { %397 = vmatprep.mubr.f32.mxu0 %v47_v33  ;;  %647 = vmatprep.mubr.f32.mxu1 %v147_v34  ;;  %v176_v32 = vld [vmem:[%s2376_s0 + $0x510] sm:$0xff]  ;;  %v79_v33 = vld [vmem:[%s2376_s0 + $0x208] sm:$0xff] }
  0x80   :  { %v179_v34 = vld [vmem:[%s2376_s0 + $0x528] sm:$0xff] }
  0x82   :  { %398 = vmatmul.mubr.f32.gmra.mxu0 %v46_v35  ;;  %648 = vmatmul.mubr.f32.gmra.mxu1 %v146_v36  ;;  %v78_v35 = vld [vmem:[%s2376_s0 + $0x200] sm:$0xff] }
  0x83   :  { %402 = vmatprep.mubr.f32.mxu0 %v49_v37  ;;  %652 = vmatprep.mubr.f32.mxu1 %v149_v38  ;;  %v178_v36 = vld [vmem:[%s2376_s0 + $0x520] sm:$0xff]  ;;  %v81_v37 = vld [vmem:[%s2376_s0 + $0x218] sm:$0xff] }
  0x84   :  { %v181_v38 = vld [vmem:[%s2376_s0 + $0x538] sm:$0xff] }
  0x86   :  { %403 = vmatmul.mubr.f32.gmra.mxu0 %v48_v39  ;;  %653 = vmatmul.mubr.f32.gmra.mxu1 %v148_v40  ;;  %v80_v39 = vld [vmem:[%s2376_s0 + $0x210] sm:$0xff] }
  0x87   :  { %407 = vmatprep.mubr.f32.mxu0 %v51_v41  ;;  %657 = vmatprep.mubr.f32.mxu1 %v151_v42  ;;  %v180_v40 = vld [vmem:[%s2376_s0 + $0x530] sm:$0xff]  ;;  %v83_v41 = vld [vmem:[%s2376_s0 + $0x228] sm:$0xff] }
  0x88   :  { %v183_v42 = vld [vmem:[%s2376_s0 + $0x548] sm:$0xff] }
  0x8a   :  { %408 = vmatmul.mubr.f32.gmra.mxu0 %v50_v43  ;;  %658 = vmatmul.mubr.f32.gmra.mxu1 %v150_v44  ;;  %v82_v43 = vld [vmem:[%s2376_s0 + $0x220] sm:$0xff] }
  0x8b   :  { %412 = vmatprep.mubr.f32.mxu0 %v53_v45  ;;  %662 = vmatprep.mubr.f32.mxu1 %v153_v46  ;;  %v182_v44 = vld [vmem:[%s2376_s0 + $0x540] sm:$0xff]  ;;  %v85_v45 = vld [vmem:[%s2376_s0 + $0x238] sm:$0xff] }
  0x8c   :  { %v185_v46 = vld [vmem:[%s2376_s0 + $0x558] sm:$0xff] }
  0x8e   :  { %413 = vmatmul.mubr.f32.gmra.mxu0 %v52_v47  ;;  %663 = vmatmul.mubr.f32.gmra.mxu1 %v152_v48  ;;  %v84_v47 = vld [vmem:[%s2376_s0 + $0x230] sm:$0xff] }
  0x8f   :  { %417 = vmatprep.mubr.f32.mxu0 %v55_v49  ;;  %667 = vmatprep.mubr.f32.mxu1 %v155_v50  ;;  %v184_v48 = vld [vmem:[%s2376_s0 + $0x550] sm:$0xff]  ;;  %v87_v49 = vld [vmem:[%s2376_s0 + $0x248] sm:$0xff] }
  0x90   :  { %v187_v50 = vld [vmem:[%s2376_s0 + $0x568] sm:$0xff] }
  0x92   :  { %418 = vmatmul.mubr.f32.gmra.mxu0 %v54_v51  ;;  %668 = vmatmul.mubr.f32.gmra.mxu1 %v154_v52  ;;  %v86_v51 = vld [vmem:[%s2376_s0 + $0x240] sm:$0xff] }
  0x93   :  { %422 = vmatprep.mubr.f32.mxu0 %v57_v53  ;;  %672 = vmatprep.mubr.f32.mxu1 %v157_v54  ;;  %v186_v52 = vld [vmem:[%s2376_s0 + $0x560] sm:$0xff]  ;;  %v89_v53 = vld [vmem:[%s2376_s0 + $0x258] sm:$0xff] }
  0x94   :  { %v189_v54 = vld [vmem:[%s2376_s0 + $0x578] sm:$0xff] }
  0x96   :  { %423 = vmatmul.mubr.f32.gmra.mxu0 %v56_v55  ;;  %673 = vmatmul.mubr.f32.gmra.mxu1 %v156_v56  ;;  %v88_v55 = vld [vmem:[%s2376_s0 + $0x250] sm:$0xff] }
  0x97   :  { %427 = vmatprep.mubr.f32.mxu0 %v59_v57  ;;  %677 = vmatprep.mubr.f32.mxu1 %v159_v58  ;;  %v188_v56 = vld [vmem:[%s2376_s0 + $0x570] sm:$0xff]  ;;  %v91_v57 = vld [vmem:[%s2376_s0 + $0x268] sm:$0xff] }
  0x98   :  { %v191_v58 = vld [vmem:[%s2376_s0 + $0x588] sm:$0xff] }
  0x9a   :  { %428 = vmatmul.mubr.f32.gmra.mxu0 %v58_v59  ;;  %678 = vmatmul.mubr.f32.gmra.mxu1 %v158_v60  ;;  %v90_v59 = vld [vmem:[%s2376_s0 + $0x260] sm:$0xff] }
  0x9b   :  { %432 = vmatprep.mubr.f32.mxu0 %v61_v61  ;;  %682 = vmatprep.mubr.f32.mxu1 %v161_v62  ;;  %v190_v60 = vld [vmem:[%s2376_s0 + $0x580] sm:$0xff]  ;;  %v93_v61 = vld [vmem:[%s2376_s0 + $0x278] sm:$0xff] }
  0x9c   :  { %v193_v62 = vld [vmem:[%s2376_s0 + $0x598] sm:$0xff] }
  0x9e   :  { %433 = vmatmul.mubr.f32.gmra.mxu0 %v60_v63  ;;  %683 = vmatmul.mubr.f32.gmra.mxu1 %v160_v0  ;;  %v92_v63 = vld [vmem:[%s2376_s0 + $0x270] sm:$0xff] }
  0x9f   :  { %437 = vmatprep.mubr.f32.mxu0 %v63_v1  ;;  %687 = vmatprep.mubr.f32.mxu1 %v163_v2  ;;  %v192_v0 = vld [vmem:[%s2376_s0 + $0x590] sm:$0xff]  ;;  %v95_v1 = vld [vmem:[%s2376_s0 + $0x288] sm:$0xff] }
  0xa0   :  { %v195_v2 = vld [vmem:[%s2376_s0 + $0x5a8] sm:$0xff] }
  0xa2   :  { %438 = vmatmul.mubr.f32.gmra.mxu0 %v62_v3  ;;  %688 = vmatmul.mubr.f32.gmra.mxu1 %v162_v4  ;;  %v94_v3 = vld [vmem:[%s2376_s0 + $0x280] sm:$0xff] }
  0xa3   :  { %442 = vmatprep.mubr.f32.mxu0 %v65_v5  ;;  %692 = vmatprep.mubr.f32.mxu1 %v165_v6  ;;  %v194_v4 = vld [vmem:[%s2376_s0 + $0x5a0] sm:$0xff]  ;;  %v97_v5 = vld [vmem:[%s2376_s0 + $0x298] sm:$0xff] }
  0xa4   :  { %v197_v6 = vld [vmem:[%s2376_s0 + $0x5b8] sm:$0xff] }
  0xa6   :  { %443 = vmatmul.mubr.f32.gmra.mxu0 %v64_v7  ;;  %693 = vmatmul.mubr.f32.gmra.mxu1 %v164_v8  ;;  %v96_v7 = vld [vmem:[%s2376_s0 + $0x290] sm:$0xff] }
  0xa7   :  { %447 = vmatprep.mubr.f32.mxu0 %v67_v9  ;;  %697 = vmatprep.mubr.f32.mxu1 %v167_v10  ;;  %v196_v8 = vld [vmem:[%s2376_s0 + $0x5b0] sm:$0xff]  ;;  %v99_v9 = vld [vmem:[%s2376_s0 + $0x2a8] sm:$0xff] }
  0xa8   :  { %v199_v10 = vld [vmem:[%s2376_s0 + $0x5c8] sm:$0xff] }
  0xaa   :  { %448 = vmatmul.mubr.f32.gmra.mxu0 %v66_v11  ;;  %698 = vmatmul.mubr.f32.gmra.mxu1 %v166_v12  ;;  %v98_v11 = vld [vmem:[%s2376_s0 + $0x2a0] sm:$0xff] }
  0xab   :  { %452 = vmatprep.mubr.f32.mxu0 %v69_v13  ;;  %702 = vmatprep.mubr.f32.mxu1 %v169_v14  ;;  %v198_v12 = vld [vmem:[%s2376_s0 + $0x5c0] sm:$0xff]  ;;  %v101_v13 = vld [vmem:[%s2376_s0 + $0x2b8] sm:$0xff] }
  0xac   :  { %v201_v14 = vld [vmem:[%s2376_s0 + $0x5d8] sm:$0xff] }
  0xae   :  { %453 = vmatmul.mubr.f32.gmra.mxu0 %v68_v15  ;;  %703 = vmatmul.mubr.f32.gmra.mxu1 %v168_v16  ;;  %v100_v15 = vld [vmem:[%s2376_s0 + $0x2b0] sm:$0xff] }
  0xaf   :  { %457 = vmatprep.mubr.f32.mxu0 %v71_v17  ;;  %707 = vmatprep.mubr.f32.mxu1 %v171_v18  ;;  %v200_v16 = vld [vmem:[%s2376_s0 + $0x5d0] sm:$0xff]  ;;  %v103_v17 = vld [vmem:[%s2376_s0 + $0x2c8] sm:$0xff] }
  0xb0   :  { %v203_v18 = vld [vmem:[%s2376_s0 + $0x5e8] sm:$0xff] }
  0xb2   :  { %458 = vmatmul.mubr.f32.gmra.mxu0 %v70_v19  ;;  %708 = vmatmul.mubr.f32.gmra.mxu1 %v170_v20  ;;  %v102_v19 = vld [vmem:[%s2376_s0 + $0x2c0] sm:$0xff] }
  0xb3   :  { %462 = vmatprep.mubr.f32.mxu0 %v73_v21  ;;  %712 = vmatprep.mubr.f32.mxu1 %v173_v22  ;;  %v202_v20 = vld [vmem:[%s2376_s0 + $0x5e0] sm:$0xff]  ;;  %v105_v21 = vld [vmem:[%s2376_s0 + $0x2d8] sm:$0xff] }
  0xb4   :  { %v205_v22 = vld [vmem:[%s2376_s0 + $0x5f8] sm:$0xff] }
  0xb6   :  { %463 = vmatmul.mubr.f32.gmra.mxu0 %v72_v23  ;;  %713 = vmatmul.mubr.f32.gmra.mxu1 %v172_v24  ;;  %v104_v23 = vld [vmem:[%s2376_s0 + $0x2d0] sm:$0xff] }
  0xb7   :  { %467 = vmatprep.mubr.f32.mxu0 %v75_v25  ;;  %717 = vmatprep.mubr.f32.mxu1 %v175_v26  ;;  %v204_v24 = vld [vmem:[%s2376_s0 + $0x5f0] sm:$0xff]  ;;  %v107_v25 = vld [vmem:[%s2376_s0 + $0x2e8] sm:$0xff] }
  0xb8   :  { %v207_v26 = vld [vmem:[%s2376_s0 + $0x608] sm:$0xff] }
  0xba   :  { %468 = vmatmul.mubr.f32.gmra.mxu0 %v74_v27  ;;  %718 = vmatmul.mubr.f32.gmra.mxu1 %v174_v28  ;;  %v106_v27 = vld [vmem:[%s2376_s0 + $0x2e0] sm:$0xff] }
  0xbb   :  { %472 = vmatprep.mubr.f32.mxu0 %v77_v29  ;;  %722 = vmatprep.mubr.f32.mxu1 %v177_v30  ;;  %v206_v28 = vld [vmem:[%s2376_s0 + $0x600] sm:$0xff]  ;;  %v109_v29 = vld [vmem:[%s2376_s0 + $0x2f8] sm:$0xff] }
  0xbc   :  { %v209_v30 = vld [vmem:[%s2376_s0 + $0x618] sm:$0xff] }
  0xbe   :  { %473 = vmatmul.mubr.f32.gmra.mxu0 %v76_v31  ;;  %723 = vmatmul.mubr.f32.gmra.mxu1 %v176_v32  ;;  %v108_v31 = vld [vmem:[%s2376_s0 + $0x2f0] sm:$0xff] }
  0xbf   :  { %477 = vmatprep.mubr.f32.mxu0 %v79_v33  ;;  %727 = vmatprep.mubr.f32.mxu1 %v179_v34  ;;  %v208_v32 = vld [vmem:[%s2376_s0 + $0x610] sm:$0xff]  ;;  %v111_v33 = vld [vmem:[%s2376_s0 + $0x308] sm:$0xff] }
  0xc0   :  { %v211_v34 = vld [vmem:[%s2376_s0 + $0x628] sm:$0xff] }
  0xc2   :  { %478 = vmatmul.mubr.f32.gmra.mxu0 %v78_v35  ;;  %728 = vmatmul.mubr.f32.gmra.mxu1 %v178_v36  ;;  %v110_v35 = vld [vmem:[%s2376_s0 + $0x300] sm:$0xff] }
  0xc3   :  { %482 = vmatprep.mubr.f32.mxu0 %v81_v37  ;;  %732 = vmatprep.mubr.f32.mxu1 %v181_v38  ;;  %v210_v36 = vld [vmem:[%s2376_s0 + $0x620] sm:$0xff]  ;;  %v113_v38 = vld [vmem:[%s2376_s0 + $0x318] sm:$0xff] }
  0xc4   :  { %v1861_v37 = vld [vmem:[%s2377_s2] ss:$0 sm:$0xff] }
  0xc6   :  { %483 = vmatmul.mubr.f32.gmra.mxu0 %v80_v39  ;;  %733 = vmatmul.mubr.f32.gmra.mxu1 %v180_v40  ;;  %v213_v39 = vld [vmem:[%s2376_s0 + $0x638] sm:$0xff] }
  0xc7   :  { %487 = vmatprep.mubr.f32.mxu0 %v83_v41  ;;  %737 = vmatprep.mubr.f32.mxu1 %v183_v42 }
  0xca   :  { %488 = vmatmul.mubr.f32.gmra.mxu0 %v82_v43  ;;  %738 = vmatmul.mubr.f32.gmra.mxu1 %v182_v44  ;;  %v112_v44 = vld [vmem:[%s2376_s0 + $0x310] sm:$0xff] }
  0xcb   :  { %492 = vmatprep.mubr.f32.mxu0 %v85_v45  ;;  %742 = vmatprep.mubr.f32.mxu1 %v185_v46  ;;  %v212_v45 = vld [vmem:[%s2376_s0 + $0x630] sm:$0xff] }
  0xce   :  { %493 = vmatmul.mubr.f32.gmra.mxu0 %v84_v47  ;;  %743 = vmatmul.mubr.f32.gmra.mxu1 %v184_v48 }
  0xcf   :  { %497 = vmatprep.mubr.f32.mxu0 %v87_v49  ;;  %747 = vmatprep.mubr.f32.mxu1 %v187_v50 }
  0xd2   :  { %498 = vmatmul.mubr.f32.gmra.mxu0 %v86_v51  ;;  %748 = vmatmul.mubr.f32.gmra.mxu1 %v186_v52 }
  0xd3   :  { %502 = vmatprep.mubr.f32.mxu0 %v89_v53  ;;  %752 = vmatprep.mubr.f32.mxu1 %v189_v54 }
  0xd6   :  { %503 = vmatmul.mubr.f32.gmra.mxu0 %v88_v55  ;;  %753 = vmatmul.mubr.f32.gmra.mxu1 %v188_v56 }
  0xd7   :  { %507 = vmatprep.mubr.f32.mxu0 %v91_v57  ;;  %757 = vmatprep.mubr.f32.mxu1 %v191_v58 }
  0xda   :  { %508 = vmatmul.mubr.f32.gmra.mxu0 %v90_v59  ;;  %758 = vmatmul.mubr.f32.gmra.mxu1 %v190_v60 }
  0xdb   :  { %512 = vmatprep.mubr.f32.mxu0 %v93_v61  ;;  %762 = vmatprep.mubr.f32.mxu1 %v193_v62 }
  0xde   :  { %513 = vmatmul.mubr.f32.gmra.mxu0 %v92_v63  ;;  %763 = vmatmul.mubr.f32.gmra.mxu1 %v192_v0 }
  0xdf   :  { %517 = vmatprep.mubr.f32.mxu0 %v95_v1  ;;  %767 = vmatprep.mubr.f32.mxu1 %v195_v2 }
  0xe2   :  { %518 = vmatmul.mubr.f32.gmra.mxu0 %v94_v3  ;;  %768 = vmatmul.mubr.f32.gmra.mxu1 %v194_v4 }
  0xe3   :  { %522 = vmatprep.mubr.f32.mxu0 %v97_v5  ;;  %772 = vmatprep.mubr.f32.mxu1 %v197_v6 }
  0xe6   :  { %523 = vmatmul.mubr.f32.gmra.mxu0 %v96_v7  ;;  %773 = vmatmul.mubr.f32.gmra.mxu1 %v196_v8 }
  0xe7   :  { %527 = vmatprep.mubr.f32.mxu0 %v99_v9  ;;  %777 = vmatprep.mubr.f32.mxu1 %v199_v10 }
  0xea   :  { %528 = vmatmul.mubr.f32.gmra.mxu0 %v98_v11  ;;  %778 = vmatmul.mubr.f32.gmra.mxu1 %v198_v12 }
  0xeb   :  { %532 = vmatprep.mubr.f32.mxu0 %v101_v13  ;;  %782 = vmatprep.mubr.f32.mxu1 %v201_v14 }
  0xee   :  { %533 = vmatmul.mubr.f32.gmra.mxu0 %v100_v15  ;;  %783 = vmatmul.mubr.f32.gmra.mxu1 %v200_v16 }
  0xef   :  { %537 = vmatprep.mubr.f32.mxu0 %v103_v17  ;;  %787 = vmatprep.mubr.f32.mxu1 %v203_v18 }
  0xf2   :  { %538 = vmatmul.mubr.f32.gmra.mxu0 %v102_v19  ;;  %788 = vmatmul.mubr.f32.gmra.mxu1 %v202_v20 }
  0xf3   :  { %542 = vmatprep.mubr.f32.mxu0 %v105_v21  ;;  %792 = vmatprep.mubr.f32.mxu1 %v205_v22 }
  0xf6   :  { %543 = vmatmul.mubr.f32.gmra.mxu0 %v104_v23  ;;  %793 = vmatmul.mubr.f32.gmra.mxu1 %v204_v24 }
  0xf7   :  { %547 = vmatprep.mubr.f32.mxu0 %v107_v25  ;;  %797 = vmatprep.mubr.f32.mxu1 %v207_v26 }
  0xfa   :  { %548 = vmatmul.mubr.f32.gmra.mxu0 %v106_v27  ;;  %798 = vmatmul.mubr.f32.gmra.mxu1 %v206_v28 }
  0xfb   :  { %552 = vmatprep.mubr.f32.mxu0 %v109_v29  ;;  %802 = vmatprep.mubr.f32.mxu1 %v209_v30 }
  0xfe   :  { %553 = vmatmul.mubr.f32.gmra.mxu0 %v108_v31  ;;  %803 = vmatmul.mubr.f32.gmra.mxu1 %v208_v32 }
  0xff   :  { %557 = vmatprep.mubr.f32.mxu0 %v111_v33  ;;  %807 = vmatprep.mubr.f32.mxu1 %v211_v34 }
 0x102   :  { %v319_v40 = vpop.f32.mrf.mxu0  ;;  %558 = vmatmul.mubr.f32.gmra.mxu0 %v110_v35  ;;  %v569_v41 = vpop.f32.mrf.mxu1  ;;  %808 = vmatmul.mubr.f32.gmra.mxu1 %v210_v36 }
 0x103   :  { %v320_v42 = vadd.f32 %v1861_v37, %v319_v40  ;;  %v570_v43 = vadd.f32 %v1861_v37, %v569_v41  ;;  %562 = vmatprep.mubr.f32.mxu0 %v113_v38  ;;  %812 = vmatprep.mubr.f32.mxu1 %v213_v39 }
 0x104   :  { %v321_v46 = vpop.f32.mrf.mxu0  ;;  %v571_v47 = vpop.f32.mrf.mxu1 }
 0x105   :  { %v818_v48 = vmax.f32 %v320_v42, 0.0  ;;  %v868_v49 = vmax.f32 %v570_v43, 0.0 }
 0x106   :  { %v324_v50 = vpop.f32.mrf.mxu0  ;;  %563 = vmatmul.mubr.f32.gmra.mxu0 %v112_v44  ;;  %v574_v51 = vpop.f32.mrf.mxu1  ;;  %813 = vmatmul.mubr.f32.gmra.mxu1 %v212_v45 }
 0x107   :  { %919 = vst.msk [vmem:[%s2378_s3] sm:$0xff] %vm918_vm0, %v818_v48  ;;  %969 = vst.msk [vmem:[%s2378_s3 + $0x190] sm:$0xff] %vm918_vm0, %v868_v49  ;;  %v325_v52 = vadd.f32 %v1861_v37, %v324_v50  ;;  %v575_v53 = vadd.f32 %v1861_v37, %v574_v51 }
 0x108   :  { %v326_v54 = vpop.f32.mrf.mxu0  ;;  %v576_v55 = vpop.f32.mrf.mxu1 }
 0x109   :  { %v819_v56 = vmax.f32 %v325_v52, 0.0  ;;  %v869_v57 = vmax.f32 %v575_v53, 0.0 }
 0x10a   :  { %v329_v58 = vpop.f32.mrf.mxu0  ;;  %v579_v59 = vpop.f32.mrf.mxu1 }
 0x10b   :  { %920 = vst.msk [vmem:[%s2378_s3 + $0x8] sm:$0xff] %vm918_vm0, %v819_v56  ;;  %970 = vst.msk [vmem:[%s2378_s3 + $0x198] sm:$0xff] %vm918_vm0, %v869_v57  ;;  %v330_v60 = vadd.f32 %v1861_v37, %v329_v58  ;;  %v580_v61 = vadd.f32 %v1861_v37, %v579_v59 }
 0x10c   :  { %v331_v62 = vpop.f32.mrf.mxu0  ;;  %v581_v63 = vpop.f32.mrf.mxu1 }
 0x10d   :  { %v820_v0 = vmax.f32 %v330_v60, 0.0  ;;  %v870_v1 = vmax.f32 %v580_v61, 0.0 }
 0x10e   :  { %v334_v2 = vpop.f32.mrf.mxu0  ;;  %v584_v3 = vpop.f32.mrf.mxu1 }
 0x10f   :  { %921 = vst.msk [vmem:[%s2378_s3 + $0x10] sm:$0xff] %vm918_vm0, %v820_v0  ;;  %971 = vst.msk [vmem:[%s2378_s3 + $0x1a0] sm:$0xff] %vm918_vm0, %v870_v1  ;;  %v335_v4 = vadd.f32 %v1861_v37, %v334_v2  ;;  %v585_v5 = vadd.f32 %v1861_v37, %v584_v3 }
 0x110   :  { %v336_v6 = vpop.f32.mrf.mxu0  ;;  %v586_v7 = vpop.f32.mrf.mxu1 }
 0x111   :  { %v821_v8 = vmax.f32 %v335_v4, 0.0  ;;  %v871_v9 = vmax.f32 %v585_v5, 0.0 }
 0x112   :  { %v339_v10 = vpop.f32.mrf.mxu0  ;;  %v589_v11 = vpop.f32.mrf.mxu1 }
 0x113   :  { %922 = vst.msk [vmem:[%s2378_s3 + $0x18] sm:$0xff] %vm918_vm0, %v821_v8  ;;  %972 = vst.msk [vmem:[%s2378_s3 + $0x1a8] sm:$0xff] %vm918_vm0, %v871_v9  ;;  %v340_v12 = vadd.f32 %v1861_v37, %v339_v10  ;;  %v590_v13 = vadd.f32 %v1861_v37, %v589_v11 }
 0x114   :  { %v341_v14 = vpop.f32.mrf.mxu0  ;;  %v591_v15 = vpop.f32.mrf.mxu1 }
 0x115   :  { %v822_v16 = vmax.f32 %v340_v12, 0.0  ;;  %v872_v17 = vmax.f32 %v590_v13, 0.0 }
 0x116   :  { %v344_v18 = vpop.f32.mrf.mxu0  ;;  %v594_v19 = vpop.f32.mrf.mxu1 }
 0x117   :  { %923 = vst.msk [vmem:[%s2378_s3 + $0x20] sm:$0xff] %vm918_vm0, %v822_v16  ;;  %973 = vst.msk [vmem:[%s2378_s3 + $0x1b0] sm:$0xff] %vm918_vm0, %v872_v17  ;;  %v345_v20 = vadd.f32 %v1861_v37, %v344_v18  ;;  %v595_v21 = vadd.f32 %v1861_v37, %v594_v19 }
 0x118   :  { %v346_v22 = vpop.f32.mrf.mxu0  ;;  %v596_v23 = vpop.f32.mrf.mxu1 }
 0x119   :  { %v823_v24 = vmax.f32 %v345_v20, 0.0  ;;  %v873_v25 = vmax.f32 %v595_v21, 0.0 }
 0x11a   :  { %v349_v26 = vpop.f32.mrf.mxu0  ;;  %v599_v27 = vpop.f32.mrf.mxu1 }
 0x11b   :  { %924 = vst.msk [vmem:[%s2378_s3 + $0x28] sm:$0xff] %vm918_vm0, %v823_v24  ;;  %974 = vst.msk [vmem:[%s2378_s3 + $0x1b8] sm:$0xff] %vm918_vm0, %v873_v25  ;;  %v350_v28 = vadd.f32 %v1861_v37, %v349_v26  ;;  %v600_v29 = vadd.f32 %v1861_v37, %v599_v27 }
 0x11c   :  { %v351_v30 = vpop.f32.mrf.mxu0  ;;  %v601_v31 = vpop.f32.mrf.mxu1 }
 0x11d   :  { %v824_v32 = vmax.f32 %v350_v28, 0.0  ;;  %v874_v33 = vmax.f32 %v600_v29, 0.0 }
 0x11e   :  { %v354_v34 = vpop.f32.mrf.mxu0  ;;  %v604_v35 = vpop.f32.mrf.mxu1 }
 0x11f   :  { %925 = vst.msk [vmem:[%s2378_s3 + $0x30] sm:$0xff] %vm918_vm0, %v824_v32  ;;  %975 = vst.msk [vmem:[%s2378_s3 + $0x1c0] sm:$0xff] %vm918_vm0, %v874_v33  ;;  %v355_v36 = vadd.f32 %v1861_v37, %v354_v34  ;;  %v605_v38 = vadd.f32 %v1861_v37, %v604_v35 }
 0x120   :  { %v356_v39 = vpop.f32.mrf.mxu0  ;;  %v606_v40 = vpop.f32.mrf.mxu1 }
 0x121   :  { %v825_v41 = vmax.f32 %v355_v36, 0.0  ;;  %v875_v42 = vmax.f32 %v605_v38, 0.0 }
 0x122   :  { %v359_v43 = vpop.f32.mrf.mxu0  ;;  %v609_v44 = vpop.f32.mrf.mxu1 }
 0x123   :  { %926 = vst.msk [vmem:[%s2378_s3 + $0x38] sm:$0xff] %vm918_vm0, %v825_v41  ;;  %976 = vst.msk [vmem:[%s2378_s3 + $0x1c8] sm:$0xff] %vm918_vm0, %v875_v42  ;;  %v360_v45 = vadd.f32 %v1861_v37, %v359_v43  ;;  %v610_v46 = vadd.f32 %v1861_v37, %v609_v44 }
 0x124   :  { %v361_v47 = vpop.f32.mrf.mxu0  ;;  %v611_v48 = vpop.f32.mrf.mxu1 }
 0x125   :  { %v826_v49 = vmax.f32 %v360_v45, 0.0  ;;  %v876_v50 = vmax.f32 %v610_v46, 0.0 }
 0x126   :  { %v364_v51 = vpop.f32.mrf.mxu0  ;;  %v614_v52 = vpop.f32.mrf.mxu1 }
 0x127   :  { %927 = vst.msk [vmem:[%s2378_s3 + $0x40] sm:$0xff] %vm918_vm0, %v826_v49  ;;  %977 = vst.msk [vmem:[%s2378_s3 + $0x1d0] sm:$0xff] %vm918_vm0, %v876_v50  ;;  %v365_v53 = vadd.f32 %v1861_v37, %v364_v51  ;;  %v615_v54 = vadd.f32 %v1861_v37, %v614_v52 }
 0x128   :  { %v366_v55 = vpop.f32.mrf.mxu0  ;;  %v616_v56 = vpop.f32.mrf.mxu1 }
 0x129   :  { %v827_v57 = vmax.f32 %v365_v53, 0.0  ;;  %v877_v58 = vmax.f32 %v615_v54, 0.0 }
 0x12a   :  { %v369_v59 = vpop.f32.mrf.mxu0  ;;  %v619_v60 = vpop.f32.mrf.mxu1 }
 0x12b   :  { %928 = vst.msk [vmem:[%s2378_s3 + $0x48] sm:$0xff] %vm918_vm0, %v827_v57  ;;  %978 = vst.msk [vmem:[%s2378_s3 + $0x1d8] sm:$0xff] %vm918_vm0, %v877_v58  ;;  %v370_v61 = vadd.f32 %v1861_v37, %v369_v59  ;;  %v620_v62 = vadd.f32 %v1861_v37, %v619_v60 }
 0x12c   :  { %v371_v63 = vpop.f32.mrf.mxu0  ;;  %v621_v0 = vpop.f32.mrf.mxu1 }
 0x12d   :  { %v828_v1 = vmax.f32 %v370_v61, 0.0  ;;  %v878_v2 = vmax.f32 %v620_v62, 0.0 }
 0x12e   :  { %v374_v3 = vpop.f32.mrf.mxu0  ;;  %v624_v4 = vpop.f32.mrf.mxu1 }
 0x12f   :  { %929 = vst.msk [vmem:[%s2378_s3 + $0x50] sm:$0xff] %vm918_vm0, %v828_v1  ;;  %979 = vst.msk [vmem:[%s2378_s3 + $0x1e0] sm:$0xff] %vm918_vm0, %v878_v2  ;;  %v375_v5 = vadd.f32 %v1861_v37, %v374_v3  ;;  %v625_v6 = vadd.f32 %v1861_v37, %v624_v4 }
 0x130   :  { %v376_v7 = vpop.f32.mrf.mxu0  ;;  %v626_v8 = vpop.f32.mrf.mxu1 }
 0x131   :  { %v829_v9 = vmax.f32 %v375_v5, 0.0  ;;  %v879_v10 = vmax.f32 %v625_v6, 0.0 }
 0x132   :  { %v379_v11 = vpop.f32.mrf.mxu0  ;;  %v629_v12 = vpop.f32.mrf.mxu1 }
 0x133   :  { %930 = vst.msk [vmem:[%s2378_s3 + $0x58] sm:$0xff] %vm918_vm0, %v829_v9  ;;  %980 = vst.msk [vmem:[%s2378_s3 + $0x1e8] sm:$0xff] %vm918_vm0, %v879_v10  ;;  %v380_v13 = vadd.f32 %v1861_v37, %v379_v11  ;;  %v630_v14 = vadd.f32 %v1861_v37, %v629_v12 }
 0x134   :  { %v381_v15 = vpop.f32.mrf.mxu0  ;;  %v631_v16 = vpop.f32.mrf.mxu1 }
 0x135   :  { %v830_v17 = vmax.f32 %v380_v13, 0.0  ;;  %v880_v18 = vmax.f32 %v630_v14, 0.0 }
 0x136   :  { %v384_v19 = vpop.f32.mrf.mxu0  ;;  %v634_v20 = vpop.f32.mrf.mxu1 }
 0x137   :  { %931 = vst.msk [vmem:[%s2378_s3 + $0x60] sm:$0xff] %vm918_vm0, %v830_v17  ;;  %981 = vst.msk [vmem:[%s2378_s3 + $0x1f0] sm:$0xff] %vm918_vm0, %v880_v18  ;;  %v385_v21 = vadd.f32 %v1861_v37, %v384_v19  ;;  %v635_v22 = vadd.f32 %v1861_v37, %v634_v20 }
 0x138   :  { %v386_v23 = vpop.f32.mrf.mxu0  ;;  %v636_v24 = vpop.f32.mrf.mxu1 }
 0x139   :  { %v831_v25 = vmax.f32 %v385_v21, 0.0  ;;  %v881_v26 = vmax.f32 %v635_v22, 0.0 }
 0x13a   :  { %v389_v27 = vpop.f32.mrf.mxu0  ;;  %v639_v28 = vpop.f32.mrf.mxu1 }
 0x13b   :  { %932 = vst.msk [vmem:[%s2378_s3 + $0x68] sm:$0xff] %vm918_vm0, %v831_v25  ;;  %982 = vst.msk [vmem:[%s2378_s3 + $0x1f8] sm:$0xff] %vm918_vm0, %v881_v26  ;;  %v390_v29 = vadd.f32 %v1861_v37, %v389_v27  ;;  %v640_v30 = vadd.f32 %v1861_v37, %v639_v28 }
 0x13c   :  { %v391_v31 = vpop.f32.mrf.mxu0  ;;  %v641_v32 = vpop.f32.mrf.mxu1 }
 0x13d   :  { %v832_v33 = vmax.f32 %v390_v29, 0.0  ;;  %v882_v34 = vmax.f32 %v640_v30, 0.0 }
 0x13e   :  { %v394_v35 = vpop.f32.mrf.mxu0  ;;  %v644_v36 = vpop.f32.mrf.mxu1 }
 0x13f   :  { %933 = vst.msk [vmem:[%s2378_s3 + $0x70] sm:$0xff] %vm918_vm0, %v832_v33  ;;  %983 = vst.msk [vmem:[%s2378_s3 + $0x200] sm:$0xff] %vm918_vm0, %v882_v34  ;;  %v395_v38 = vadd.f32 %v1861_v37, %v394_v35  ;;  %v645_v39 = vadd.f32 %v1861_v37, %v644_v36 }
 0x140   :  { %v396_v40 = vpop.f32.mrf.mxu0  ;;  %v646_v41 = vpop.f32.mrf.mxu1 }
 0x141   :  { %v833_v42 = vmax.f32 %v395_v38, 0.0  ;;  %v883_v43 = vmax.f32 %v645_v39, 0.0 }
 0x142   :  { %v399_v44 = vpop.f32.mrf.mxu0  ;;  %v649_v45 = vpop.f32.mrf.mxu1 }
 0x143   :  { %934 = vst.msk [vmem:[%s2378_s3 + $0x78] sm:$0xff] %vm918_vm0, %v833_v42  ;;  %984 = vst.msk [vmem:[%s2378_s3 + $0x208] sm:$0xff] %vm918_vm0, %v883_v43  ;;  %v400_v46 = vadd.f32 %v1861_v37, %v399_v44  ;;  %v650_v47 = vadd.f32 %v1861_v37, %v649_v45 }
 0x144   :  { %v401_v48 = vpop.f32.mrf.mxu0  ;;  %v651_v49 = vpop.f32.mrf.mxu1 }
 0x145   :  { %v834_v50 = vmax.f32 %v400_v46, 0.0  ;;  %v884_v51 = vmax.f32 %v650_v47, 0.0 }
 0x146   :  { %v404_v52 = vpop.f32.mrf.mxu0  ;;  %v654_v53 = vpop.f32.mrf.mxu1 }
 0x147   :  { %935 = vst.msk [vmem:[%s2378_s3 + $0x80] sm:$0xff] %vm918_vm0, %v834_v50  ;;  %985 = vst.msk [vmem:[%s2378_s3 + $0x210] sm:$0xff] %vm918_vm0, %v884_v51  ;;  %v405_v54 = vadd.f32 %v1861_v37, %v404_v52  ;;  %v655_v55 = vadd.f32 %v1861_v37, %v654_v53 }
 0x148   :  { %v406_v56 = vpop.f32.mrf.mxu0  ;;  %v656_v57 = vpop.f32.mrf.mxu1 }
 0x149   :  { %v835_v58 = vmax.f32 %v405_v54, 0.0  ;;  %v885_v59 = vmax.f32 %v655_v55, 0.0 }
 0x14a   :  { %v409_v60 = vpop.f32.mrf.mxu0  ;;  %v659_v61 = vpop.f32.mrf.mxu1 }
 0x14b   :  { %936 = vst.msk [vmem:[%s2378_s3 + $0x88] sm:$0xff] %vm918_vm0, %v835_v58  ;;  %986 = vst.msk [vmem:[%s2378_s3 + $0x218] sm:$0xff] %vm918_vm0, %v885_v59  ;;  %v410_v62 = vadd.f32 %v1861_v37, %v409_v60  ;;  %v660_v63 = vadd.f32 %v1861_v37, %v659_v61 }
 0x14c   :  { %v411_v0 = vpop.f32.mrf.mxu0  ;;  %v661_v1 = vpop.f32.mrf.mxu1 }
 0x14d   :  { %v836_v2 = vmax.f32 %v410_v62, 0.0  ;;  %v886_v3 = vmax.f32 %v660_v63, 0.0 }
 0x14e   :  { %v414_v4 = vpop.f32.mrf.mxu0  ;;  %v664_v5 = vpop.f32.mrf.mxu1 }
 0x14f   :  { %937 = vst.msk [vmem:[%s2378_s3 + $0x90] sm:$0xff] %vm918_vm0, %v836_v2  ;;  %987 = vst.msk [vmem:[%s2378_s3 + $0x220] sm:$0xff] %vm918_vm0, %v886_v3  ;;  %v415_v6 = vadd.f32 %v1861_v37, %v414_v4  ;;  %v665_v7 = vadd.f32 %v1861_v37, %v664_v5 }
 0x150   :  { %v416_v8 = vpop.f32.mrf.mxu0  ;;  %v666_v9 = vpop.f32.mrf.mxu1 }
 0x151   :  { %v837_v10 = vmax.f32 %v415_v6, 0.0  ;;  %v887_v11 = vmax.f32 %v665_v7, 0.0 }
 0x152   :  { %v419_v12 = vpop.f32.mrf.mxu0  ;;  %v669_v13 = vpop.f32.mrf.mxu1 }
 0x153   :  { %938 = vst.msk [vmem:[%s2378_s3 + $0x98] sm:$0xff] %vm918_vm0, %v837_v10  ;;  %988 = vst.msk [vmem:[%s2378_s3 + $0x228] sm:$0xff] %vm918_vm0, %v887_v11  ;;  %v420_v14 = vadd.f32 %v1861_v37, %v419_v12  ;;  %v670_v15 = vadd.f32 %v1861_v37, %v669_v13 }
 0x154   :  { %v421_v16 = vpop.f32.mrf.mxu0  ;;  %v671_v17 = vpop.f32.mrf.mxu1 }
 0x155   :  { %v838_v18 = vmax.f32 %v420_v14, 0.0  ;;  %v888_v19 = vmax.f32 %v670_v15, 0.0 }
 0x156   :  { %v424_v20 = vpop.f32.mrf.mxu0  ;;  %v674_v21 = vpop.f32.mrf.mxu1 }
 0x157   :  { %939 = vst.msk [vmem:[%s2378_s3 + $0xa0] sm:$0xff] %vm918_vm0, %v838_v18  ;;  %989 = vst.msk [vmem:[%s2378_s3 + $0x230] sm:$0xff] %vm918_vm0, %v888_v19  ;;  %v425_v22 = vadd.f32 %v1861_v37, %v424_v20  ;;  %v675_v23 = vadd.f32 %v1861_v37, %v674_v21 }
 0x158   :  { %v426_v24 = vpop.f32.mrf.mxu0  ;;  %v676_v25 = vpop.f32.mrf.mxu1 }
 0x159   :  { %v839_v26 = vmax.f32 %v425_v22, 0.0  ;;  %v889_v27 = vmax.f32 %v675_v23, 0.0 }
 0x15a   :  { %v429_v28 = vpop.f32.mrf.mxu0  ;;  %v679_v29 = vpop.f32.mrf.mxu1 }
 0x15b   :  { %940 = vst.msk [vmem:[%s2378_s3 + $0xa8] sm:$0xff] %vm918_vm0, %v839_v26  ;;  %990 = vst.msk [vmem:[%s2378_s3 + $0x238] sm:$0xff] %vm918_vm0, %v889_v27  ;;  %v430_v30 = vadd.f32 %v1861_v37, %v429_v28  ;;  %v680_v31 = vadd.f32 %v1861_v37, %v679_v29 }
 0x15c   :  { %v431_v32 = vpop.f32.mrf.mxu0  ;;  %v681_v33 = vpop.f32.mrf.mxu1 }
 0x15d   :  { %v840_v34 = vmax.f32 %v430_v30, 0.0  ;;  %v890_v35 = vmax.f32 %v680_v31, 0.0 }
 0x15e   :  { %v434_v36 = vpop.f32.mrf.mxu0  ;;  %v684_v38 = vpop.f32.mrf.mxu1 }
 0x15f   :  { %941 = vst.msk [vmem:[%s2378_s3 + $0xb0] sm:$0xff] %vm918_vm0, %v840_v34  ;;  %991 = vst.msk [vmem:[%s2378_s3 + $0x240] sm:$0xff] %vm918_vm0, %v890_v35  ;;  %v435_v39 = vadd.f32 %v1861_v37, %v434_v36  ;;  %v685_v40 = vadd.f32 %v1861_v37, %v684_v38 }
 0x160   :  { %v436_v41 = vpop.f32.mrf.mxu0  ;;  %v686_v42 = vpop.f32.mrf.mxu1 }
 0x161   :  { %v841_v43 = vmax.f32 %v435_v39, 0.0  ;;  %v891_v44 = vmax.f32 %v685_v40, 0.0 }
 0x162   :  { %v439_v45 = vpop.f32.mrf.mxu0  ;;  %v689_v46 = vpop.f32.mrf.mxu1 }
 0x163   :  { %942 = vst.msk [vmem:[%s2378_s3 + $0xb8] sm:$0xff] %vm918_vm0, %v841_v43  ;;  %992 = vst.msk [vmem:[%s2378_s3 + $0x248] sm:$0xff] %vm918_vm0, %v891_v44  ;;  %v440_v47 = vadd.f32 %v1861_v37, %v439_v45  ;;  %v690_v48 = vadd.f32 %v1861_v37, %v689_v46 }
 0x164   :  { %v441_v49 = vpop.f32.mrf.mxu0  ;;  %v691_v50 = vpop.f32.mrf.mxu1 }
 0x165   :  { %v842_v51 = vmax.f32 %v440_v47, 0.0  ;;  %v892_v52 = vmax.f32 %v690_v48, 0.0 }
 0x166   :  { %v444_v53 = vpop.f32.mrf.mxu0  ;;  %v694_v54 = vpop.f32.mrf.mxu1 }
 0x167   :  { %943 = vst.msk [vmem:[%s2378_s3 + $0xc0] sm:$0xff] %vm918_vm0, %v842_v51  ;;  %993 = vst.msk [vmem:[%s2378_s3 + $0x250] sm:$0xff] %vm918_vm0, %v892_v52  ;;  %v445_v55 = vadd.f32 %v1861_v37, %v444_v53  ;;  %v695_v56 = vadd.f32 %v1861_v37, %v694_v54 }
 0x168   :  { %v446_v57 = vpop.f32.mrf.mxu0  ;;  %v696_v58 = vpop.f32.mrf.mxu1 }
 0x169   :  { %v843_v59 = vmax.f32 %v445_v55, 0.0  ;;  %v893_v60 = vmax.f32 %v695_v56, 0.0 }
 0x16a   :  { %v449_v61 = vpop.f32.mrf.mxu0  ;;  %v699_v62 = vpop.f32.mrf.mxu1 }
 0x16b   :  { %944 = vst.msk [vmem:[%s2378_s3 + $0xc8] sm:$0xff] %vm918_vm0, %v843_v59  ;;  %994 = vst.msk [vmem:[%s2378_s3 + $0x258] sm:$0xff] %vm918_vm0, %v893_v60  ;;  %v450_v63 = vadd.f32 %v1861_v37, %v449_v61  ;;  %v700_v0 = vadd.f32 %v1861_v37, %v699_v62 }
 0x16c   :  { %v451_v1 = vpop.f32.mrf.mxu0  ;;  %v701_v2 = vpop.f32.mrf.mxu1 }
 0x16d   :  { %v844_v3 = vmax.f32 %v450_v63, 0.0  ;;  %v894_v4 = vmax.f32 %v700_v0, 0.0 }
 0x16e   :  { %v454_v5 = vpop.f32.mrf.mxu0  ;;  %v704_v6 = vpop.f32.mrf.mxu1 }
 0x16f   :  { %945 = vst.msk [vmem:[%s2378_s3 + $0xd0] sm:$0xff] %vm918_vm0, %v844_v3  ;;  %995 = vst.msk [vmem:[%s2378_s3 + $0x260] sm:$0xff] %vm918_vm0, %v894_v4  ;;  %v455_v7 = vadd.f32 %v1861_v37, %v454_v5  ;;  %v705_v8 = vadd.f32 %v1861_v37, %v704_v6 }
 0x170   :  { %v456_v9 = vpop.f32.mrf.mxu0  ;;  %v706_v10 = vpop.f32.mrf.mxu1 }
 0x171   :  { %v845_v11 = vmax.f32 %v455_v7, 0.0  ;;  %v895_v12 = vmax.f32 %v705_v8, 0.0 }
 0x172   :  { %v459_v13 = vpop.f32.mrf.mxu0  ;;  %v709_v14 = vpop.f32.mrf.mxu1 }
 0x173   :  { %946 = vst.msk [vmem:[%s2378_s3 + $0xd8] sm:$0xff] %vm918_vm0, %v845_v11  ;;  %996 = vst.msk [vmem:[%s2378_s3 + $0x268] sm:$0xff] %vm918_vm0, %v895_v12  ;;  %v460_v15 = vadd.f32 %v1861_v37, %v459_v13  ;;  %v710_v16 = vadd.f32 %v1861_v37, %v709_v14 }
 0x174   :  { %v461_v17 = vpop.f32.mrf.mxu0  ;;  %v711_v18 = vpop.f32.mrf.mxu1 }
 0x175   :  { %v846_v19 = vmax.f32 %v460_v15, 0.0  ;;  %v896_v20 = vmax.f32 %v710_v16, 0.0 }
 0x176   :  { %v464_v21 = vpop.f32.mrf.mxu0  ;;  %v714_v22 = vpop.f32.mrf.mxu1 }
 0x177   :  { %947 = vst.msk [vmem:[%s2378_s3 + $0xe0] sm:$0xff] %vm918_vm0, %v846_v19  ;;  %997 = vst.msk [vmem:[%s2378_s3 + $0x270] sm:$0xff] %vm918_vm0, %v896_v20  ;;  %v465_v23 = vadd.f32 %v1861_v37, %v464_v21  ;;  %v715_v24 = vadd.f32 %v1861_v37, %v714_v22 }
 0x178   :  { %v466_v25 = vpop.f32.mrf.mxu0  ;;  %v716_v26 = vpop.f32.mrf.mxu1 }
 0x179   :  { %v847_v27 = vmax.f32 %v465_v23, 0.0  ;;  %v897_v28 = vmax.f32 %v715_v24, 0.0 }
 0x17a   :  { %v469_v29 = vpop.f32.mrf.mxu0  ;;  %v719_v30 = vpop.f32.mrf.mxu1 }
 0x17b   :  { %948 = vst.msk [vmem:[%s2378_s3 + $0xe8] sm:$0xff] %vm918_vm0, %v847_v27  ;;  %998 = vst.msk [vmem:[%s2378_s3 + $0x278] sm:$0xff] %vm918_vm0, %v897_v28  ;;  %v470_v31 = vadd.f32 %v1861_v37, %v469_v29  ;;  %v720_v32 = vadd.f32 %v1861_v37, %v719_v30 }
 0x17c   :  { %v471_v33 = vpop.f32.mrf.mxu0  ;;  %v721_v34 = vpop.f32.mrf.mxu1 }
 0x17d   :  { %v848_v35 = vmax.f32 %v470_v31, 0.0  ;;  %v898_v36 = vmax.f32 %v720_v32, 0.0 }
 0x17e   :  { %v474_v38 = vpop.f32.mrf.mxu0  ;;  %v724_v39 = vpop.f32.mrf.mxu1 }
 0x17f   :  { %949 = vst.msk [vmem:[%s2378_s3 + $0xf0] sm:$0xff] %vm918_vm0, %v848_v35  ;;  %999 = vst.msk [vmem:[%s2378_s3 + $0x280] sm:$0xff] %vm918_vm0, %v898_v36  ;;  %v475_v40 = vadd.f32 %v1861_v37, %v474_v38  ;;  %v725_v41 = vadd.f32 %v1861_v37, %v724_v39 }
 0x180   :  { %v476_v42 = vpop.f32.mrf.mxu0  ;;  %v726_v43 = vpop.f32.mrf.mxu1 }
 0x181   :  { %v849_v44 = vmax.f32 %v475_v40, 0.0  ;;  %v899_v45 = vmax.f32 %v725_v41, 0.0 }
 0x182   :  { %v479_v46 = vpop.f32.mrf.mxu0  ;;  %v729_v47 = vpop.f32.mrf.mxu1 }
 0x183   :  { %950 = vst.msk [vmem:[%s2378_s3 + $0xf8] sm:$0xff] %vm918_vm0, %v849_v44  ;;  %1000 = vst.msk [vmem:[%s2378_s3 + $0x288] sm:$0xff] %vm918_vm0, %v899_v45  ;;  %v480_v48 = vadd.f32 %v1861_v37, %v479_v46  ;;  %v730_v49 = vadd.f32 %v1861_v37, %v729_v47 }
 0x184   :  { %v481_v50 = vpop.f32.mrf.mxu0  ;;  %v731_v51 = vpop.f32.mrf.mxu1 }
 0x185   :  { %v850_v52 = vmax.f32 %v480_v48, 0.0  ;;  %v900_v53 = vmax.f32 %v730_v49, 0.0 }
 0x186   :  { %v484_v54 = vpop.f32.mrf.mxu0  ;;  %v734_v55 = vpop.f32.mrf.mxu1 }
 0x187   :  { %951 = vst.msk [vmem:[%s2378_s3 + $0x100] sm:$0xff] %vm918_vm0, %v850_v52  ;;  %1001 = vst.msk [vmem:[%s2378_s3 + $0x290] sm:$0xff] %vm918_vm0, %v900_v53  ;;  %v485_v56 = vadd.f32 %v1861_v37, %v484_v54  ;;  %v735_v57 = vadd.f32 %v1861_v37, %v734_v55 }
 0x188   :  { %v486_v58 = vpop.f32.mrf.mxu0  ;;  %v736_v59 = vpop.f32.mrf.mxu1 }
 0x189   :  { %v851_v60 = vmax.f32 %v485_v56, 0.0  ;;  %v901_v61 = vmax.f32 %v735_v57, 0.0 }
 0x18a   :  { %v489_v62 = vpop.f32.mrf.mxu0  ;;  %v739_v63 = vpop.f32.mrf.mxu1 }
 0x18b   :  { %952 = vst.msk [vmem:[%s2378_s3 + $0x108] sm:$0xff] %vm918_vm0, %v851_v60  ;;  %1002 = vst.msk [vmem:[%s2378_s3 + $0x298] sm:$0xff] %vm918_vm0, %v901_v61  ;;  %v490_v0 = vadd.f32 %v1861_v37, %v489_v62  ;;  %v740_v1 = vadd.f32 %v1861_v37, %v739_v63 }
 0x18c   :  { %v491_v2 = vpop.f32.mrf.mxu0  ;;  %v741_v3 = vpop.f32.mrf.mxu1 }
 0x18d   :  { %v852_v4 = vmax.f32 %v490_v0, 0.0  ;;  %v902_v5 = vmax.f32 %v740_v1, 0.0 }
 0x18e   :  { %v494_v6 = vpop.f32.mrf.mxu0  ;;  %v744_v7 = vpop.f32.mrf.mxu1 }
 0x18f   :  { %953 = vst.msk [vmem:[%s2378_s3 + $0x110] sm:$0xff] %vm918_vm0, %v852_v4  ;;  %1003 = vst.msk [vmem:[%s2378_s3 + $0x2a0] sm:$0xff] %vm918_vm0, %v902_v5  ;;  %v495_v8 = vadd.f32 %v1861_v37, %v494_v6  ;;  %v745_v9 = vadd.f32 %v1861_v37, %v744_v7 }
 0x190   :  { %v496_v10 = vpop.f32.mrf.mxu0  ;;  %v746_v11 = vpop.f32.mrf.mxu1 }
 0x191   :  { %v853_v12 = vmax.f32 %v495_v8, 0.0  ;;  %v903_v13 = vmax.f32 %v745_v9, 0.0 }
 0x192   :  { %v499_v14 = vpop.f32.mrf.mxu0  ;;  %v749_v15 = vpop.f32.mrf.mxu1 }
 0x193   :  { %954 = vst.msk [vmem:[%s2378_s3 + $0x118] sm:$0xff] %vm918_vm0, %v853_v12  ;;  %1004 = vst.msk [vmem:[%s2378_s3 + $0x2a8] sm:$0xff] %vm918_vm0, %v903_v13  ;;  %v500_v16 = vadd.f32 %v1861_v37, %v499_v14  ;;  %v750_v17 = vadd.f32 %v1861_v37, %v749_v15 }
 0x194   :  { %v501_v18 = vpop.f32.mrf.mxu0  ;;  %v751_v19 = vpop.f32.mrf.mxu1 }
 0x195   :  { %v854_v20 = vmax.f32 %v500_v16, 0.0  ;;  %v904_v21 = vmax.f32 %v750_v17, 0.0 }
 0x196   :  { %v504_v22 = vpop.f32.mrf.mxu0  ;;  %v754_v23 = vpop.f32.mrf.mxu1 }
 0x197   :  { %955 = vst.msk [vmem:[%s2378_s3 + $0x120] sm:$0xff] %vm918_vm0, %v854_v20  ;;  %1005 = vst.msk [vmem:[%s2378_s3 + $0x2b0] sm:$0xff] %vm918_vm0, %v904_v21  ;;  %v505_v24 = vadd.f32 %v1861_v37, %v504_v22  ;;  %v755_v25 = vadd.f32 %v1861_v37, %v754_v23 }
 0x198   :  { %v506_v26 = vpop.f32.mrf.mxu0  ;;  %v756_v27 = vpop.f32.mrf.mxu1 }
 0x199   :  { %v855_v28 = vmax.f32 %v505_v24, 0.0  ;;  %v905_v29 = vmax.f32 %v755_v25, 0.0 }
 0x19a   :  { %v509_v30 = vpop.f32.mrf.mxu0  ;;  %v759_v31 = vpop.f32.mrf.mxu1 }
 0x19b   :  { %956 = vst.msk [vmem:[%s2378_s3 + $0x128] sm:$0xff] %vm918_vm0, %v855_v28  ;;  %1006 = vst.msk [vmem:[%s2378_s3 + $0x2b8] sm:$0xff] %vm918_vm0, %v905_v29  ;;  %v510_v32 = vadd.f32 %v1861_v37, %v509_v30  ;;  %v760_v33 = vadd.f32 %v1861_v37, %v759_v31 }
 0x19c   :  { %v511_v34 = vpop.f32.mrf.mxu0  ;;  %v761_v35 = vpop.f32.mrf.mxu1 }
 0x19d   :  { %v856_v36 = vmax.f32 %v510_v32, 0.0  ;;  %v906_v38 = vmax.f32 %v760_v33, 0.0 }
 0x19e   :  { %v514_v39 = vpop.f32.mrf.mxu0  ;;  %v764_v40 = vpop.f32.mrf.mxu1 }
 0x19f   :  { %957 = vst.msk [vmem:[%s2378_s3 + $0x130] sm:$0xff] %vm918_vm0, %v856_v36  ;;  %1007 = vst.msk [vmem:[%s2378_s3 + $0x2c0] sm:$0xff] %vm918_vm0, %v906_v38  ;;  %v515_v41 = vadd.f32 %v1861_v37, %v514_v39  ;;  %v765_v42 = vadd.f32 %v1861_v37, %v764_v40 }
 0x1a0   :  { %v516_v43 = vpop.f32.mrf.mxu0  ;;  %v766_v44 = vpop.f32.mrf.mxu1 }
 0x1a1   :  { %v857_v45 = vmax.f32 %v515_v41, 0.0  ;;  %v907_v46 = vmax.f32 %v765_v42, 0.0 }
 0x1a2   :  { %v519_v47 = vpop.f32.mrf.mxu0  ;;  %v769_v48 = vpop.f32.mrf.mxu1 }
 0x1a3   :  { %958 = vst.msk [vmem:[%s2378_s3 + $0x138] sm:$0xff] %vm918_vm0, %v857_v45  ;;  %1008 = vst.msk [vmem:[%s2378_s3 + $0x2c8] sm:$0xff] %vm918_vm0, %v907_v46  ;;  %v520_v49 = vadd.f32 %v1861_v37, %v519_v47  ;;  %v770_v50 = vadd.f32 %v1861_v37, %v769_v48 }
 0x1a4   :  { %v521_v51 = vpop.f32.mrf.mxu0  ;;  %v771_v52 = vpop.f32.mrf.mxu1 }
 0x1a5   :  { %v858_v53 = vmax.f32 %v520_v49, 0.0  ;;  %v908_v54 = vmax.f32 %v770_v50, 0.0 }
 0x1a6   :  { %v524_v55 = vpop.f32.mrf.mxu0  ;;  %v774_v56 = vpop.f32.mrf.mxu1 }
 0x1a7   :  { %959 = vst.msk [vmem:[%s2378_s3 + $0x140] sm:$0xff] %vm918_vm0, %v858_v53  ;;  %1009 = vst.msk [vmem:[%s2378_s3 + $0x2d0] sm:$0xff] %vm918_vm0, %v908_v54  ;;  %v525_v57 = vadd.f32 %v1861_v37, %v524_v55  ;;  %v775_v58 = vadd.f32 %v1861_v37, %v774_v56 }
 0x1a8   :  { %v526_v59 = vpop.f32.mrf.mxu0  ;;  %v776_v60 = vpop.f32.mrf.mxu1 }
 0x1a9   :  { %v859_v61 = vmax.f32 %v525_v57, 0.0  ;;  %v909_v62 = vmax.f32 %v775_v58, 0.0 }
 0x1aa   :  { %v529_v63 = vpop.f32.mrf.mxu0  ;;  %v779_v0 = vpop.f32.mrf.mxu1 }
 0x1ab   :  { %960 = vst.msk [vmem:[%s2378_s3 + $0x148] sm:$0xff] %vm918_vm0, %v859_v61  ;;  %1010 = vst.msk [vmem:[%s2378_s3 + $0x2d8] sm:$0xff] %vm918_vm0, %v909_v62  ;;  %v530_v1 = vadd.f32 %v1861_v37, %v529_v63  ;;  %v780_v2 = vadd.f32 %v1861_v37, %v779_v0 }
 0x1ac   :  { %v531_v3 = vpop.f32.mrf.mxu0  ;;  %v781_v4 = vpop.f32.mrf.mxu1 }
 0x1ad   :  { %v860_v5 = vmax.f32 %v530_v1, 0.0  ;;  %v910_v6 = vmax.f32 %v780_v2, 0.0 }
 0x1ae   :  { %v534_v7 = vpop.f32.mrf.mxu0  ;;  %v784_v8 = vpop.f32.mrf.mxu1 }
 0x1af   :  { %961 = vst.msk [vmem:[%s2378_s3 + $0x150] sm:$0xff] %vm918_vm0, %v860_v5  ;;  %1011 = vst.msk [vmem:[%s2378_s3 + $0x2e0] sm:$0xff] %vm918_vm0, %v910_v6  ;;  %v535_v9 = vadd.f32 %v1861_v37, %v534_v7  ;;  %v785_v10 = vadd.f32 %v1861_v37, %v784_v8 }
 0x1b0   :  { %v536_v11 = vpop.f32.mrf.mxu0  ;;  %v786_v12 = vpop.f32.mrf.mxu1 }
 0x1b1   :  { %v861_v13 = vmax.f32 %v535_v9, 0.0  ;;  %v911_v14 = vmax.f32 %v785_v10, 0.0 }
 0x1b2   :  { %v539_v15 = vpop.f32.mrf.mxu0  ;;  %v789_v16 = vpop.f32.mrf.mxu1 }
 0x1b3   :  { %962 = vst.msk [vmem:[%s2378_s3 + $0x158] sm:$0xff] %vm918_vm0, %v861_v13  ;;  %1012 = vst.msk [vmem:[%s2378_s3 + $0x2e8] sm:$0xff] %vm918_vm0, %v911_v14  ;;  %v540_v17 = vadd.f32 %v1861_v37, %v539_v15  ;;  %v790_v18 = vadd.f32 %v1861_v37, %v789_v16 }
 0x1b4   :  { %v541_v19 = vpop.f32.mrf.mxu0  ;;  %v791_v20 = vpop.f32.mrf.mxu1 }
 0x1b5   :  { %v862_v21 = vmax.f32 %v540_v17, 0.0  ;;  %v912_v22 = vmax.f32 %v790_v18, 0.0 }
 0x1b6   :  { %v544_v23 = vpop.f32.mrf.mxu0  ;;  %v794_v24 = vpop.f32.mrf.mxu1 }
 0x1b7   :  { %963 = vst.msk [vmem:[%s2378_s3 + $0x160] sm:$0xff] %vm918_vm0, %v862_v21  ;;  %1013 = vst.msk [vmem:[%s2378_s3 + $0x2f0] sm:$0xff] %vm918_vm0, %v912_v22  ;;  %v545_v25 = vadd.f32 %v1861_v37, %v544_v23  ;;  %v795_v26 = vadd.f32 %v1861_v37, %v794_v24 }
 0x1b8   :  { %v546_v27 = vpop.f32.mrf.mxu0  ;;  %v796_v28 = vpop.f32.mrf.mxu1 }
 0x1b9   :  { %v863_v29 = vmax.f32 %v545_v25, 0.0  ;;  %v913_v30 = vmax.f32 %v795_v26, 0.0 }
 0x1ba   :  { %v549_v31 = vpop.f32.mrf.mxu0  ;;  %v799_v32 = vpop.f32.mrf.mxu1 }
 0x1bb   :  { %964 = vst.msk [vmem:[%s2378_s3 + $0x168] sm:$0xff] %vm918_vm0, %v863_v29  ;;  %1014 = vst.msk [vmem:[%s2378_s3 + $0x2f8] sm:$0xff] %vm918_vm0, %v913_v30  ;;  %v550_v33 = vadd.f32 %v1861_v37, %v549_v31  ;;  %v800_v34 = vadd.f32 %v1861_v37, %v799_v32 }
 0x1bc   :  { %v551_v35 = vpop.f32.mrf.mxu0  ;;  %v801_v36 = vpop.f32.mrf.mxu1 }
 0x1bd   :  { %v864_v38 = vmax.f32 %v550_v33, 0.0  ;;  %v914_v39 = vmax.f32 %v800_v34, 0.0 }
 0x1be   :  { %v554_v40 = vpop.f32.mrf.mxu0  ;;  %v804_v41 = vpop.f32.mrf.mxu1 }
 0x1bf   :  { %965 = vst.msk [vmem:[%s2378_s3 + $0x170] sm:$0xff] %vm918_vm0, %v864_v38  ;;  %1015 = vst.msk [vmem:[%s2378_s3 + $0x300] sm:$0xff] %vm918_vm0, %v914_v39  ;;  %v555_v42 = vadd.f32 %v1861_v37, %v554_v40  ;;  %v805_v43 = vadd.f32 %v1861_v37, %v804_v41 }
 0x1c0   :  { %v556_v44 = vpop.f32.mrf.mxu0  ;;  %v806_v45 = vpop.f32.mrf.mxu1 }
 0x1c1   :  { %v865_v46 = vmax.f32 %v555_v42, 0.0  ;;  %v915_v47 = vmax.f32 %v805_v43, 0.0 }
 0x1c2   :  { %v559_v48 = vpop.f32.mrf.mxu0  ;;  %v809_v49 = vpop.f32.mrf.mxu1 }
 0x1c3   :  { %966 = vst.msk [vmem:[%s2378_s3 + $0x178] sm:$0xff] %vm918_vm0, %v865_v46  ;;  %1016 = vst.msk [vmem:[%s2378_s3 + $0x308] sm:$0xff] %vm918_vm0, %v915_v47  ;;  %v560_v50 = vadd.f32 %v1861_v37, %v559_v48  ;;  %v810_v51 = vadd.f32 %v1861_v37, %v809_v49 }
 0x1c4   :  { %v561_v52 = vpop.f32.mrf.mxu0  ;;  %v811_v53 = vpop.f32.mrf.mxu1 }
 0x1c5   :  { %v866_v54 = vmax.f32 %v560_v50, 0.0  ;;  %v916_v55 = vmax.f32 %v810_v51, 0.0 }
 0x1c6   :  { %v564_v56 = vpop.f32.mrf.mxu0  ;;  %v814_v57 = vpop.f32.mrf.mxu1 }
 0x1c7   :  { %967 = vst.msk [vmem:[%s2378_s3 + $0x180] sm:$0xff] %vm918_vm0, %v866_v54  ;;  %1017 = vst.msk [vmem:[%s2378_s3 + $0x310] sm:$0xff] %vm918_vm0, %v916_v55  ;;  %v565_v58 = vadd.f32 %v1861_v37, %v564_v56  ;;  %v815_v59 = vadd.f32 %v1861_v37, %v814_v57 }
 0x1c8   :  { %v566_v60 = vpop.f32.mrf.mxu0  ;;  %v816_v61 = vpop.f32.mrf.mxu1 }
 0x1c9   :  { %v867_v62 = vmax.f32 %v565_v58, 0.0  ;;  %v917_v63 = vmax.f32 %v815_v59, 0.0 }
 0x1cb   :  { %968 = vst.msk [vmem:[%s2378_s3 + $0x188] sm:$0xff] %vm918_vm0, %v867_v62  ;;  %1018 = vst.msk [vmem:[%s2378_s3 + $0x318] sm:$0xff] %vm918_vm0, %v917_v63 }

// kernel: actor_critic_forward.4
= control target key start
LH: loop header
LB: loop body
LE: loop exit
PB: predicated region body
PF: predicated region fallthrough
CT: control target
= control target key end

     0   :  { %v422_v0 = vmov 0.0   ;;  %vm81_vm0 = vcmask 130048   ;;  %vm336_vm1 = vcmask 261120   ;;  %vm357_vm2 = vcmask 254976   ;;  %s789_s1 = inlined_call_operand.vmem [shape: f32[144,32], index: 1, kind: input, shape index: {}]   ;;  %s790_s0 = inlined_call_operand.vmem [shape: f32[162,144], index: 0, kind: input, shape index: {}]   ;;  %s791_s2 = inlined_call_operand.vmem [shape: f32[1,32], index: 2, kind: input, shape index: {}]   ;;  %s792_s3 = inlined_call_operand.vmem [shape: f32[162,32], index: 3, kind: output, shape index: {}]  }
   0x1   :  { %145 = vmatprep.subr.mxu0 %v422_v0  ;;  %v71_v1 = vld [vmem:[%s789_s1 + $0x78] sm:$0xff]  ;;  %385 = vmatprep.subr.mxu1 %v422_v0  ;;  %v70_v2 = vld [vmem:[%s789_s1 + $0x70] sm:$0xff]  ;;  %v69_v3 = vld [vmem:[%s789_s1 + $0x68] sm:$0xff] }
   0x2   :  { %146 = vmatpush1.msra.mxu0 %v71_v1  ;;  %403 = vmatpush1.msra.mxu1 %v71_v1  ;;  %v68_v4 = vld [vmem:[%s789_s1 + $0x60] sm:$0xff]  ;;  %v67_v5 = vld [vmem:[%s789_s1 + $0x58] sm:$0xff]  ;;  %v66_v6 = vld [vmem:[%s789_s1 + $0x50] sm:$0xff] }
   0x3   :  { %147 = vmatprep.subr.mxu0 %v422_v0  ;;  %386 = vmatprep.subr.mxu1 %v422_v0  ;;  %v65_v7 = vld [vmem:[%s789_s1 + $0x48] sm:$0xff]  ;;  %v64_v8 = vld [vmem:[%s789_s1 + $0x40] sm:$0xff]  ;;  %v63_v9 = vld [vmem:[%s789_s1 + $0x38] sm:$0xff] }
   0x4   :  { %148 = vmatpush1.msra.mxu0 %v70_v2  ;;  %404 = vmatpush1.msra.mxu1 %v70_v2  ;;  %v62_v10 = vld [vmem:[%s789_s1 + $0x30] sm:$0xff]  ;;  %v61_v11 = vld [vmem:[%s789_s1 + $0x28] sm:$0xff]  ;;  %v60_v12 = vld [vmem:[%s789_s1 + $0x20] sm:$0xff] }
   0x5   :  { %149 = vmatprep.subr.mxu0 %v422_v0  ;;  %387 = vmatprep.subr.mxu1 %v422_v0  ;;  %v59_v13 = vld [vmem:[%s789_s1 + $0x18] sm:$0xff]  ;;  %v58_v14 = vld [vmem:[%s789_s1 + $0x10] sm:$0xff]  ;;  %v57_v15 = vld [vmem:[%s789_s1 + $0x8] sm:$0xff] }
   0x6   :  { %150 = vmatpush1.msra.mxu0 %v69_v3  ;;  %405 = vmatpush1.msra.mxu1 %v69_v3  ;;  %v56_v16 = vld [vmem:[%s789_s1] sm:$0xff]  ;;  %v73_v17 = vld [vmem:[%s789_s1 + $0x88] sm:$0xff]  ;;  %v37_v21 = vld [vmem:[%s790_s0 + $0xb8] sm:$0xff] }
   0x7   :  { %151 = vmatprep.subr.mxu0 %v422_v0  ;;  %388 = vmatprep.subr.mxu1 %v422_v0  ;;  %v15_v18 = vld [vmem:[%s790_s0 + $0x8] sm:$0xff]  ;;  %v72_v19 = vld [vmem:[%s789_s1 + $0x80] sm:$0xff]  ;;  %v17_v22 = vld [vmem:[%s790_s0 + $0x18] sm:$0xff] }
   0x8   :  { %152 = vmatpush1.msra.mxu0 %v68_v4  ;;  %406 = vmatpush1.msra.mxu1 %v68_v4  ;;  %v14_v20 = vld [vmem:[%s790_s0] sm:$0xff]  ;;  %v36_v23 = vld [vmem:[%s790_s0 + $0xb0] sm:$0xff]  ;;  %v39_v24 = vld [vmem:[%s790_s0 + $0xc8] sm:$0xff] }
   0x9   :  { %153 = vmatprep.subr.mxu0 %v422_v0  ;;  %389 = vmatprep.subr.mxu1 %v422_v0  ;;  %v16_v25 = vld [vmem:[%s790_s0 + $0x10] sm:$0xff]  ;;  %v19_v26 = vld [vmem:[%s790_s0 + $0x28] sm:$0xff]  ;;  %v38_v27 = vld [vmem:[%s790_s0 + $0xc0] sm:$0xff] }
   0xa   :  { %154 = vmatpush1.msra.mxu0 %v67_v5  ;;  %407 = vmatpush1.msra.mxu1 %v67_v5  ;;  %v41_v28 = vld [vmem:[%s790_s0 + $0xd8] sm:$0xff]  ;;  %v18_v29 = vld [vmem:[%s790_s0 + $0x20] sm:$0xff]  ;;  %v40_v31 = vld [vmem:[%s790_s0 + $0xd0] sm:$0xff] }
   0xb   :  { %155 = vmatprep.subr.mxu0 %v422_v0  ;;  %390 = vmatprep.subr.mxu1 %v422_v0  ;;  %v21_v30 = vld [vmem:[%s790_s0 + $0x38] sm:$0xff]  ;;  %v43_v32 = vld [vmem:[%s790_s0 + $0xe8] sm:$0xff]  ;;  %v20_v33 = vld [vmem:[%s790_s0 + $0x30] sm:$0xff] }
   0xc   :  { %156 = vmatpush1.msra.mxu0 %v66_v6  ;;  %408 = vmatpush1.msra.mxu1 %v66_v6  ;;  %v23_v34 = vld [vmem:[%s790_s0 + $0x48] sm:$0xff]  ;;  %v42_v35 = vld [vmem:[%s790_s0 + $0xe0] sm:$0xff]  ;;  %v45_v36 = vld [vmem:[%s790_s0 + $0xf8] sm:$0xff] }
   0xd   :  { %157 = vmatprep.subr.mxu0 %v422_v0  ;;  %391 = vmatprep.subr.mxu1 %v422_v0  ;;  %v22_v37 = vld [vmem:[%s790_s0 + $0x40] sm:$0xff]  ;;  %v25_v38 = vld [vmem:[%s790_s0 + $0x58] sm:$0xff]  ;;  %v44_v39 = vld [vmem:[%s790_s0 + $0xf0] sm:$0xff] }
   0xe   :  { %158 = vmatpush1.msra.mxu0 %v65_v7  ;;  %409 = vmatpush1.msra.mxu1 %v65_v7  ;;  %v47_v40 = vld [vmem:[%s790_s0 + $0x108] sm:$0xff]  ;;  %v24_v41 = vld [vmem:[%s790_s0 + $0x50] sm:$0xff]  ;;  %v46_v43 = vld [vmem:[%s790_s0 + $0x100] sm:$0xff] }
   0xf   :  { %159 = vmatprep.subr.mxu0 %v422_v0  ;;  %392 = vmatprep.subr.mxu1 %v422_v0  ;;  %v27_v42 = vld [vmem:[%s790_s0 + $0x68] sm:$0xff]  ;;  %v49_v44 = vld [vmem:[%s790_s0 + $0x118] sm:$0xff]  ;;  %v26_v45 = vld [vmem:[%s790_s0 + $0x60] sm:$0xff] }
  0x10   :  { %160 = vmatpush1.msra.mxu0 %v64_v8  ;;  %410 = vmatpush1.msra.mxu1 %v64_v8  ;;  %v29_v46 = vld [vmem:[%s790_s0 + $0x78] sm:$0xff]  ;;  %v48_v47 = vld [vmem:[%s790_s0 + $0x110] sm:$0xff]  ;;  %v51_v48 = vld [vmem:[%s790_s0 + $0x128] sm:$0xff] }
  0x11   :  { %161 = vmatprep.subr.mxu0 %v422_v0  ;;  %393 = vmatprep.subr.mxu1 %v422_v0  ;;  %v28_v49 = vld [vmem:[%s790_s0 + $0x70] sm:$0xff]  ;;  %v31_v50 = vld [vmem:[%s790_s0 + $0x88] sm:$0xff]  ;;  %v50_v51 = vld [vmem:[%s790_s0 + $0x120] sm:$0xff] }
  0x12   :  { %162 = vmatpush1.msra.mxu0 %v63_v9  ;;  %411 = vmatpush1.msra.mxu1 %v63_v9  ;;  %v53_v52 = vld [vmem:[%s790_s0 + $0x138] sm:$0xff]  ;;  %v30_v53 = vld [vmem:[%s790_s0 + $0x80] sm:$0xff]  ;;  %v52_v55 = vld [vmem:[%s790_s0 + $0x130] sm:$0xff] }
  0x13   :  { %163 = vmatprep.subr.mxu0 %v422_v0  ;;  %394 = vmatprep.subr.mxu1 %v422_v0  ;;  %v33_v54 = vld [vmem:[%s790_s0 + $0x98] sm:$0xff]  ;;  %v55_v56 = vld [vmem:[%s790_s0 + $0x148] sm:$0x3]  ;;  %v32_v57 = vld [vmem:[%s790_s0 + $0x90] sm:$0xff] }
  0x14   :  { %164 = vmatpush1.msra.mxu0 %v62_v10  ;;  %412 = vmatpush1.msra.mxu1 %v62_v10  ;;  %v35_v58 = vld [vmem:[%s790_s0 + $0xa8] sm:$0xff]  ;;  %v54_v59 = vld [vmem:[%s790_s0 + $0x140] sm:$0x3] }
  0x15   :  { %165 = vmatprep.subr.mxu0 %v422_v0  ;;  %395 = vmatprep.subr.mxu1 %v422_v0  ;;  %v34_v60 = vld [vmem:[%s790_s0 + $0xa0] sm:$0xff] }
  0x16   :  { %166 = vmatpush1.msra.mxu0 %v61_v11  ;;  %413 = vmatpush1.msra.mxu1 %v61_v11  ;;  %v683_v61 = vld [vmem:[%s791_s2] ss:$0 sm:$0xff] }
  0x17   :  { %167 = vmatprep.subr.mxu0 %v422_v0  ;;  %396 = vmatprep.subr.mxu1 %v422_v0 }
  0x18   :  { %168 = vmatpush1.msra.mxu0 %v60_v12  ;;  %414 = vmatpush1.msra.mxu1 %v60_v12 }
  0x19   :  { %169 = vmatprep.subr.mxu0 %v422_v0  ;;  %397 = vmatprep.subr.mxu1 %v422_v0 }
  0x1a   :  { %170 = vmatpush1.msra.mxu0 %v59_v13  ;;  %415 = vmatpush1.msra.mxu1 %v59_v13 }
  0x1b   :  { %171 = vmatprep.subr.mxu0 %v422_v0  ;;  %398 = vmatprep.subr.mxu1 %v422_v0 }
  0x1c   :  { %172 = vmatpush1.msra.mxu0 %v58_v14  ;;  %416 = vmatpush1.msra.mxu1 %v58_v14 }
  0x1d   :  { %173 = vmatprep.subr.mxu0 %v422_v0  ;;  %399 = vmatprep.subr.mxu1 %v422_v0 }
  0x1e   :  { %174 = vmatpush1.msra.mxu0 %v57_v15  ;;  %417 = vmatpush1.msra.mxu1 %v57_v15 }
  0x1f   :  { %175 = vmatprep.subr.mxu0 %v422_v0  ;;  %400 = vmatprep.subr.mxu1 %v422_v0 }
  0x20   :  { %176 = vmatpush1.msra.mxu0 %v56_v16  ;;  %418 = vmatpush1.msra.mxu1 %v56_v16 }
  0x21   :  { %205 = vmatprep.subr.mxu0 %v422_v0  ;;  %401 = vmatprep.subr.mxu1 %v422_v0 }
  0x22   :  { %206 = vmatpush2.msra.mxu0 %v73_v17  ;;  %419 = vmatpush2.msra.mxu1 %v73_v17 }
  0x23   :  { %207 = vmatprep.subr.mxu0 %v422_v0  ;;  %364 = vmatprep.mubr.msk.f32.mxu0 %vm81_vm0, %v15_v18 }
  0x24   :  { %208 = vmatpush2.msra.mxu0 %v72_v19  ;;  %402 = vmatprep.subr.mxu1 %v422_v0 }
  0x25   :  { %210 = vmatmul.mubr.f32.vlgmr.msra.gmra.mxu0 %v14_v20  ;;  %420 = vmatpush2.msra.mxu1 %v72_v19 }
  0x26   :  { %375 = vmatprep.mubr.msk.f32.mxu1 %vm81_vm0, %v37_v21  ;;  %365 = vmatprep.mubr.msk.f32.mxu0 %vm81_vm0, %v17_v22 }
  0x27   :  { %265 = vmatmul.mubr.f32.vlgmr.msra.gmra.mxu1 %v36_v23 }
  0x28   :  { %376 = vmatprep.mubr.msk.f32.mxu1 %vm81_vm0, %v39_v24 }
  0x29   :  { %215 = vmatmul.mubr.f32.gmra.mxu0 %v16_v25 }
  0x2a   :  { %366 = vmatprep.mubr.msk.f32.mxu0 %vm81_vm0, %v19_v26 }
  0x2b   :  { %270 = vmatmul.mubr.f32.gmra.mxu1 %v38_v27 }
  0x2c   :  { %377 = vmatprep.mubr.msk.f32.mxu1 %vm81_vm0, %v41_v28 }
  0x2d   :  { %220 = vmatmul.mubr.f32.gmra.mxu0 %v18_v29 }
  0x2e   :  { %367 = vmatprep.mubr.msk.f32.mxu0 %vm81_vm0, %v21_v30 }
  0x2f   :  { %275 = vmatmul.mubr.f32.gmra.mxu1 %v40_v31 }
  0x30   :  { %378 = vmatprep.mubr.msk.f32.mxu1 %vm81_vm0, %v43_v32 }
  0x31   :  { %225 = vmatmul.mubr.f32.gmra.mxu0 %v20_v33 }
  0x32   :  { %368 = vmatprep.mubr.msk.f32.mxu0 %vm81_vm0, %v23_v34 }
  0x33   :  { %280 = vmatmul.mubr.f32.gmra.mxu1 %v42_v35 }
  0x34   :  { %379 = vmatprep.mubr.msk.f32.mxu1 %vm81_vm0, %v45_v36 }
  0x35   :  { %230 = vmatmul.mubr.f32.gmra.mxu0 %v22_v37 }
  0x36   :  { %369 = vmatprep.mubr.msk.f32.mxu0 %vm81_vm0, %v25_v38 }
  0x37   :  { %285 = vmatmul.mubr.f32.gmra.mxu1 %v44_v39 }
  0x38   :  { %380 = vmatprep.mubr.msk.f32.mxu1 %vm81_vm0, %v47_v40 }
  0x39   :  { %235 = vmatmul.mubr.f32.gmra.mxu0 %v24_v41 }
  0x3a   :  { %370 = vmatprep.mubr.msk.f32.mxu0 %vm81_vm0, %v27_v42 }
  0x3b   :  { %290 = vmatmul.mubr.f32.gmra.mxu1 %v46_v43 }
  0x3c   :  { %381 = vmatprep.mubr.msk.f32.mxu1 %vm81_vm0, %v49_v44 }
  0x3d   :  { %240 = vmatmul.mubr.f32.gmra.mxu0 %v26_v45 }
  0x3e   :  { %371 = vmatprep.mubr.msk.f32.mxu0 %vm81_vm0, %v29_v46 }
  0x3f   :  { %295 = vmatmul.mubr.f32.gmra.mxu1 %v48_v47 }
  0x40   :  { %382 = vmatprep.mubr.msk.f32.mxu1 %vm81_vm0, %v51_v48 }
  0x41   :  { %245 = vmatmul.mubr.f32.gmra.mxu0 %v28_v49 }
  0x42   :  { %372 = vmatprep.mubr.msk.f32.mxu0 %vm81_vm0, %v31_v50 }
  0x43   :  { %300 = vmatmul.mubr.f32.gmra.mxu1 %v50_v51 }
  0x44   :  { %383 = vmatprep.mubr.msk.f32.mxu1 %vm81_vm0, %v53_v52 }
  0x45   :  { %250 = vmatmul.mubr.f32.gmra.mxu0 %v30_v53 }
  0x46   :  { %373 = vmatprep.mubr.msk.f32.mxu0 %vm81_vm0, %v33_v54 }
  0x47   :  { %305 = vmatmul.mubr.f32.gmra.mxu1 %v52_v55 }
  0x48   :  { %384 = vmatprep.mubr.msk.f32.mxu1 %vm81_vm0, %v55_v56 }
  0x49   :  { %255 = vmatmul.mubr.f32.gmra.mxu0 %v32_v57 }
  0x4a   :  { %374 = vmatprep.mubr.msk.f32.mxu0 %vm81_vm0, %v35_v58 }
  0x4b   :  { %310 = vmatmul.mubr.f32.gmra.mxu1 %v54_v59 }
  0x4d   :  { %260 = vmatmul.mubr.f32.gmra.mxu0 %v34_v60 }
  0xe5   :  { %v211_v62 = vpop.f32.mrf.mxu0 }
  0xe6   :  { %v212_v63 = vadd.f32 %v683_v61, %v211_v62 }
  0xe7   :  { %v213_v0 = vpop.f32.mrf.mxu0  ;;  %v266_v1 = vpop.f32.mrf.mxu1 }
  0xe8   :  { %v315_v2 = vmax.f32 %v212_v63, 0.0  ;;  %v267_v3 = vadd.f32 %v683_v61, %v266_v1 }
  0xe9   :  { %v216_v4 = vpop.f32.mrf.mxu0  ;;  %v268_v5 = vpop.f32.mrf.mxu1 }
  0xea   :  { %337 = vst.msk [vmem:[%s792_s3] sm:$0xff] %vm336_vm1, %v315_v2  ;;  %v326_v6 = vmax.f32 %v267_v3, 0.0  ;;  %v217_v7 = vadd.f32 %v683_v61, %v216_v4 }
  0xeb   :  { %v218_v8 = vpop.f32.mrf.mxu0  ;;  %v271_v9 = vpop.f32.mrf.mxu1 }
  0xec   :  { %348 = vst.msk [vmem:[%s792_s3 + $0x58] sm:$0xff] %vm336_vm1, %v326_v6  ;;  %v316_v10 = vmax.f32 %v217_v7, 0.0  ;;  %v272_v11 = vadd.f32 %v683_v61, %v271_v9 }
  0xed   :  { %v221_v12 = vpop.f32.mrf.mxu0  ;;  %v273_v13 = vpop.f32.mrf.mxu1 }
  0xee   :  { %338 = vst.msk [vmem:[%s792_s3 + $0x8] sm:$0xff] %vm336_vm1, %v316_v10  ;;  %v327_v14 = vmax.f32 %v272_v11, 0.0  ;;  %v222_v15 = vadd.f32 %v683_v61, %v221_v12 }
  0xef   :  { %v223_v16 = vpop.f32.mrf.mxu0  ;;  %v276_v17 = vpop.f32.mrf.mxu1 }
  0xf0   :  { %349 = vst.msk [vmem:[%s792_s3 + $0x60] sm:$0xff] %vm336_vm1, %v327_v14  ;;  %v317_v18 = vmax.f32 %v222_v15, 0.0  ;;  %v277_v19 = vadd.f32 %v683_v61, %v276_v17 }
  0xf1   :  { %v226_v20 = vpop.f32.mrf.mxu0  ;;  %v278_v21 = vpop.f32.mrf.mxu1 }
  0xf2   :  { %339 = vst.msk [vmem:[%s792_s3 + $0x10] sm:$0xff] %vm336_vm1, %v317_v18  ;;  %v328_v22 = vmax.f32 %v277_v19, 0.0  ;;  %v227_v23 = vadd.f32 %v683_v61, %v226_v20 }
  0xf3   :  { %v228_v24 = vpop.f32.mrf.mxu0  ;;  %v281_v25 = vpop.f32.mrf.mxu1 }
  0xf4   :  { %350 = vst.msk [vmem:[%s792_s3 + $0x68] sm:$0xff] %vm336_vm1, %v328_v22  ;;  %v318_v26 = vmax.f32 %v227_v23, 0.0  ;;  %v282_v27 = vadd.f32 %v683_v61, %v281_v25 }
  0xf5   :  { %v231_v28 = vpop.f32.mrf.mxu0  ;;  %v283_v29 = vpop.f32.mrf.mxu1 }
  0xf6   :  { %340 = vst.msk [vmem:[%s792_s3 + $0x18] sm:$0xff] %vm336_vm1, %v318_v26  ;;  %v329_v30 = vmax.f32 %v282_v27, 0.0  ;;  %v232_v31 = vadd.f32 %v683_v61, %v231_v28 }
  0xf7   :  { %v233_v32 = vpop.f32.mrf.mxu0  ;;  %v286_v33 = vpop.f32.mrf.mxu1 }
  0xf8   :  { %351 = vst.msk [vmem:[%s792_s3 + $0x70] sm:$0xff] %vm336_vm1, %v329_v30  ;;  %v319_v34 = vmax.f32 %v232_v31, 0.0  ;;  %v287_v35 = vadd.f32 %v683_v61, %v286_v33 }
  0xf9   :  { %v236_v36 = vpop.f32.mrf.mxu0  ;;  %v288_v37 = vpop.f32.mrf.mxu1 }
  0xfa   :  { %341 = vst.msk [vmem:[%s792_s3 + $0x20] sm:$0xff] %vm336_vm1, %v319_v34  ;;  %v330_v38 = vmax.f32 %v287_v35, 0.0  ;;  %v237_v39 = vadd.f32 %v683_v61, %v236_v36 }
  0xfb   :  { %v238_v40 = vpop.f32.mrf.mxu0  ;;  %v291_v41 = vpop.f32.mrf.mxu1 }
  0xfc   :  { %352 = vst.msk [vmem:[%s792_s3 + $0x78] sm:$0xff] %vm336_vm1, %v330_v38  ;;  %v320_v42 = vmax.f32 %v237_v39, 0.0  ;;  %v292_v43 = vadd.f32 %v683_v61, %v291_v41 }
  0xfd   :  { %v241_v44 = vpop.f32.mrf.mxu0  ;;  %v293_v45 = vpop.f32.mrf.mxu1 }
  0xfe   :  { %342 = vst.msk [vmem:[%s792_s3 + $0x28] sm:$0xff] %vm336_vm1, %v320_v42  ;;  %v331_v46 = vmax.f32 %v292_v43, 0.0  ;;  %v242_v47 = vadd.f32 %v683_v61, %v241_v44 }
  0xff   :  { %v243_v48 = vpop.f32.mrf.mxu0  ;;  %v296_v49 = vpop.f32.mrf.mxu1 }
 0x100   :  { %353 = vst.msk [vmem:[%s792_s3 + $0x80] sm:$0xff] %vm336_vm1, %v331_v46  ;;  %v321_v50 = vmax.f32 %v242_v47, 0.0  ;;  %v297_v51 = vadd.f32 %v683_v61, %v296_v49 }
 0x101   :  { %v246_v52 = vpop.f32.mrf.mxu0  ;;  %v298_v53 = vpop.f32.mrf.mxu1 }
 0x102   :  { %343 = vst.msk [vmem:[%s792_s3 + $0x30] sm:$0xff] %vm336_vm1, %v321_v50  ;;  %v332_v54 = vmax.f32 %v297_v51, 0.0  ;;  %v247_v55 = vadd.f32 %v683_v61, %v246_v52 }
 0x103   :  { %v248_v56 = vpop.f32.mrf.mxu0  ;;  %v301_v57 = vpop.f32.mrf.mxu1 }
 0x104   :  { %354 = vst.msk [vmem:[%s792_s3 + $0x88] sm:$0xff] %vm336_vm1, %v332_v54  ;;  %v322_v58 = vmax.f32 %v247_v55, 0.0  ;;  %v302_v59 = vadd.f32 %v683_v61, %v301_v57 }
 0x105   :  { %v251_v60 = vpop.f32.mrf.mxu0  ;;  %v303_v62 = vpop.f32.mrf.mxu1 }
 0x106   :  { %344 = vst.msk [vmem:[%s792_s3 + $0x38] sm:$0xff] %vm336_vm1, %v322_v58  ;;  %v333_v63 = vmax.f32 %v302_v59, 0.0  ;;  %v252_v0 = vadd.f32 %v683_v61, %v251_v60 }
 0x107   :  { %v253_v1 = vpop.f32.mrf.mxu0  ;;  %v306_v2 = vpop.f32.mrf.mxu1 }
 0x108   :  { %355 = vst.msk [vmem:[%s792_s3 + $0x90] sm:$0xff] %vm336_vm1, %v333_v63  ;;  %v323_v3 = vmax.f32 %v252_v0, 0.0  ;;  %v307_v4 = vadd.f32 %v683_v61, %v306_v2 }
 0x109   :  { %v256_v5 = vpop.f32.mrf.mxu0  ;;  %v308_v6 = vpop.f32.mrf.mxu1 }
 0x10a   :  { %345 = vst.msk [vmem:[%s792_s3 + $0x40] sm:$0xff] %vm336_vm1, %v323_v3  ;;  %v334_v7 = vmax.f32 %v307_v4, 0.0  ;;  %v257_v8 = vadd.f32 %v683_v61, %v256_v5 }
 0x10b   :  { %v258_v9 = vpop.f32.mrf.mxu0  ;;  %v311_v10 = vpop.f32.mrf.mxu1 }
 0x10c   :  { %356 = vst.msk [vmem:[%s792_s3 + $0x98] sm:$0xff] %vm336_vm1, %v334_v7  ;;  %v324_v11 = vmax.f32 %v257_v8, 0.0  ;;  %v312_v12 = vadd.f32 %v683_v61, %v311_v10 }
 0x10d   :  { %v261_v13 = vpop.f32.mrf.mxu0  ;;  %v313_v14 = vpop.f32.mrf.mxu1 }
 0x10e   :  { %346 = vst.msk [vmem:[%s792_s3 + $0x48] sm:$0xff] %vm336_vm1, %v324_v11  ;;  %v335_v15 = vmax.f32 %v312_v12, 0.0  ;;  %v262_v16 = vadd.f32 %v683_v61, %v261_v13 }
 0x10f   :  { %v263_v17 = vpop.f32.mrf.mxu0 }
 0x110   :  { %358 = vst.msk [vmem:[%s792_s3 + $0xa0] sm:$0x3] %vm357_vm2, %v335_v15  ;;  %v325_v18 = vmax.f32 %v262_v16, 0.0 }
 0x112   :  { %347 = vst.msk [vmem:[%s792_s3 + $0x50] sm:$0xff] %vm336_vm1, %v325_v18 }

// kernel: actor_critic_forward.5
= control target key start
LH: loop header
LB: loop body
LE: loop exit
PB: predicated region body
PF: predicated region fallthrough
CT: control target
= control target key end

     0   :  { %15 = vsyncpa [#allocation4], 0  ;;  %s4024_s0 = inlined_call_operand.<no memory space> [shape: f32[1], index: 0, kind: input, shape index: {}]   ;;  %s4025_s1 = inlined_call_operand.vmem [shape: f32[2,2592], index: 1, kind: input, shape index: {}]   ;;  %s4026_s2 = inlined_call_operand.vmem [shape: f32[2592,256], index: 2, kind: input, shape index: {}]   ;;  %s4027_s3 = inlined_call_operand.vmem [shape: f32[1,256], index: 3, kind: input, shape index: {}]   ;;  %s4028_s4 = inlined_call_operand.vmem [shape: f32[256,7], index: 4, kind: input, shape index: {}]   ;;  %s4029_s5 = inlined_call_operand.vmem [shape: f32[1,7], index: 5, kind: input, shape index: {}]   ;;  %s4030_s6 = inlined_call_operand.hbm [shape: f32[2,6], index: 6, kind: output, shape index: {0}]   ;;  %s4031_s7 = inlined_call_operand.hbm [shape: f32[2,6], index: 7, kind: output, shape index: {1}]   ;;  %s4032_s8 = inlined_call_operand.vmem [shape: f32[2,1], index: 8, kind: output, shape index: {2}]  }
   0x1   :  { %v66_v0 = vld [vmem:[%s4026_s2 + $0xf8] sm:$0xff]  ;;  %v65_v1 = vld [vmem:[%s4026_s2 + $0xf0] sm:$0xff]  ;;  %v64_v2 = vld [vmem:[%s4026_s2 + $0xe8] sm:$0xff] }
   0x2   :  { %816 = vmatprep.subr.mxu0 %v66_v0  ;;  %v130_v3 = vld [vmem:[%s4026_s2 + $0x2f8] sm:$0xff]  ;;  %v63_v4 = vld [vmem:[%s4026_s2 + $0xe0] sm:$0xff]  ;;  %v129_v5 = vld [vmem:[%s4026_s2 + $0x2f0] sm:$0xff] }
   0x3   :  { %817 = vmatpush1.msra.mxu0 %v65_v1  ;;  %887 = vmatprep.subr.mxu1 %v130_v3  ;;  %v62_v6 = vld [vmem:[%s4026_s2 + $0xd8] sm:$0xff]  ;;  %v128_v7 = vld [vmem:[%s4026_s2 + $0x2e8] sm:$0xff]  ;;  %v61_v8 = vld [vmem:[%s4026_s2 + $0xd0] sm:$0xff] }
   0x4   :  { %818 = vmatprep.subr.mxu0 %v64_v2  ;;  %888 = vmatpush1.msra.mxu1 %v129_v5  ;;  %v127_v9 = vld [vmem:[%s4026_s2 + $0x2e0] sm:$0xff]  ;;  %v126_v10 = vld [vmem:[%s4026_s2 + $0x2d8] sm:$0xff]  ;;  %v60_v11 = vld [vmem:[%s4026_s2 + $0xc8] sm:$0xff] }
   0x5   :  { %819 = vmatpush1.msra.mxu0 %v63_v4  ;;  %889 = vmatprep.subr.mxu1 %v128_v7  ;;  %v125_v12 = vld [vmem:[%s4026_s2 + $0x2d0] sm:$0xff]  ;;  %v59_v13 = vld [vmem:[%s4026_s2 + $0xc0] sm:$0xff]  ;;  %v124_v14 = vld [vmem:[%s4026_s2 + $0x2c8] sm:$0xff] }
   0x6   :  { %820 = vmatprep.subr.mxu0 %v62_v6  ;;  %890 = vmatpush1.msra.mxu1 %v127_v9  ;;  %v58_v15 = vld [vmem:[%s4026_s2 + $0xb8] sm:$0xff]  ;;  %v123_v16 = vld [vmem:[%s4026_s2 + $0x2c0] sm:$0xff]  ;;  %v57_v17 = vld [vmem:[%s4026_s2 + $0xb0] sm:$0xff] }
   0x7   :  { %821 = vmatpush1.msra.mxu0 %v61_v8  ;;  %891 = vmatprep.subr.mxu1 %v126_v10  ;;  %v122_v18 = vld [vmem:[%s4026_s2 + $0x2b8] sm:$0xff]  ;;  %v56_v19 = vld [vmem:[%s4026_s2 + $0xa8] sm:$0xff]  ;;  %v121_v20 = vld [vmem:[%s4026_s2 + $0x2b0] sm:$0xff] }
   0x8   :  { %822 = vmatprep.subr.mxu0 %v60_v11  ;;  %892 = vmatpush1.msra.mxu1 %v125_v12  ;;  %v55_v21 = vld [vmem:[%s4026_s2 + $0xa0] sm:$0xff]  ;;  %v120_v22 = vld [vmem:[%s4026_s2 + $0x2a8] sm:$0xff]  ;;  %v54_v23 = vld [vmem:[%s4026_s2 + $0x98] sm:$0xff] }
   0x9   :  { %823 = vmatpush1.msra.mxu0 %v59_v13  ;;  %893 = vmatprep.subr.mxu1 %v124_v14  ;;  %v119_v24 = vld [vmem:[%s4026_s2 + $0x2a0] sm:$0xff]  ;;  %v53_v25 = vld [vmem:[%s4026_s2 + $0x90] sm:$0xff]  ;;  %v118_v26 = vld [vmem:[%s4026_s2 + $0x298] sm:$0xff] }
   0xa   :  { %824 = vmatprep.subr.mxu0 %v58_v15  ;;  %894 = vmatpush1.msra.mxu1 %v123_v16  ;;  %v52_v27 = vld [vmem:[%s4026_s2 + $0x88] sm:$0xff]  ;;  %v117_v28 = vld [vmem:[%s4026_s2 + $0x290] sm:$0xff]  ;;  %v51_v29 = vld [vmem:[%s4026_s2 + $0x80] sm:$0xff] }
   0xb   :  { %825 = vmatpush1.msra.mxu0 %v57_v17  ;;  %895 = vmatprep.subr.mxu1 %v122_v18  ;;  %v116_v30 = vld [vmem:[%s4026_s2 + $0x288] sm:$0xff]  ;;  %v50_v31 = vld [vmem:[%s4026_s2 + $0x78] sm:$0xff]  ;;  %v115_v32 = vld [vmem:[%s4026_s2 + $0x280] sm:$0xff] }
   0xc   :  { %826 = vmatprep.subr.mxu0 %v56_v19  ;;  %896 = vmatpush1.msra.mxu1 %v121_v20  ;;  %v49_v33 = vld [vmem:[%s4026_s2 + $0x70] sm:$0xff]  ;;  %v114_v34 = vld [vmem:[%s4026_s2 + $0x278] sm:$0xff]  ;;  %v48_v35 = vld [vmem:[%s4026_s2 + $0x68] sm:$0xff] }
   0xd   :  { %827 = vmatpush1.msra.mxu0 %v55_v21  ;;  %897 = vmatprep.subr.mxu1 %v120_v22  ;;  %v113_v36 = vld [vmem:[%s4026_s2 + $0x270] sm:$0xff]  ;;  %v47_v37 = vld [vmem:[%s4026_s2 + $0x60] sm:$0xff]  ;;  %v112_v38 = vld [vmem:[%s4026_s2 + $0x268] sm:$0xff] }
   0xe   :  { %828 = vmatprep.subr.mxu0 %v54_v23  ;;  %898 = vmatpush1.msra.mxu1 %v119_v24  ;;  %v46_v39 = vld [vmem:[%s4026_s2 + $0x58] sm:$0xff]  ;;  %v111_v40 = vld [vmem:[%s4026_s2 + $0x260] sm:$0xff]  ;;  %v45_v41 = vld [vmem:[%s4026_s2 + $0x50] sm:$0xff] }
   0xf   :  { %829 = vmatpush1.msra.mxu0 %v53_v25  ;;  %899 = vmatprep.subr.mxu1 %v118_v26  ;;  %v110_v42 = vld [vmem:[%s4026_s2 + $0x258] sm:$0xff]  ;;  %v44_v43 = vld [vmem:[%s4026_s2 + $0x48] sm:$0xff]  ;;  %v109_v44 = vld [vmem:[%s4026_s2 + $0x250] sm:$0xff] }
  0x10   :  { %830 = vmatprep.subr.mxu0 %v52_v27  ;;  %900 = vmatpush1.msra.mxu1 %v117_v28  ;;  %v43_v45 = vld [vmem:[%s4026_s2 + $0x40] sm:$0xff]  ;;  %v108_v46 = vld [vmem:[%s4026_s2 + $0x248] sm:$0xff]  ;;  %v42_v47 = vld [vmem:[%s4026_s2 + $0x38] sm:$0xff]  ;;  %v685_v27 = vlaneseq  ;;  %v1876_v28 = vmov 1983009808  }
  0x11   :  { %831 = vmatpush1.msra.mxu0 %v51_v29  ;;  %901 = vmatprep.subr.mxu1 %v116_v30  ;;  %v107_v48 = vld [vmem:[%s4026_s2 + $0x240] sm:$0xff]  ;;  %v41_v49 = vld [vmem:[%s4026_s2 + $0x30] sm:$0xff]  ;;  %v106_v50 = vld [vmem:[%s4026_s2 + $0x238] sm:$0xff]  ;;  %v703_v29 = vunpack.c.l.s4 %v1876_v28 }
  0x12   :  { %832 = vmatprep.subr.mxu0 %v50_v31  ;;  %902 = vmatpush1.msra.mxu1 %v115_v32  ;;  %v40_v51 = vld [vmem:[%s4026_s2 + $0x28] sm:$0xff]  ;;  %v105_v52 = vld [vmem:[%s4026_s2 + $0x230] sm:$0xff]  ;;  %v39_v53 = vld [vmem:[%s4026_s2 + $0x20] sm:$0xff] }
  0x13   :  { %833 = vmatpush1.msra.mxu0 %v49_v33  ;;  %903 = vmatprep.subr.mxu1 %v114_v34  ;;  %v104_v54 = vld [vmem:[%s4026_s2 + $0x228] sm:$0xff]  ;;  %v38_v55 = vld [vmem:[%s4026_s2 + $0x18] sm:$0xff]  ;;  %v103_v56 = vld [vmem:[%s4026_s2 + $0x220] sm:$0xff] }
  0x14   :  { %834 = vmatprep.subr.mxu0 %v48_v35  ;;  %904 = vmatpush1.msra.mxu1 %v113_v36  ;;  %v37_v57 = vld [vmem:[%s4026_s2 + $0x10] sm:$0xff]  ;;  %v102_v58 = vld [vmem:[%s4026_s2 + $0x218] sm:$0xff]  ;;  %v36_v59 = vld [vmem:[%s4026_s2 + $0x8] sm:$0xff] }
  0x15   :  { %835 = vmatpush1.msra.mxu0 %v47_v37  ;;  %905 = vmatprep.subr.mxu1 %v112_v38  ;;  %v101_v60 = vld [vmem:[%s4026_s2 + $0x210] sm:$0xff]  ;;  %v35_v61 = vld [vmem:[%s4026_s2] sm:$0xff]  ;;  %v100_v62 = vld [vmem:[%s4026_s2 + $0x208] sm:$0xff]  ;;  %v2223_v38 = vshrl.u32 %v685_v27, 7 }
  0x16   :  { %836 = vmatprep.subr.mxu0 %v46_v39  ;;  %906 = vmatpush1.msra.mxu1 %v111_v40  ;;  %v98_v63 = vld [vmem:[%s4026_s2 + $0x1f8] sm:$0xff]  ;;  %v99_v0 = vld [vmem:[%s4026_s2 + $0x200] sm:$0xff]  ;;  %v97_v1 = vld [vmem:[%s4026_s2 + $0x1f0] sm:$0xff]  ;;  %v704_v39 = vunpack.c.0.s8 %v703_v29 }
  0x17   :  { %837 = vmatpush1.msra.mxu0 %v45_v41  ;;  %907 = vmatprep.subr.mxu1 %v110_v42  ;;  %v162_v2 = vld [vmem:[%s4026_s2 + $0x3f8] sm:$0xff]  ;;  %v96_v3 = vld [vmem:[%s4026_s2 + $0x1e8] sm:$0xff]  ;;  %v161_v4 = vld [vmem:[%s4026_s2 + $0x3f0] sm:$0xff] }
  0x18   :  { %838 = vmatprep.subr.mxu0 %v44_v43  ;;  %908 = vmatpush1.msra.mxu1 %v109_v44  ;;  %v95_v5 = vld [vmem:[%s4026_s2 + $0x1e0] sm:$0xff]  ;;  %v160_v6 = vld [vmem:[%s4026_s2 + $0x3e8] sm:$0xff]  ;;  %v94_v7 = vld [vmem:[%s4026_s2 + $0x1d8] sm:$0xff] }
  0x19   :  { %839 = vmatpush1.msra.mxu0 %v43_v45  ;;  %909 = vmatprep.subr.mxu1 %v108_v46  ;;  %v159_v8 = vld [vmem:[%s4026_s2 + $0x3e0] sm:$0xff]  ;;  %v93_v9 = vld [vmem:[%s4026_s2 + $0x1d0] sm:$0xff]  ;;  %v158_v10 = vld [vmem:[%s4026_s2 + $0x3d8] sm:$0xff] }
  0x1a   :  { %840 = vmatprep.subr.mxu0 %v42_v47  ;;  %910 = vmatpush1.msra.mxu1 %v107_v48  ;;  %v92_v11 = vld [vmem:[%s4026_s2 + $0x1c8] sm:$0xff]  ;;  %v157_v12 = vld [vmem:[%s4026_s2 + $0x3d0] sm:$0xff]  ;;  %v91_v13 = vld [vmem:[%s4026_s2 + $0x1c0] sm:$0xff]  ;;  %v2250_v48 = vsub.s32 %v704_v39, %v2223_v38 }
  0x1b   :  { %841 = vmatpush1.msra.mxu0 %v41_v49  ;;  %911 = vmatprep.subr.mxu1 %v106_v50  ;;  %v156_v14 = vld [vmem:[%s4026_s2 + $0x3c8] sm:$0xff]  ;;  %v90_v15 = vld [vmem:[%s4026_s2 + $0x1b8] sm:$0xff]  ;;  %v155_v16 = vld [vmem:[%s4026_s2 + $0x3c0] sm:$0xff] }
  0x1c   :  { %842 = vmatprep.subr.mxu0 %v40_v51  ;;  %912 = vmatpush1.msra.mxu1 %v105_v52  ;;  %v89_v17 = vld [vmem:[%s4026_s2 + $0x1b0] sm:$0xff]  ;;  %v154_v18 = vld [vmem:[%s4026_s2 + $0x3b8] sm:$0xff]  ;;  %v88_v19 = vld [vmem:[%s4026_s2 + $0x1a8] sm:$0xff] }
  0x1d   :  { %843 = vmatpush1.msra.mxu0 %v39_v53  ;;  %913 = vmatprep.subr.mxu1 %v104_v54  ;;  %v153_v20 = vld [vmem:[%s4026_s2 + $0x3b0] sm:$0xff]  ;;  %v87_v21 = vld [vmem:[%s4026_s2 + $0x1a0] sm:$0xff]  ;;  %v152_v22 = vld [vmem:[%s4026_s2 + $0x3a8] sm:$0xff] }
  0x1e   :  { %844 = vmatprep.subr.mxu0 %v38_v55  ;;  %914 = vmatpush1.msra.mxu1 %v103_v56  ;;  %v86_v23 = vld [vmem:[%s4026_s2 + $0x198] sm:$0xff]  ;;  %v151_v24 = vld [vmem:[%s4026_s2 + $0x3a0] sm:$0xff]  ;;  %v85_v25 = vld [vmem:[%s4026_s2 + $0x190] sm:$0xff] }
  0x1f   :  { %845 = vmatpush1.msra.mxu0 %v37_v57  ;;  %915 = vmatprep.subr.mxu1 %v102_v58  ;;  %v150_v26 = vld [vmem:[%s4026_s2 + $0x398] sm:$0xff]  ;;  %v84_v30 = vld [vmem:[%s4026_s2 + $0x188] sm:$0xff]  ;;  %v149_v31 = vld [vmem:[%s4026_s2 + $0x390] sm:$0xff] }
  0x20   :  { %846 = vmatprep.subr.mxu0 %v36_v59  ;;  %916 = vmatpush1.msra.mxu1 %v101_v60  ;;  %v83_v32 = vld [vmem:[%s4026_s2 + $0x180] sm:$0xff]  ;;  %v148_v33 = vld [vmem:[%s4026_s2 + $0x388] sm:$0xff]  ;;  %v82_v34 = vld [vmem:[%s4026_s2 + $0x178] sm:$0xff] }
  0x21   :  { %847 = vmatpush1.msra.mxu0 %v35_v61  ;;  %917 = vmatprep.subr.mxu1 %v100_v62  ;;  %v147_v35 = vld [vmem:[%s4026_s2 + $0x380] sm:$0xff]  ;;  %v81_v36 = vld [vmem:[%s4026_s2 + $0x170] sm:$0xff]  ;;  %v146_v37 = vld [vmem:[%s4026_s2 + $0x378] sm:$0xff] }
  0x22   :  { %848 = vmatprep.subr.mxu0 %v98_v63  ;;  %918 = vmatpush1.msra.mxu1 %v99_v0  ;;  %v80_v40 = vld [vmem:[%s4026_s2 + $0x168] sm:$0xff]  ;;  %v145_v41 = vld [vmem:[%s4026_s2 + $0x370] sm:$0xff]  ;;  %v79_v42 = vld [vmem:[%s4026_s2 + $0x160] sm:$0xff] }
  0x23   :  { %849 = vmatpush2.msra.mxu0 %v97_v1  ;;  %919 = vmatprep.subr.mxu1 %v162_v2  ;;  %v144_v43 = vld [vmem:[%s4026_s2 + $0x368] sm:$0xff]  ;;  %v78_v44 = vld [vmem:[%s4026_s2 + $0x158] sm:$0xff]  ;;  %v143_v45 = vld [vmem:[%s4026_s2 + $0x360] sm:$0xff] }
  0x24   :  { %850 = vmatprep.subr.mxu0 %v96_v3  ;;  %920 = vmatpush2.msra.mxu1 %v161_v4  ;;  %v77_v46 = vld [vmem:[%s4026_s2 + $0x150] sm:$0xff]  ;;  %v142_v47 = vld [vmem:[%s4026_s2 + $0x358] sm:$0xff]  ;;  %v76_v49 = vld [vmem:[%s4026_s2 + $0x148] sm:$0xff] }
  0x25   :  { %851 = vmatpush2.msra.mxu0 %v95_v5  ;;  %921 = vmatprep.subr.mxu1 %v160_v6  ;;  %v141_v50 = vld [vmem:[%s4026_s2 + $0x350] sm:$0xff]  ;;  %v29_v51 = vld [vmem:[%s4025_s1] sm:$0xff]  ;;  %v140_v53 = vld [vmem:[%s4026_s2 + $0x348] sm:$0xff] }
  0x26   :  { %852 = vmatprep.subr.mxu0 %v94_v7  ;;  %922 = vmatpush2.msra.mxu1 %v159_v8  ;;  %v75_v52 = vld [vmem:[%s4026_s2 + $0x140] sm:$0xff]  ;;  %v74_v54 = vld [vmem:[%s4026_s2 + $0x138] sm:$0xff]  ;;  %v73_v56 = vld [vmem:[%s4026_s2 + $0x130] sm:$0xff]  ;;  %v708_v58 = vrot.slane %v29_v51, %v2250_v48  ;;  %v701_v59 = vcombine.high %v29_v51, %v29_v51 }
  0x27   :  { %853 = vmatpush2.msra.mxu0 %v93_v9  ;;  %923 = vmatprep.subr.mxu1 %v158_v10  ;;  %v139_v55 = vld [vmem:[%s4026_s2 + $0x340] sm:$0xff]  ;;  %v138_v57 = vld [vmem:[%s4026_s2 + $0x338] sm:$0xff]  ;;  %v72_v60 = vld [vmem:[%s4026_s2 + $0x128] sm:$0xff] }
  0x28   :  { %854 = vmatprep.subr.mxu0 %v92_v11  ;;  %924 = vmatpush2.msra.mxu1 %v157_v12  ;;  %v137_v61 = vld [vmem:[%s4026_s2 + $0x330] sm:$0xff]  ;;  %v71_v62 = vld [vmem:[%s4026_s2 + $0x120] sm:$0xff]  ;;  %v136_v63 = vld [vmem:[%s4026_s2 + $0x328] sm:$0xff]  ;;  %v716_v4 = vcombine.high %v708_v58, %v708_v58  ;;  %v715_v5 = vrot.slane %v701_v59, %v2250_v48 }
  0x29   :  { %855 = vmatpush2.msra.mxu0 %v91_v13  ;;  %925 = vmatprep.subr.mxu1 %v156_v14  ;;  %v70_v0 = vld [vmem:[%s4026_s2 + $0x118] sm:$0xff]  ;;  %v135_v1 = vld [vmem:[%s4026_s2 + $0x320] sm:$0xff]  ;;  %v69_v2 = vld [vmem:[%s4026_s2 + $0x110] sm:$0xff] }
  0x2a   :  { %856 = vmatprep.subr.mxu0 %v90_v15  ;;  %926 = vmatpush2.msra.mxu1 %v155_v16  ;;  %v134_v3 = vld [vmem:[%s4026_s2 + $0x318] sm:$0xff]  ;;  %v68_v6 = vld [vmem:[%s4026_s2 + $0x108] sm:$0xff]  ;;  %v67_v7 = vld [vmem:[%s4026_s2 + $0x100] sm:$0xff]  ;;  %v717_v12 = vcombine.high %v715_v5, %v715_v5 }
  0x2b   :  { %857 = vmatpush2.msra.mxu0 %v89_v17  ;;  %927 = vmatprep.subr.mxu1 %v154_v18  ;;  %v133_v8 = vld [vmem:[%s4026_s2 + $0x310] sm:$0xff]  ;;  %v132_v9 = vld [vmem:[%s4026_s2 + $0x308] sm:$0xff]  ;;  %v194_v10 = vld [vmem:[%s4026_s2 + $0x4f8] sm:$0xff] }
  0x2c   :  { %858 = vmatprep.subr.mxu0 %v88_v19  ;;  %928 = vmatpush2.msra.mxu1 %v153_v20  ;;  %v131_v11 = vld [vmem:[%s4026_s2 + $0x300] sm:$0xff]  ;;  %v193_v13 = vld [vmem:[%s4026_s2 + $0x4f0] sm:$0xff]  ;;  %v192_v14 = vld [vmem:[%s4026_s2 + $0x4e8] sm:$0xff] }
  0x2d   :  { %859 = vmatpush2.msra.mxu0 %v87_v21  ;;  %929 = vmatprep.subr.mxu1 %v152_v22  ;;  %v258_v15 = vld [vmem:[%s4026_s2 + $0x6f8] sm:$0xff]  ;;  %v191_v16 = vld [vmem:[%s4026_s2 + $0x4e0] sm:$0xff]  ;;  %v257_v17 = vld [vmem:[%s4026_s2 + $0x6f0] sm:$0xff] }
  0x2e   :  { %860 = vmatprep.subr.mxu0 %v86_v23  ;;  %930 = vmatpush2.msra.mxu1 %v151_v24  ;;  %v190_v18 = vld [vmem:[%s4026_s2 + $0x4d8] sm:$0xff]  ;;  %v256_v19 = vld [vmem:[%s4026_s2 + $0x6e8] sm:$0xff]  ;;  %v189_v20 = vld [vmem:[%s4026_s2 + $0x4d0] sm:$0xff] }
  0x2f   :  { %861 = vmatpush2.msra.mxu0 %v85_v25  ;;  %931 = vmatprep.subr.mxu1 %v150_v26  ;;  %v255_v21 = vld [vmem:[%s4026_s2 + $0x6e0] sm:$0xff]  ;;  %v188_v22 = vld [vmem:[%s4026_s2 + $0x4c8] sm:$0xff]  ;;  %v254_v23 = vld [vmem:[%s4026_s2 + $0x6d8] sm:$0xff] }
  0x30   :  { %862 = vmatprep.subr.mxu0 %v84_v30  ;;  %932 = vmatpush2.msra.mxu1 %v149_v31  ;;  %v187_v24 = vld [vmem:[%s4026_s2 + $0x4c0] sm:$0xff]  ;;  %v253_v25 = vld [vmem:[%s4026_s2 + $0x6d0] sm:$0xff]  ;;  %v186_v26 = vld [vmem:[%s4026_s2 + $0x4b8] sm:$0xff] }
  0x31   :  { %863 = vmatpush2.msra.mxu0 %v83_v32  ;;  %933 = vmatprep.subr.mxu1 %v148_v33  ;;  %v252_v27 = vld [vmem:[%s4026_s2 + $0x6c8] sm:$0xff]  ;;  %v185_v28 = vld [vmem:[%s4026_s2 + $0x4b0] sm:$0xff]  ;;  %v251_v29 = vld [vmem:[%s4026_s2 + $0x6c0] sm:$0xff] }
  0x32   :  { %864 = vmatprep.subr.mxu0 %v82_v34  ;;  %934 = vmatpush2.msra.mxu1 %v147_v35  ;;  %v184_v30 = vld [vmem:[%s4026_s2 + $0x4a8] sm:$0xff]  ;;  %v250_v31 = vld [vmem:[%s4026_s2 + $0x6b8] sm:$0xff]  ;;  %v183_v32 = vld [vmem:[%s4026_s2 + $0x4a0] sm:$0xff] }
  0x33   :  { %865 = vmatpush2.msra.mxu0 %v81_v36  ;;  %935 = vmatprep.subr.mxu1 %v146_v37  ;;  %v249_v33 = vld [vmem:[%s4026_s2 + $0x6b0] sm:$0xff]  ;;  %v182_v34 = vld [vmem:[%s4026_s2 + $0x498] sm:$0xff]  ;;  %v248_v35 = vld [vmem:[%s4026_s2 + $0x6a8] sm:$0xff] }
  0x34   :  { %866 = vmatprep.subr.mxu0 %v80_v40  ;;  %936 = vmatpush2.msra.mxu1 %v145_v41  ;;  %v181_v36 = vld [vmem:[%s4026_s2 + $0x490] sm:$0xff]  ;;  %v247_v37 = vld [vmem:[%s4026_s2 + $0x6a0] sm:$0xff]  ;;  %v180_v39 = vld [vmem:[%s4026_s2 + $0x488] sm:$0xff] }
  0x35   :  { %867 = vmatpush2.msra.mxu0 %v79_v42  ;;  %937 = vmatprep.subr.mxu1 %v144_v43  ;;  %v246_v40 = vld [vmem:[%s4026_s2 + $0x698] sm:$0xff]  ;;  %v179_v41 = vld [vmem:[%s4026_s2 + $0x480] sm:$0xff]  ;;  %v245_v42 = vld [vmem:[%s4026_s2 + $0x690] sm:$0xff] }
  0x36   :  { %868 = vmatprep.subr.mxu0 %v78_v44  ;;  %938 = vmatpush2.msra.mxu1 %v143_v45  ;;  %v178_v43 = vld [vmem:[%s4026_s2 + $0x478] sm:$0xff]  ;;  %v244_v44 = vld [vmem:[%s4026_s2 + $0x688] sm:$0xff]  ;;  %v177_v45 = vld [vmem:[%s4026_s2 + $0x470] sm:$0xff] }
  0x37   :  { %869 = vmatpush2.msra.mxu0 %v77_v46  ;;  %939 = vmatprep.subr.mxu1 %v142_v47  ;;  %v243_v46 = vld [vmem:[%s4026_s2 + $0x680] sm:$0xff]  ;;  %v176_v47 = vld [vmem:[%s4026_s2 + $0x468] sm:$0xff]  ;;  %v241_v51 = vld [vmem:[%s4026_s2 + $0x670] sm:$0xff] }
  0x38   :  { %870 = vmatprep.subr.mxu0 %v76_v49  ;;  %940 = vmatpush2.msra.mxu1 %v141_v50  ;;  %v242_v49 = vld [vmem:[%s4026_s2 + $0x678] sm:$0xff]  ;;  %v175_v50 = vld [vmem:[%s4026_s2 + $0x460] sm:$0xff]  ;;  %v237_v59 = vld [vmem:[%s4026_s2 + $0x650] sm:$0xff] }
  0x39   :  { %871 = vmatpush2.msra.mxu0 %v75_v52  ;;  %941 = vmatprep.subr.mxu1 %v140_v53  ;;  %v174_v52 = vld [vmem:[%s4026_s2 + $0x458] sm:$0xff]  ;;  %v240_v53 = vld [vmem:[%s4026_s2 + $0x668] sm:$0xff] }
  0x3a   :  { %872 = vmatprep.subr.mxu0 %v74_v54  ;;  %942 = vmatpush2.msra.mxu1 %v139_v55  ;;  %v173_v54 = vld [vmem:[%s4026_s2 + $0x450] sm:$0xff]  ;;  %v239_v55 = vld [vmem:[%s4026_s2 + $0x660] sm:$0xff] }
  0x3b   :  { %873 = vmatpush2.msra.mxu0 %v73_v56  ;;  %943 = vmatprep.subr.mxu1 %v138_v57  ;;  %v172_v56 = vld [vmem:[%s4026_s2 + $0x448] sm:$0xff]  ;;  %v238_v57 = vld [vmem:[%s4026_s2 + $0x658] sm:$0xff] }
  0x3c   :  { %874 = vmatprep.subr.mxu0 %v72_v60  ;;  %944 = vmatpush2.msra.mxu1 %v137_v61  ;;  %v170_v60 = vld [vmem:[%s4026_s2 + $0x438] sm:$0xff]  ;;  %v236_v61 = vld [vmem:[%s4026_s2 + $0x648] sm:$0xff] }
  0x3d   :  { %875 = vmatpush2.msra.mxu0 %v71_v62  ;;  %945 = vmatprep.subr.mxu1 %v136_v63  ;;  %v169_v62 = vld [vmem:[%s4026_s2 + $0x430] sm:$0xff]  ;;  %v235_v63 = vld [vmem:[%s4026_s2 + $0x640] sm:$0xff] }
  0x3e   :  { %876 = vmatprep.subr.mxu0 %v70_v0  ;;  %946 = vmatpush2.msra.mxu1 %v135_v1  ;;  %v168_v0 = vld [vmem:[%s4026_s2 + $0x428] sm:$0xff]  ;;  %v234_v1 = vld [vmem:[%s4026_s2 + $0x638] sm:$0xff] }
  0x3f   :  { %877 = vmatpush2.msra.mxu0 %v69_v2  ;;  %947 = vmatprep.subr.mxu1 %v134_v3  ;;  %v167_v2 = vld [vmem:[%s4026_s2 + $0x420] sm:$0xff]  ;;  %v233_v3 = vld [vmem:[%s4026_s2 + $0x630] sm:$0xff] }
  0x40   :  { %878 = vmatprep.subr.mxu0 %v68_v6  ;;  %880 = vmatprep.mubr.f32.mxu0 %v716_v4  ;;  %v166_v4 = vld [vmem:[%s4026_s2 + $0x418] sm:$0xff]  ;;  %v165_v6 = vld [vmem:[%s4026_s2 + $0x410] sm:$0xff] }
  0x41   :  { %879 = vmatpush2.msra.mxu0 %v67_v7  ;;  %948 = vmatpush2.msra.mxu1 %v133_v8  ;;  %v231_v7 = vld [vmem:[%s4026_s2 + $0x620] sm:$0xff]  ;;  %v164_v8 = vld [vmem:[%s4026_s2 + $0x408] sm:$0xff] }
  0x42   :  { %881 = vmatmul.mubr.f32.vlgmr.msra.gmra.mxu0 %v708_v58  ;;  %949 = vmatprep.subr.mxu1 %v132_v9  ;;  %v171_v58 = vld [vmem:[%s4026_s2 + $0x440] sm:$0xff]  ;;  %v230_v9 = vld [vmem:[%s4026_s2 + $0x618] sm:$0xff] }
  0x43   :  { %958 = vmatprep.subr.mxu0 %v194_v10  ;;  %950 = vmatpush2.msra.mxu1 %v131_v11  ;;  %v163_v10 = vld [vmem:[%s4026_s2 + $0x400] sm:$0xff]  ;;  %v229_v11 = vld [vmem:[%s4026_s2 + $0x610] sm:$0xff] }
  0x44   :  { %951 = vmatprep.mubr.f32.mxu1 %v717_v12  ;;  %959 = vmatpush1.msra.mxu0 %v193_v13  ;;  %v226_v12 = vld [vmem:[%s4026_s2 + $0x5f8] sm:$0xff]  ;;  %v228_v13 = vld [vmem:[%s4026_s2 + $0x608] sm:$0xff] }
  0x45   :  { %952 = vmatmul.mubr.f32.vlgmr.msra.gmra.mxu1 %v715_v5  ;;  %960 = vmatprep.subr.mxu0 %v192_v14  ;;  %v232_v5 = vld [vmem:[%s4026_s2 + $0x628] sm:$0xff]  ;;  %v225_v14 = vld [vmem:[%s4026_s2 + $0x5f0] sm:$0xff] }
  0x46   :  { %1029 = vmatprep.subr.mxu1 %v258_v15  ;;  %961 = vmatpush1.msra.mxu0 %v191_v16  ;;  %v227_v15 = vld [vmem:[%s4026_s2 + $0x600] sm:$0xff]  ;;  %v224_v16 = vld [vmem:[%s4026_s2 + $0x5e8] sm:$0xff] }
  0x47   :  { %1030 = vmatpush1.msra.mxu1 %v257_v17  ;;  %962 = vmatprep.subr.mxu0 %v190_v18  ;;  %v290_v17 = vld [vmem:[%s4026_s2 + $0x7f8] sm:$0xff]  ;;  %v223_v18 = vld [vmem:[%s4026_s2 + $0x5e0] sm:$0xff] }
  0x48   :  { %1031 = vmatprep.subr.mxu1 %v256_v19  ;;  %963 = vmatpush1.msra.mxu0 %v189_v20  ;;  %v289_v19 = vld [vmem:[%s4026_s2 + $0x7f0] sm:$0xff]  ;;  %v222_v20 = vld [vmem:[%s4026_s2 + $0x5d8] sm:$0xff] }
  0x49   :  { %1032 = vmatpush1.msra.mxu1 %v255_v21  ;;  %964 = vmatprep.subr.mxu0 %v188_v22  ;;  %v288_v21 = vld [vmem:[%s4026_s2 + $0x7e8] sm:$0xff]  ;;  %v221_v22 = vld [vmem:[%s4026_s2 + $0x5d0] sm:$0xff] }
  0x4a   :  { %1033 = vmatprep.subr.mxu1 %v254_v23  ;;  %965 = vmatpush1.msra.mxu0 %v187_v24  ;;  %v287_v23 = vld [vmem:[%s4026_s2 + $0x7e0] sm:$0xff]  ;;  %v220_v24 = vld [vmem:[%s4026_s2 + $0x5c8] sm:$0xff] }
  0x4b   :  { %1034 = vmatpush1.msra.mxu1 %v253_v25  ;;  %966 = vmatprep.subr.mxu0 %v186_v26  ;;  %v286_v25 = vld [vmem:[%s4026_s2 + $0x7d8] sm:$0xff]  ;;  %v219_v26 = vld [vmem:[%s4026_s2 + $0x5c0] sm:$0xff] }
  0x4c   :  { %1035 = vmatprep.subr.mxu1 %v252_v27  ;;  %967 = vmatpush1.msra.mxu0 %v185_v28  ;;  %v285_v27 = vld [vmem:[%s4026_s2 + $0x7d0] sm:$0xff]  ;;  %v218_v28 = vld [vmem:[%s4026_s2 + $0x5b8] sm:$0xff] }
  0x4d   :  { %1036 = vmatpush1.msra.mxu1 %v251_v29  ;;  %968 = vmatprep.subr.mxu0 %v184_v30  ;;  %v284_v29 = vld [vmem:[%s4026_s2 + $0x7c8] sm:$0xff]  ;;  %v217_v30 = vld [vmem:[%s4026_s2 + $0x5b0] sm:$0xff] }
  0x4e   :  { %1037 = vmatprep.subr.mxu1 %v250_v31  ;;  %969 = vmatpush1.msra.mxu0 %v183_v32  ;;  %v283_v31 = vld [vmem:[%s4026_s2 + $0x7c0] sm:$0xff]  ;;  %v216_v32 = vld [vmem:[%s4026_s2 + $0x5a8] sm:$0xff] }
  0x4f   :  { %1038 = vmatpush1.msra.mxu1 %v249_v33  ;;  %970 = vmatprep.subr.mxu0 %v182_v34  ;;  %v282_v33 = vld [vmem:[%s4026_s2 + $0x7b8] sm:$0xff]  ;;  %v215_v34 = vld [vmem:[%s4026_s2 + $0x5a0] sm:$0xff] }
  0x50   :  { %1039 = vmatprep.subr.mxu1 %v248_v35  ;;  %971 = vmatpush1.msra.mxu0 %v181_v36  ;;  %v281_v35 = vld [vmem:[%s4026_s2 + $0x7b0] sm:$0xff]  ;;  %v214_v36 = vld [vmem:[%s4026_s2 + $0x598] sm:$0xff] }
  0x51   :  { %1040 = vmatpush1.msra.mxu1 %v247_v37  ;;  %972 = vmatprep.subr.mxu0 %v180_v39  ;;  %v280_v37 = vld [vmem:[%s4026_s2 + $0x7a8] sm:$0xff]  ;;  %v213_v39 = vld [vmem:[%s4026_s2 + $0x590] sm:$0xff] }
  0x52   :  { %1041 = vmatprep.subr.mxu1 %v246_v40  ;;  %973 = vmatpush1.msra.mxu0 %v179_v41  ;;  %v279_v40 = vld [vmem:[%s4026_s2 + $0x7a0] sm:$0xff]  ;;  %v212_v41 = vld [vmem:[%s4026_s2 + $0x588] sm:$0xff] }
  0x53   :  { %1042 = vmatpush1.msra.mxu1 %v245_v42  ;;  %974 = vmatprep.subr.mxu0 %v178_v43  ;;  %v278_v42 = vld [vmem:[%s4026_s2 + $0x798] sm:$0xff]  ;;  %v211_v43 = vld [vmem:[%s4026_s2 + $0x580] sm:$0xff] }
  0x54   :  { %1043 = vmatprep.subr.mxu1 %v244_v44  ;;  %975 = vmatpush1.msra.mxu0 %v177_v45  ;;  %v277_v44 = vld [vmem:[%s4026_s2 + $0x790] sm:$0xff]  ;;  %v210_v45 = vld [vmem:[%s4026_s2 + $0x578] sm:$0xff] }
  0x55   :  { %1044 = vmatpush1.msra.mxu1 %v243_v46  ;;  %976 = vmatprep.subr.mxu0 %v176_v47  ;;  %v276_v46 = vld [vmem:[%s4026_s2 + $0x788] sm:$0xff]  ;;  %v209_v47 = vld [vmem:[%s4026_s2 + $0x570] sm:$0xff] }
  0x56   :  { %1045 = vmatprep.subr.mxu1 %v242_v49  ;;  %977 = vmatpush1.msra.mxu0 %v175_v50  ;;  %v275_v49 = vld [vmem:[%s4026_s2 + $0x780] sm:$0xff]  ;;  %v208_v50 = vld [vmem:[%s4026_s2 + $0x568] sm:$0xff] }
  0x57   :  { %1046 = vmatpush1.msra.mxu1 %v241_v51  ;;  %978 = vmatprep.subr.mxu0 %v174_v52  ;;  %v274_v51 = vld [vmem:[%s4026_s2 + $0x778] sm:$0xff]  ;;  %v207_v52 = vld [vmem:[%s4026_s2 + $0x560] sm:$0xff] }
  0x58   :  { %1047 = vmatprep.subr.mxu1 %v240_v53  ;;  %979 = vmatpush1.msra.mxu0 %v173_v54  ;;  %v273_v53 = vld [vmem:[%s4026_s2 + $0x770] sm:$0xff]  ;;  %v206_v54 = vld [vmem:[%s4026_s2 + $0x558] sm:$0xff] }
  0x59   :  { %1048 = vmatpush1.msra.mxu1 %v239_v55  ;;  %980 = vmatprep.subr.mxu0 %v172_v56  ;;  %v272_v55 = vld [vmem:[%s4026_s2 + $0x768] sm:$0xff]  ;;  %v205_v56 = vld [vmem:[%s4026_s2 + $0x550] sm:$0xff] }
  0x5a   :  { %1049 = vmatprep.subr.mxu1 %v238_v57  ;;  %981 = vmatpush1.msra.mxu0 %v171_v58  ;;  %v271_v57 = vld [vmem:[%s4026_s2 + $0x760] sm:$0xff]  ;;  %v204_v58 = vld [vmem:[%s4026_s2 + $0x548] sm:$0xff] }
  0x5b   :  { %1050 = vmatpush1.msra.mxu1 %v237_v59  ;;  %982 = vmatprep.subr.mxu0 %v170_v60  ;;  %v270_v59 = vld [vmem:[%s4026_s2 + $0x758] sm:$0xff]  ;;  %v203_v60 = vld [vmem:[%s4026_s2 + $0x540] sm:$0xff] }
  0x5c   :  { %1051 = vmatprep.subr.mxu1 %v236_v61  ;;  %983 = vmatpush1.msra.mxu0 %v169_v62  ;;  %v30_v61 = vld [vmem:[%s4025_s1 + $0x8] sm:$0xff]  ;;  %v269_v62 = vld [vmem:[%s4026_s2 + $0x750] sm:$0xff] }
  0x5d   :  { %1052 = vmatpush1.msra.mxu1 %v235_v63  ;;  %984 = vmatprep.subr.mxu0 %v168_v0  ;;  %v202_v63 = vld [vmem:[%s4026_s2 + $0x538] sm:$0xff]  ;;  %v268_v0 = vld [vmem:[%s4026_s2 + $0x748] sm:$0xff] }
  0x5e   :  { %1053 = vmatprep.subr.mxu1 %v234_v1  ;;  %985 = vmatpush1.msra.mxu0 %v167_v2  ;;  %v201_v1 = vld [vmem:[%s4026_s2 + $0x530] sm:$0xff]  ;;  %v267_v2 = vld [vmem:[%s4026_s2 + $0x740] sm:$0xff] }
  0x5f   :  { %1054 = vmatpush1.msra.mxu1 %v233_v3  ;;  %986 = vmatprep.subr.mxu0 %v166_v4  ;;  %v200_v3 = vld [vmem:[%s4026_s2 + $0x528] sm:$0xff]  ;;  %v718_v4 = vcombine.high %v30_v61, %v30_v61 }
  0x60   :  { %1055 = vmatprep.subr.mxu1 %v232_v5  ;;  %987 = vmatpush1.msra.mxu0 %v165_v6  ;;  %v266_v5 = vld [vmem:[%s4026_s2 + $0x738] sm:$0xff]  ;;  %v199_v6 = vld [vmem:[%s4026_s2 + $0x520] sm:$0xff] }
  0x61   :  { %1056 = vmatpush1.msra.mxu1 %v231_v7  ;;  %988 = vmatprep.subr.mxu0 %v164_v8  ;;  %v725_v7 = vrot.slane %v30_v61, %v2250_v48  ;;  %v265_v8 = vld [vmem:[%s4026_s2 + $0x730] sm:$0xff] }
  0x62   :  { %1057 = vmatprep.subr.mxu1 %v230_v9  ;;  %989 = vmatpush1.msra.mxu0 %v163_v10  ;;  %v198_v9 = vld [vmem:[%s4026_s2 + $0x518] sm:$0xff]  ;;  %v264_v10 = vld [vmem:[%s4026_s2 + $0x728] sm:$0xff]  ;;  %v369_v61 = vld [vmem:[%s4026_s2 + $0xa70] sm:$0xff] }
  0x63   :  { %1058 = vmatpush1.msra.mxu1 %v229_v11  ;;  %990 = vmatprep.subr.mxu0 %v226_v12  ;;  %v197_v11 = vld [vmem:[%s4026_s2 + $0x510] sm:$0xff]  ;;  %v263_v12 = vld [vmem:[%s4026_s2 + $0x720] sm:$0xff] }
  0x64   :  { %1059 = vmatprep.subr.mxu1 %v228_v13  ;;  %991 = vmatpush2.msra.mxu0 %v225_v14  ;;  %v196_v13 = vld [vmem:[%s4026_s2 + $0x508] sm:$0xff]  ;;  %v732_v14 = vrot.slane %v718_v4, %v2250_v48  ;;  %v299_v4 = vld [vmem:[%s4026_s2 + $0x840] sm:$0xff] }
  0x65   :  { %1060 = vmatpush1.msra.mxu1 %v227_v15  ;;  %992 = vmatprep.subr.mxu0 %v224_v16  ;;  %v262_v15 = vld [vmem:[%s4026_s2 + $0x718] sm:$0xff]  ;;  %v195_v16 = vld [vmem:[%s4026_s2 + $0x500] sm:$0xff] }
  0x66   :  { %1061 = vmatprep.subr.mxu1 %v290_v17  ;;  %993 = vmatpush2.msra.mxu0 %v223_v18  ;;  %v733_v17 = vcombine.high %v725_v7, %v725_v7  ;;  %v261_v18 = vld [vmem:[%s4026_s2 + $0x710] sm:$0xff] }
  0x67   :  { %1062 = vmatpush2.msra.mxu1 %v289_v19  ;;  %994 = vmatprep.subr.mxu0 %v222_v20  ;;  %v260_v19 = vld [vmem:[%s4026_s2 + $0x708] sm:$0xff]  ;;  %v322_v20 = vld [vmem:[%s4026_s2 + $0x8f8] sm:$0xff] }
  0x68   :  { %1063 = vmatprep.subr.mxu1 %v288_v21  ;;  %995 = vmatpush2.msra.mxu0 %v221_v22  ;;  %v259_v21 = vld [vmem:[%s4026_s2 + $0x700] sm:$0xff]  ;;  %v734_v22 = vcombine.high %v732_v14, %v732_v14 }
  0x69   :  { %1064 = vmatpush2.msra.mxu1 %v287_v23  ;;  %996 = vmatprep.subr.mxu0 %v220_v24  ;;  %v321_v23 = vld [vmem:[%s4026_s2 + $0x8f0] sm:$0xff]  ;;  %v320_v24 = vld [vmem:[%s4026_s2 + $0x8e8] sm:$0xff] }
  0x6a   :  { %1065 = vmatprep.subr.mxu1 %v286_v25  ;;  %997 = vmatpush2.msra.mxu0 %v219_v26  ;;  %v386_v25 = vld [vmem:[%s4026_s2 + $0xaf8] sm:$0xff]  ;;  %v319_v26 = vld [vmem:[%s4026_s2 + $0x8e0] sm:$0xff] }
  0x6b   :  { %1066 = vmatpush2.msra.mxu1 %v285_v27  ;;  %998 = vmatprep.subr.mxu0 %v218_v28  ;;  %v385_v27 = vld [vmem:[%s4026_s2 + $0xaf0] sm:$0xff]  ;;  %v318_v28 = vld [vmem:[%s4026_s2 + $0x8d8] sm:$0xff] }
  0x6c   :  { %1067 = vmatprep.subr.mxu1 %v284_v29  ;;  %999 = vmatpush2.msra.mxu0 %v217_v30  ;;  %v384_v29 = vld [vmem:[%s4026_s2 + $0xae8] sm:$0xff]  ;;  %v317_v30 = vld [vmem:[%s4026_s2 + $0x8d0] sm:$0xff] }
  0x6d   :  { %1068 = vmatpush2.msra.mxu1 %v283_v31  ;;  %1000 = vmatprep.subr.mxu0 %v216_v32  ;;  %v383_v31 = vld [vmem:[%s4026_s2 + $0xae0] sm:$0xff]  ;;  %v316_v32 = vld [vmem:[%s4026_s2 + $0x8c8] sm:$0xff] }
  0x6e   :  { %1069 = vmatprep.subr.mxu1 %v282_v33  ;;  %1001 = vmatpush2.msra.mxu0 %v215_v34  ;;  %v382_v33 = vld [vmem:[%s4026_s2 + $0xad8] sm:$0xff]  ;;  %v315_v34 = vld [vmem:[%s4026_s2 + $0x8c0] sm:$0xff] }
  0x6f   :  { %1070 = vmatpush2.msra.mxu1 %v281_v35  ;;  %1002 = vmatprep.subr.mxu0 %v214_v36  ;;  %v381_v35 = vld [vmem:[%s4026_s2 + $0xad0] sm:$0xff]  ;;  %v314_v36 = vld [vmem:[%s4026_s2 + $0x8b8] sm:$0xff] }
  0x70   :  { %1071 = vmatprep.subr.mxu1 %v280_v37  ;;  %1003 = vmatpush2.msra.mxu0 %v213_v39  ;;  %v380_v37 = vld [vmem:[%s4026_s2 + $0xac8] sm:$0xff]  ;;  %v313_v39 = vld [vmem:[%s4026_s2 + $0x8b0] sm:$0xff] }
  0x71   :  { %1072 = vmatpush2.msra.mxu1 %v279_v40  ;;  %1004 = vmatprep.subr.mxu0 %v212_v41  ;;  %v379_v40 = vld [vmem:[%s4026_s2 + $0xac0] sm:$0xff]  ;;  %v312_v41 = vld [vmem:[%s4026_s2 + $0x8a8] sm:$0xff] }
  0x72   :  { %1073 = vmatprep.subr.mxu1 %v278_v42  ;;  %1005 = vmatpush2.msra.mxu0 %v211_v43  ;;  %v378_v42 = vld [vmem:[%s4026_s2 + $0xab8] sm:$0xff]  ;;  %v311_v43 = vld [vmem:[%s4026_s2 + $0x8a0] sm:$0xff] }
  0x73   :  { %1074 = vmatpush2.msra.mxu1 %v277_v44  ;;  %1006 = vmatprep.subr.mxu0 %v210_v45  ;;  %v377_v44 = vld [vmem:[%s4026_s2 + $0xab0] sm:$0xff]  ;;  %v310_v45 = vld [vmem:[%s4026_s2 + $0x898] sm:$0xff] }
  0x74   :  { %1075 = vmatprep.subr.mxu1 %v276_v46  ;;  %1007 = vmatpush2.msra.mxu0 %v209_v47  ;;  %v376_v46 = vld [vmem:[%s4026_s2 + $0xaa8] sm:$0xff]  ;;  %v309_v47 = vld [vmem:[%s4026_s2 + $0x890] sm:$0xff] }
  0x75   :  { %1076 = vmatpush2.msra.mxu1 %v275_v49  ;;  %1008 = vmatprep.subr.mxu0 %v208_v50  ;;  %v375_v49 = vld [vmem:[%s4026_s2 + $0xaa0] sm:$0xff]  ;;  %v308_v50 = vld [vmem:[%s4026_s2 + $0x888] sm:$0xff] }
  0x76   :  { %1077 = vmatprep.subr.mxu1 %v274_v51  ;;  %1009 = vmatpush2.msra.mxu0 %v207_v52  ;;  %v374_v51 = vld [vmem:[%s4026_s2 + $0xa98] sm:$0xff]  ;;  %v307_v52 = vld [vmem:[%s4026_s2 + $0x880] sm:$0xff] }
  0x77   :  { %1078 = vmatpush2.msra.mxu1 %v273_v53  ;;  %1010 = vmatprep.subr.mxu0 %v206_v54  ;;  %v373_v53 = vld [vmem:[%s4026_s2 + $0xa90] sm:$0xff]  ;;  %v306_v54 = vld [vmem:[%s4026_s2 + $0x878] sm:$0xff] }
  0x78   :  { %1079 = vmatprep.subr.mxu1 %v272_v55  ;;  %1011 = vmatpush2.msra.mxu0 %v205_v56  ;;  %v372_v55 = vld [vmem:[%s4026_s2 + $0xa88] sm:$0xff]  ;;  %v305_v56 = vld [vmem:[%s4026_s2 + $0x870] sm:$0xff] }
  0x79   :  { %1080 = vmatpush2.msra.mxu1 %v271_v57  ;;  %1012 = vmatprep.subr.mxu0 %v204_v58  ;;  %v371_v57 = vld [vmem:[%s4026_s2 + $0xa80] sm:$0xff]  ;;  %v304_v58 = vld [vmem:[%s4026_s2 + $0x868] sm:$0xff] }
  0x7a   :  { %1081 = vmatprep.subr.mxu1 %v270_v59  ;;  %1013 = vmatpush2.msra.mxu0 %v203_v60  ;;  %v370_v59 = vld [vmem:[%s4026_s2 + $0xa78] sm:$0xff]  ;;  %v303_v60 = vld [vmem:[%s4026_s2 + $0x860] sm:$0xff] }
  0x7b   :  { %1082 = vmatpush2.msra.mxu1 %v269_v62  ;;  %1014 = vmatprep.subr.mxu0 %v202_v63  ;;  %v302_v62 = vld [vmem:[%s4026_s2 + $0x858] sm:$0xff]  ;;  %v368_v63 = vld [vmem:[%s4026_s2 + $0xa68] sm:$0xff] }
  0x7c   :  { %1083 = vmatprep.subr.mxu1 %v268_v0  ;;  %1015 = vmatpush2.msra.mxu0 %v201_v1  ;;  %v301_v0 = vld [vmem:[%s4026_s2 + $0x850] sm:$0xff]  ;;  %v367_v1 = vld [vmem:[%s4026_s2 + $0xa60] sm:$0xff] }
  0x7d   :  { %1084 = vmatpush2.msra.mxu1 %v267_v2  ;;  %1016 = vmatprep.subr.mxu0 %v200_v3  ;;  %v300_v2 = vld [vmem:[%s4026_s2 + $0x848] sm:$0xff]  ;;  %v366_v3 = vld [vmem:[%s4026_s2 + $0xa58] sm:$0xff] }
  0x7e   :  { %1085 = vmatprep.subr.mxu1 %v266_v5  ;;  %1017 = vmatpush2.msra.mxu0 %v199_v6  ;;  %v365_v5 = vld [vmem:[%s4026_s2 + $0xa50] sm:$0xff]  ;;  %v298_v6 = vld [vmem:[%s4026_s2 + $0x838] sm:$0xff] }
  0x7f   :  { %1086 = vmatpush2.msra.mxu1 %v265_v8  ;;  %1018 = vmatprep.subr.mxu0 %v198_v9  ;;  %v297_v8 = vld [vmem:[%s4026_s2 + $0x830] sm:$0xff]  ;;  %v363_v9 = vld [vmem:[%s4026_s2 + $0xa40] sm:$0xff] }
  0x80   :  { %1087 = vmatprep.subr.mxu1 %v264_v10  ;;  %1019 = vmatpush2.msra.mxu0 %v197_v11  ;;  %v296_v10 = vld [vmem:[%s4026_s2 + $0x828] sm:$0xff]  ;;  %v362_v11 = vld [vmem:[%s4026_s2 + $0xa38] sm:$0xff] }
  0x81   :  { %1088 = vmatpush2.msra.mxu1 %v263_v12  ;;  %1020 = vmatprep.subr.mxu0 %v196_v13  ;;  %v295_v12 = vld [vmem:[%s4026_s2 + $0x820] sm:$0xff]  ;;  %v361_v13 = vld [vmem:[%s4026_s2 + $0xa30] sm:$0xff] }
  0x82   :  { %1089 = vmatprep.subr.mxu1 %v262_v15  ;;  %1021 = vmatpush2.msra.mxu0 %v195_v16  ;;  %v360_v15 = vld [vmem:[%s4026_s2 + $0xa28] sm:$0xff]  ;;  %v293_v16 = vld [vmem:[%s4026_s2 + $0x810] sm:$0xff] }
  0x83   :  { %1022 = vmatprep.mubr.f32.mxu0 %v733_v17  ;;  %1090 = vmatpush2.msra.mxu1 %v261_v18  ;;  %v359_v17 = vld [vmem:[%s4026_s2 + $0xa20] sm:$0xff]  ;;  %v292_v18 = vld [vmem:[%s4026_s2 + $0x808] sm:$0xff] }
  0x84   :  { %1023 = vmatmul.mubr.f32.vlgmr.msra.gmra.mxu0 %v725_v7  ;;  %1091 = vmatprep.subr.mxu1 %v260_v19  ;;  %v364_v7 = vld [vmem:[%s4026_s2 + $0xa48] sm:$0xff]  ;;  %v358_v19 = vld [vmem:[%s4026_s2 + $0xa18] sm:$0xff] }
  0x85   :  { %1100 = vmatprep.subr.mxu0 %v322_v20  ;;  %1092 = vmatpush2.msra.mxu1 %v259_v21  ;;  %v291_v20 = vld [vmem:[%s4026_s2 + $0x800] sm:$0xff]  ;;  %v357_v21 = vld [vmem:[%s4026_s2 + $0xa10] sm:$0xff] }
  0x86   :  { %1093 = vmatprep.mubr.f32.mxu1 %v734_v22  ;;  %1101 = vmatpush1.msra.mxu0 %v321_v23  ;;  %v354_v22 = vld [vmem:[%s4026_s2 + $0x9f8] sm:$0xff]  ;;  %v356_v23 = vld [vmem:[%s4026_s2 + $0xa08] sm:$0xff] }
  0x87   :  { %1094 = vmatmul.mubr.f32.vlgmr.msra.gmra.mxu1 %v732_v14  ;;  %1102 = vmatprep.subr.mxu0 %v320_v24  ;;  %v294_v14 = vld [vmem:[%s4026_s2 + $0x818] sm:$0xff]  ;;  %v353_v24 = vld [vmem:[%s4026_s2 + $0x9f0] sm:$0xff] }
  0x88   :  { %1171 = vmatprep.subr.mxu1 %v386_v25  ;;  %1103 = vmatpush1.msra.mxu0 %v319_v26  ;;  %v355_v25 = vld [vmem:[%s4026_s2 + $0xa00] sm:$0xff]  ;;  %v352_v26 = vld [vmem:[%s4026_s2 + $0x9e8] sm:$0xff] }
  0x89   :  { %1172 = vmatpush1.msra.mxu1 %v385_v27  ;;  %1104 = vmatprep.subr.mxu0 %v318_v28  ;;  %v418_v27 = vld [vmem:[%s4026_s2 + $0xbf8] sm:$0xff]  ;;  %v351_v28 = vld [vmem:[%s4026_s2 + $0x9e0] sm:$0xff] }
  0x8a   :  { %1173 = vmatprep.subr.mxu1 %v384_v29  ;;  %1105 = vmatpush1.msra.mxu0 %v317_v30  ;;  %v417_v29 = vld [vmem:[%s4026_s2 + $0xbf0] sm:$0xff]  ;;  %v350_v30 = vld [vmem:[%s4026_s2 + $0x9d8] sm:$0xff] }
  0x8b   :  { %1174 = vmatpush1.msra.mxu1 %v383_v31  ;;  %1106 = vmatprep.subr.mxu0 %v316_v32  ;;  %v416_v31 = vld [vmem:[%s4026_s2 + $0xbe8] sm:$0xff]  ;;  %v349_v32 = vld [vmem:[%s4026_s2 + $0x9d0] sm:$0xff] }
  0x8c   :  { %1175 = vmatprep.subr.mxu1 %v382_v33  ;;  %1107 = vmatpush1.msra.mxu0 %v315_v34  ;;  %v415_v33 = vld [vmem:[%s4026_s2 + $0xbe0] sm:$0xff]  ;;  %v348_v34 = vld [vmem:[%s4026_s2 + $0x9c8] sm:$0xff] }
  0x8d   :  { %1176 = vmatpush1.msra.mxu1 %v381_v35  ;;  %1108 = vmatprep.subr.mxu0 %v314_v36  ;;  %v414_v35 = vld [vmem:[%s4026_s2 + $0xbd8] sm:$0xff]  ;;  %v347_v36 = vld [vmem:[%s4026_s2 + $0x9c0] sm:$0xff] }
  0x8e   :  { %1177 = vmatprep.subr.mxu1 %v380_v37  ;;  %1109 = vmatpush1.msra.mxu0 %v313_v39  ;;  %v413_v37 = vld [vmem:[%s4026_s2 + $0xbd0] sm:$0xff]  ;;  %v346_v39 = vld [vmem:[%s4026_s2 + $0x9b8] sm:$0xff] }
  0x8f   :  { %1178 = vmatpush1.msra.mxu1 %v379_v40  ;;  %1110 = vmatprep.subr.mxu0 %v312_v41  ;;  %v412_v40 = vld [vmem:[%s4026_s2 + $0xbc8] sm:$0xff]  ;;  %v345_v41 = vld [vmem:[%s4026_s2 + $0x9b0] sm:$0xff] }
  0x90   :  { %1179 = vmatprep.subr.mxu1 %v378_v42  ;;  %1111 = vmatpush1.msra.mxu0 %v311_v43  ;;  %v411_v42 = vld [vmem:[%s4026_s2 + $0xbc0] sm:$0xff]  ;;  %v344_v43 = vld [vmem:[%s4026_s2 + $0x9a8] sm:$0xff] }
  0x91   :  { %1180 = vmatpush1.msra.mxu1 %v377_v44  ;;  %1112 = vmatprep.subr.mxu0 %v310_v45  ;;  %v410_v44 = vld [vmem:[%s4026_s2 + $0xbb8] sm:$0xff]  ;;  %v343_v45 = vld [vmem:[%s4026_s2 + $0x9a0] sm:$0xff] }
  0x92   :  { %1181 = vmatprep.subr.mxu1 %v376_v46  ;;  %1113 = vmatpush1.msra.mxu0 %v309_v47  ;;  %v409_v46 = vld [vmem:[%s4026_s2 + $0xbb0] sm:$0xff]  ;;  %v342_v47 = vld [vmem:[%s4026_s2 + $0x998] sm:$0xff] }
  0x93   :  { %1182 = vmatpush1.msra.mxu1 %v375_v49  ;;  %1114 = vmatprep.subr.mxu0 %v308_v50  ;;  %v408_v49 = vld [vmem:[%s4026_s2 + $0xba8] sm:$0xff]  ;;  %v341_v50 = vld [vmem:[%s4026_s2 + $0x990] sm:$0xff] }
  0x94   :  { %1183 = vmatprep.subr.mxu1 %v374_v51  ;;  %1115 = vmatpush1.msra.mxu0 %v307_v52  ;;  %v407_v51 = vld [vmem:[%s4026_s2 + $0xba0] sm:$0xff]  ;;  %v340_v52 = vld [vmem:[%s4026_s2 + $0x988] sm:$0xff] }
  0x95   :  { %1184 = vmatpush1.msra.mxu1 %v373_v53  ;;  %1116 = vmatprep.subr.mxu0 %v306_v54  ;;  %v406_v53 = vld [vmem:[%s4026_s2 + $0xb98] sm:$0xff]  ;;  %v339_v54 = vld [vmem:[%s4026_s2 + $0x980] sm:$0xff] }
  0x96   :  { %1185 = vmatprep.subr.mxu1 %v372_v55  ;;  %1117 = vmatpush1.msra.mxu0 %v305_v56  ;;  %v405_v55 = vld [vmem:[%s4026_s2 + $0xb90] sm:$0xff]  ;;  %v338_v56 = vld [vmem:[%s4026_s2 + $0x978] sm:$0xff] }
  0x97   :  { %1186 = vmatpush1.msra.mxu1 %v371_v57  ;;  %1118 = vmatprep.subr.mxu0 %v304_v58  ;;  %v404_v57 = vld [vmem:[%s4026_s2 + $0xb88] sm:$0xff]  ;;  %v337_v58 = vld [vmem:[%s4026_s2 + $0x970] sm:$0xff] }
  0x98   :  { %1187 = vmatprep.subr.mxu1 %v370_v59  ;;  %1119 = vmatpush1.msra.mxu0 %v303_v60  ;;  %v403_v59 = vld [vmem:[%s4026_s2 + $0xb80] sm:$0xff]  ;;  %v336_v60 = vld [vmem:[%s4026_s2 + $0x968] sm:$0xff] }
  0x99   :  { %1188 = vmatpush1.msra.mxu1 %v369_v61  ;;  %1120 = vmatprep.subr.mxu0 %v302_v62  ;;  %v402_v61 = vld [vmem:[%s4026_s2 + $0xb78] sm:$0xff]  ;;  %v335_v62 = vld [vmem:[%s4026_s2 + $0x960] sm:$0xff] }
  0x9a   :  { %1189 = vmatprep.subr.mxu1 %v368_v63  ;;  %1121 = vmatpush1.msra.mxu0 %v301_v0  ;;  %v401_v63 = vld [vmem:[%s4026_s2 + $0xb70] sm:$0xff]  ;;  %v334_v0 = vld [vmem:[%s4026_s2 + $0x958] sm:$0xff] }
  0x9b   :  { %1190 = vmatpush1.msra.mxu1 %v367_v1  ;;  %1122 = vmatprep.subr.mxu0 %v300_v2  ;;  %v400_v1 = vld [vmem:[%s4026_s2 + $0xb68] sm:$0xff]  ;;  %v333_v2 = vld [vmem:[%s4026_s2 + $0x950] sm:$0xff] }
  0x9c   :  { %1191 = vmatprep.subr.mxu1 %v366_v3  ;;  %1123 = vmatpush1.msra.mxu0 %v299_v4  ;;  %v399_v3 = vld [vmem:[%s4026_s2 + $0xb60] sm:$0xff]  ;;  %v332_v4 = vld [vmem:[%s4026_s2 + $0x948] sm:$0xff] }
  0x9d   :  { %1192 = vmatpush1.msra.mxu1 %v365_v5  ;;  %1124 = vmatprep.subr.mxu0 %v298_v6  ;;  %v398_v5 = vld [vmem:[%s4026_s2 + $0xb58] sm:$0xff]  ;;  %v331_v6 = vld [vmem:[%s4026_s2 + $0x940] sm:$0xff] }
  0x9e   :  { %1193 = vmatprep.subr.mxu1 %v364_v7  ;;  %1125 = vmatpush1.msra.mxu0 %v297_v8  ;;  %v31_v7 = vld [vmem:[%s4025_s1 + $0x10] sm:$0xff] }
  0x9f   :  { %1194 = vmatpush1.msra.mxu1 %v363_v9  ;;  %1126 = vmatprep.subr.mxu0 %v296_v10  ;;  %v397_v8 = vld [vmem:[%s4026_s2 + $0xb50] sm:$0xff]  ;;  %v330_v9 = vld [vmem:[%s4026_s2 + $0x938] sm:$0xff]  ;;  %v396_v10 = vld [vmem:[%s4026_s2 + $0xb48] sm:$0xff] }
  0xa0   :  { %1195 = vmatprep.subr.mxu1 %v362_v11  ;;  %1127 = vmatpush1.msra.mxu0 %v295_v12  ;;  %v329_v11 = vld [vmem:[%s4026_s2 + $0x930] sm:$0xff]  ;;  %v395_v12 = vld [vmem:[%s4026_s2 + $0xb40] sm:$0xff] }
  0xa1   :  { %1196 = vmatpush1.msra.mxu1 %v361_v13  ;;  %1128 = vmatprep.subr.mxu0 %v294_v14  ;;  %v328_v13 = vld [vmem:[%s4026_s2 + $0x928] sm:$0xff]  ;;  %v735_v14 = vcombine.high %v31_v7, %v31_v7 }
  0xa2   :  { %1197 = vmatprep.subr.mxu1 %v360_v15  ;;  %1129 = vmatpush1.msra.mxu0 %v293_v16  ;;  %v394_v15 = vld [vmem:[%s4026_s2 + $0xb38] sm:$0xff]  ;;  %v327_v16 = vld [vmem:[%s4026_s2 + $0x920] sm:$0xff] }
  0xa3   :  { %1198 = vmatpush1.msra.mxu1 %v359_v17  ;;  %1130 = vmatprep.subr.mxu0 %v292_v18  ;;  %v742_v17 = vrot.slane %v31_v7, %v2250_v48  ;;  %v393_v18 = vld [vmem:[%s4026_s2 + $0xb30] sm:$0xff] }
  0xa4   :  { %1199 = vmatprep.subr.mxu1 %v358_v19  ;;  %1131 = vmatpush1.msra.mxu0 %v291_v20  ;;  %v326_v19 = vld [vmem:[%s4026_s2 + $0x918] sm:$0xff]  ;;  %v392_v20 = vld [vmem:[%s4026_s2 + $0xb28] sm:$0xff]  ;;  %v497_v7 = vld [vmem:[%s4026_s2 + $0xe70] sm:$0xff] }
  0xa5   :  { %1200 = vmatpush1.msra.mxu1 %v357_v21  ;;  %1132 = vmatprep.subr.mxu0 %v354_v22  ;;  %v325_v21 = vld [vmem:[%s4026_s2 + $0x910] sm:$0xff]  ;;  %v391_v22 = vld [vmem:[%s4026_s2 + $0xb20] sm:$0xff] }
  0xa6   :  { %1201 = vmatprep.subr.mxu1 %v356_v23  ;;  %1133 = vmatpush2.msra.mxu0 %v353_v24  ;;  %v324_v23 = vld [vmem:[%s4026_s2 + $0x908] sm:$0xff]  ;;  %v749_v24 = vrot.slane %v735_v14, %v2250_v48  ;;  %v427_v14 = vld [vmem:[%s4026_s2 + $0xc40] sm:$0xff] }
  0xa7   :  { %1202 = vmatpush1.msra.mxu1 %v355_v25  ;;  %1134 = vmatprep.subr.mxu0 %v352_v26  ;;  %v390_v25 = vld [vmem:[%s4026_s2 + $0xb18] sm:$0xff]  ;;  %v323_v26 = vld [vmem:[%s4026_s2 + $0x900] sm:$0xff] }
  0xa8   :  { %1203 = vmatprep.subr.mxu1 %v418_v27  ;;  %1135 = vmatpush2.msra.mxu0 %v351_v28  ;;  %v750_v27 = vcombine.high %v742_v17, %v742_v17  ;;  %v389_v28 = vld [vmem:[%s4026_s2 + $0xb10] sm:$0xff] }
  0xa9   :  { %1204 = vmatpush2.msra.mxu1 %v417_v29  ;;  %1136 = vmatprep.subr.mxu0 %v350_v30  ;;  %v388_v29 = vld [vmem:[%s4026_s2 + $0xb08] sm:$0xff]  ;;  %v450_v30 = vld [vmem:[%s4026_s2 + $0xcf8] sm:$0xff] }
  0xaa   :  { %1205 = vmatprep.subr.mxu1 %v416_v31  ;;  %1137 = vmatpush2.msra.mxu0 %v349_v32  ;;  %v387_v31 = vld [vmem:[%s4026_s2 + $0xb00] sm:$0xff]  ;;  %v751_v32 = vcombine.high %v749_v24, %v749_v24 }
  0xab   :  { %1206 = vmatpush2.msra.mxu1 %v415_v33  ;;  %1138 = vmatprep.subr.mxu0 %v348_v34  ;;  %v449_v33 = vld [vmem:[%s4026_s2 + $0xcf0] sm:$0xff]  ;;  %v448_v34 = vld [vmem:[%s4026_s2 + $0xce8] sm:$0xff] }
  0xac   :  { %1207 = vmatprep.subr.mxu1 %v414_v35  ;;  %1139 = vmatpush2.msra.mxu0 %v347_v36  ;;  %v514_v35 = vld [vmem:[%s4026_s2 + $0xef8] sm:$0xff]  ;;  %v447_v36 = vld [vmem:[%s4026_s2 + $0xce0] sm:$0xff] }
  0xad   :  { %1208 = vmatpush2.msra.mxu1 %v413_v37  ;;  %1140 = vmatprep.subr.mxu0 %v346_v39  ;;  %v513_v37 = vld [vmem:[%s4026_s2 + $0xef0] sm:$0xff]  ;;  %v446_v39 = vld [vmem:[%s4026_s2 + $0xcd8] sm:$0xff] }
  0xae   :  { %1209 = vmatprep.subr.mxu1 %v412_v40  ;;  %1141 = vmatpush2.msra.mxu0 %v345_v41  ;;  %v512_v40 = vld [vmem:[%s4026_s2 + $0xee8] sm:$0xff]  ;;  %v445_v41 = vld [vmem:[%s4026_s2 + $0xcd0] sm:$0xff] }
  0xaf   :  { %1210 = vmatpush2.msra.mxu1 %v411_v42  ;;  %1142 = vmatprep.subr.mxu0 %v344_v43  ;;  %v511_v42 = vld [vmem:[%s4026_s2 + $0xee0] sm:$0xff]  ;;  %v444_v43 = vld [vmem:[%s4026_s2 + $0xcc8] sm:$0xff] }
  0xb0   :  { %1211 = vmatprep.subr.mxu1 %v410_v44  ;;  %1143 = vmatpush2.msra.mxu0 %v343_v45  ;;  %v510_v44 = vld [vmem:[%s4026_s2 + $0xed8] sm:$0xff]  ;;  %v443_v45 = vld [vmem:[%s4026_s2 + $0xcc0] sm:$0xff] }
  0xb1   :  { %1212 = vmatpush2.msra.mxu1 %v409_v46  ;;  %1144 = vmatprep.subr.mxu0 %v342_v47  ;;  %v509_v46 = vld [vmem:[%s4026_s2 + $0xed0] sm:$0xff]  ;;  %v442_v47 = vld [vmem:[%s4026_s2 + $0xcb8] sm:$0xff] }
  0xb2   :  { %1213 = vmatprep.subr.mxu1 %v408_v49  ;;  %1145 = vmatpush2.msra.mxu0 %v341_v50  ;;  %v508_v49 = vld [vmem:[%s4026_s2 + $0xec8] sm:$0xff]  ;;  %v441_v50 = vld [vmem:[%s4026_s2 + $0xcb0] sm:$0xff] }
  0xb3   :  { %1214 = vmatpush2.msra.mxu1 %v407_v51  ;;  %1146 = vmatprep.subr.mxu0 %v340_v52  ;;  %v507_v51 = vld [vmem:[%s4026_s2 + $0xec0] sm:$0xff]  ;;  %v440_v52 = vld [vmem:[%s4026_s2 + $0xca8] sm:$0xff] }
  0xb4   :  { %1215 = vmatprep.subr.mxu1 %v406_v53  ;;  %1147 = vmatpush2.msra.mxu0 %v339_v54  ;;  %v506_v53 = vld [vmem:[%s4026_s2 + $0xeb8] sm:$0xff]  ;;  %v439_v54 = vld [vmem:[%s4026_s2 + $0xca0] sm:$0xff] }
  0xb5   :  { %1216 = vmatpush2.msra.mxu1 %v405_v55  ;;  %1148 = vmatprep.subr.mxu0 %v338_v56  ;;  %v505_v55 = vld [vmem:[%s4026_s2 + $0xeb0] sm:$0xff]  ;;  %v438_v56 = vld [vmem:[%s4026_s2 + $0xc98] sm:$0xff] }
  0xb6   :  { %1217 = vmatprep.subr.mxu1 %v404_v57  ;;  %1149 = vmatpush2.msra.mxu0 %v337_v58  ;;  %v504_v57 = vld [vmem:[%s4026_s2 + $0xea8] sm:$0xff]  ;;  %v437_v58 = vld [vmem:[%s4026_s2 + $0xc90] sm:$0xff] }
  0xb7   :  { %1218 = vmatpush2.msra.mxu1 %v403_v59  ;;  %1150 = vmatprep.subr.mxu0 %v336_v60  ;;  %v503_v59 = vld [vmem:[%s4026_s2 + $0xea0] sm:$0xff]  ;;  %v436_v60 = vld [vmem:[%s4026_s2 + $0xc88] sm:$0xff] }
  0xb8   :  { %1219 = vmatprep.subr.mxu1 %v402_v61  ;;  %1151 = vmatpush2.msra.mxu0 %v335_v62  ;;  %v502_v61 = vld [vmem:[%s4026_s2 + $0xe98] sm:$0xff]  ;;  %v435_v62 = vld [vmem:[%s4026_s2 + $0xc80] sm:$0xff] }
  0xb9   :  { %1220 = vmatpush2.msra.mxu1 %v401_v63  ;;  %1152 = vmatprep.subr.mxu0 %v334_v0  ;;  %v501_v63 = vld [vmem:[%s4026_s2 + $0xe90] sm:$0xff]  ;;  %v434_v0 = vld [vmem:[%s4026_s2 + $0xc78] sm:$0xff] }
  0xba   :  { %1221 = vmatprep.subr.mxu1 %v400_v1  ;;  %1153 = vmatpush2.msra.mxu0 %v333_v2  ;;  %v500_v1 = vld [vmem:[%s4026_s2 + $0xe88] sm:$0xff]  ;;  %v433_v2 = vld [vmem:[%s4026_s2 + $0xc70] sm:$0xff] }
  0xbb   :  { %1222 = vmatpush2.msra.mxu1 %v399_v3  ;;  %1154 = vmatprep.subr.mxu0 %v332_v4  ;;  %v499_v3 = vld [vmem:[%s4026_s2 + $0xe80] sm:$0xff]  ;;  %v432_v4 = vld [vmem:[%s4026_s2 + $0xc68] sm:$0xff] }
  0xbc   :  { %1223 = vmatprep.subr.mxu1 %v398_v5  ;;  %1155 = vmatpush2.msra.mxu0 %v331_v6  ;;  %v498_v5 = vld [vmem:[%s4026_s2 + $0xe78] sm:$0xff]  ;;  %v431_v6 = vld [vmem:[%s4026_s2 + $0xc60] sm:$0xff] }
  0xbd   :  { %1224 = vmatpush2.msra.mxu1 %v397_v8  ;;  %1156 = vmatprep.subr.mxu0 %v330_v9  ;;  %v430_v8 = vld [vmem:[%s4026_s2 + $0xc58] sm:$0xff]  ;;  %v496_v9 = vld [vmem:[%s4026_s2 + $0xe68] sm:$0xff] }
  0xbe   :  { %1225 = vmatprep.subr.mxu1 %v396_v10  ;;  %1157 = vmatpush2.msra.mxu0 %v329_v11  ;;  %v429_v10 = vld [vmem:[%s4026_s2 + $0xc50] sm:$0xff]  ;;  %v495_v11 = vld [vmem:[%s4026_s2 + $0xe60] sm:$0xff] }
  0xbf   :  { %1226 = vmatpush2.msra.mxu1 %v395_v12  ;;  %1158 = vmatprep.subr.mxu0 %v328_v13  ;;  %v428_v12 = vld [vmem:[%s4026_s2 + $0xc48] sm:$0xff]  ;;  %v494_v13 = vld [vmem:[%s4026_s2 + $0xe58] sm:$0xff] }
  0xc0   :  { %1227 = vmatprep.subr.mxu1 %v394_v15  ;;  %1159 = vmatpush2.msra.mxu0 %v327_v16 }
  0xc1   :  { %1228 = vmatpush2.msra.mxu1 %v393_v18  ;;  %1160 = vmatprep.subr.mxu0 %v326_v19 }
  0xc2   :  { %1229 = vmatprep.subr.mxu1 %v392_v20  ;;  %1161 = vmatpush2.msra.mxu0 %v325_v21 }
  0xc3   :  { %1230 = vmatpush2.msra.mxu1 %v391_v22  ;;  %1162 = vmatprep.subr.mxu0 %v324_v23 }
  0xc4   :  { %1231 = vmatprep.subr.mxu1 %v390_v25  ;;  %1163 = vmatpush2.msra.mxu0 %v323_v26 }
  0xc5   :  { %1164 = vmatprep.mubr.f32.mxu0 %v750_v27  ;;  %1232 = vmatpush2.msra.mxu1 %v389_v28 }
  0xc6   :  { %1165 = vmatmul.mubr.f32.vlgmr.msra.gmra.mxu0 %v742_v17  ;;  %1233 = vmatprep.subr.mxu1 %v388_v29 }
  0xc7   :  { %1242 = vmatprep.subr.mxu0 %v450_v30  ;;  %1234 = vmatpush2.msra.mxu1 %v387_v31 }
  0xc8   :  { %1235 = vmatprep.mubr.f32.mxu1 %v751_v32  ;;  %1243 = vmatpush1.msra.mxu0 %v449_v33 }
  0xc9   :  { %1236 = vmatmul.mubr.f32.vlgmr.msra.gmra.mxu1 %v749_v24  ;;  %1244 = vmatprep.subr.mxu0 %v448_v34 }
  0xca   :  { %1313 = vmatprep.subr.mxu1 %v514_v35  ;;  %1245 = vmatpush1.msra.mxu0 %v447_v36 }
  0xcb   :  { %1314 = vmatpush1.msra.mxu1 %v513_v37  ;;  %1246 = vmatprep.subr.mxu0 %v446_v39 }
  0xcc   :  { %1315 = vmatprep.subr.mxu1 %v512_v40  ;;  %1247 = vmatpush1.msra.mxu0 %v445_v41 }
  0xcd   :  { %1316 = vmatpush1.msra.mxu1 %v511_v42  ;;  %1248 = vmatprep.subr.mxu0 %v444_v43 }
  0xce   :  { %1317 = vmatprep.subr.mxu1 %v510_v44  ;;  %1249 = vmatpush1.msra.mxu0 %v443_v45 }
  0xcf   :  { %1318 = vmatpush1.msra.mxu1 %v509_v46  ;;  %1250 = vmatprep.subr.mxu0 %v442_v47 }
  0xd0   :  { %1319 = vmatprep.subr.mxu1 %v508_v49  ;;  %1251 = vmatpush1.msra.mxu0 %v441_v50 }
  0xd1   :  { %1320 = vmatpush1.msra.mxu1 %v507_v51  ;;  %1252 = vmatprep.subr.mxu0 %v440_v52 }
  0xd2   :  { %1321 = vmatprep.subr.mxu1 %v506_v53  ;;  %1253 = vmatpush1.msra.mxu0 %v439_v54 }
  0xd3   :  { %1322 = vmatpush1.msra.mxu1 %v505_v55  ;;  %1254 = vmatprep.subr.mxu0 %v438_v56 }
  0xd4   :  { %1323 = vmatprep.subr.mxu1 %v504_v57  ;;  %1255 = vmatpush1.msra.mxu0 %v437_v58 }
  0xd5   :  { %1324 = vmatpush1.msra.mxu1 %v503_v59  ;;  %1256 = vmatprep.subr.mxu0 %v436_v60 }
  0xd6   :  { %1325 = vmatprep.subr.mxu1 %v502_v61  ;;  %1257 = vmatpush1.msra.mxu0 %v435_v62 }
  0xd7   :  { %1326 = vmatpush1.msra.mxu1 %v501_v63  ;;  %1258 = vmatprep.subr.mxu0 %v434_v0 }
  0xd8   :  { %1327 = vmatprep.subr.mxu1 %v500_v1  ;;  %1259 = vmatpush1.msra.mxu0 %v433_v2 }
  0xd9   :  { %1328 = vmatpush1.msra.mxu1 %v499_v3  ;;  %1260 = vmatprep.subr.mxu0 %v432_v4 }
  0xda   :  { %1329 = vmatprep.subr.mxu1 %v498_v5  ;;  %1261 = vmatpush1.msra.mxu0 %v431_v6 }
  0xdb   :  { %1330 = vmatpush1.msra.mxu1 %v497_v7  ;;  %1262 = vmatprep.subr.mxu0 %v430_v8 }
  0xdc   :  { %16 = vsyncpa [#allocation6], 0  ;;  %1331 = vmatprep.subr.mxu1 %v496_v9  ;;  %1263 = vmatpush1.msra.mxu0 %v429_v10  ;;  %v493_v15 = vld [vmem:[%s4026_s2 + $0xe50] sm:$0xff]  ;;  %v426_v16 = vld [vmem:[%s4026_s2 + $0xc38] sm:$0xff]  ;;  %vm813_vm0 = vcmask 261120   ;;  %vm1712_vm1 = vcmask 41984  }
  0xdd   :  { %1332 = vmatpush1.msra.mxu1 %v495_v11  ;;  %1264 = vmatprep.subr.mxu0 %v428_v12  ;;  %v492_v17 = vld [vmem:[%s4026_s2 + $0xe48] sm:$0xff]  ;;  %v425_v18 = vld [vmem:[%s4026_s2 + $0xc30] sm:$0xff]  ;;  %v491_v19 = vld [vmem:[%s4026_s2 + $0xe40] sm:$0xff]  ;;  %vm1710_vm2 = vcmask 1024   ;;  %s1879_s13 = smov [#allocation3]   ;;  %s1880_s15 = smov [#allocation5]  }
  0xde   :  { %1333 = vmatprep.subr.mxu1 %v494_v13  ;;  %1265 = vmatpush1.msra.mxu0 %v427_v14  ;;  %v424_v20 = vld [vmem:[%s4026_s2 + $0xc28] sm:$0xff]  ;;  %v490_v21 = vld [vmem:[%s4026_s2 + $0xe38] sm:$0xff]  ;;  %v423_v22 = vld [vmem:[%s4026_s2 + $0xc20] sm:$0xff]  ;;  %s1746_s14 = sshll.u32 %s1879_s13, 4  ;;  %s1756_s16 = sshll.u32 %s1880_s15, 4  ;;  %s1747_s14 = int_to_ptr.vmem [resolvable:$true] %s1746_s14  ;;  %s1757_s16 = int_to_ptr.vmem [resolvable:$true] %s1756_s16 }
  0xdf   :  { %1334 = vmatpush1.msra.mxu1 %v493_v15  ;;  %1266 = vmatprep.subr.mxu0 %v426_v16  ;;  %v489_v23 = vld [vmem:[%s4026_s2 + $0xe30] sm:$0xff]  ;;  %v422_v24 = vld [vmem:[%s4026_s2 + $0xc18] sm:$0xff]  ;;  %v488_v25 = vld [vmem:[%s4026_s2 + $0xe28] sm:$0xff]  ;;  %s1832_s17 = scalar_lea.vmem %s1747_s14, 32  ;;  %p1837_p1 = scmp.lt.s32.totalorder %s1747_s14, %s1747_s14 }
  0xe0   :  { %1335 = vmatprep.subr.mxu1 %v492_v17  ;;  %1267 = vmatpush1.msra.mxu0 %v425_v18  ;;  %v421_v26 = vld [vmem:[%s4026_s2 + $0xc10] sm:$0xff]  ;;  %v487_v27 = vld [vmem:[%s4026_s2 + $0xe20] sm:$0xff]  ;;  %v420_v28 = vld [vmem:[%s4026_s2 + $0xc08] sm:$0xff]  ;;  %p1833_p0 = scmp.ne.s32.totalorder %s1747_s14, %s1832_s17  ;;  %p1838_p2 = scmp.lt.s32.totalorder %s1832_s17, %s1832_s17 }
  0xe1   :  { %1336 = vmatpush1.msra.mxu1 %v491_v19  ;;  %1268 = vmatprep.subr.mxu0 %v424_v20  ;;  %v486_v29 = vld [vmem:[%s4026_s2 + $0xe18] sm:$0xff]  ;;  %v419_v30 = vld [vmem:[%s4026_s2 + $0xc00] sm:$0xff]  ;;  %v485_v31 = vld [vmem:[%s4026_s2 + $0xe10] sm:$0xff] }
  0xe2   :  { %1337 = vmatprep.subr.mxu1 %v490_v21  ;;  %1269 = vmatpush1.msra.mxu0 %v423_v22  ;;  %v482_v32 = vld [vmem:[%s4026_s2 + $0xdf8] sm:$0xff]  ;;  %v484_v33 = vld [vmem:[%s4026_s2 + $0xe08] sm:$0xff]  ;;  %v481_v34 = vld [vmem:[%s4026_s2 + $0xdf0] sm:$0xff]  ;;  %p1839_p3 = por %p1838_p2, %p1837_p1 }
  0xe3   :  { %1338 = vmatpush1.msra.mxu1 %v489_v23  ;;  %1270 = vmatprep.subr.mxu0 %v422_v24  ;;  %v483_v35 = vld [vmem:[%s4026_s2 + $0xe00] sm:$0xff]  ;;  %v480_v36 = vld [vmem:[%s4026_s2 + $0xde8] sm:$0xff]  ;;  %v546_v37 = vld [vmem:[%s4026_s2 + $0xff8] sm:$0xff] }
  0xe4   :  { %1339 = vmatprep.subr.mxu1 %v488_v25  ;;  %1271 = vmatpush1.msra.mxu0 %v421_v26  ;;  %v479_v39 = vld [vmem:[%s4026_s2 + $0xde0] sm:$0xff]  ;;  %v545_v40 = vld [vmem:[%s4026_s2 + $0xff0] sm:$0xff]  ;;  %v478_v41 = vld [vmem:[%s4026_s2 + $0xdd8] sm:$0xff]  ;;  %p1840_p4 = pnand %p1839_p3, %p1833_p0 }
  0xe5   :  { %1340 = vmatpush1.msra.mxu1 %v487_v27  ;;  %1272 = vmatprep.subr.mxu0 %v420_v28  ;;  %v544_v42 = vld [vmem:[%s4026_s2 + $0xfe8] sm:$0xff]  ;;  %v477_v43 = vld [vmem:[%s4026_s2 + $0xdd0] sm:$0xff]  ;;  %v543_v44 = vld [vmem:[%s4026_s2 + $0xfe0] sm:$0xff] }
  0xe6   :  { %1341 = vmatprep.subr.mxu1 %v486_v29  ;;  %1273 = vmatpush1.msra.mxu0 %v419_v30  ;;  %v476_v45 = vld [vmem:[%s4026_s2 + $0xdc8] sm:$0xff]  ;;  %v542_v46 = vld [vmem:[%s4026_s2 + $0xfd8] sm:$0xff]  ;;  %v475_v47 = vld [vmem:[%s4026_s2 + $0xdc0] sm:$0xff] }
  0xe7   :  { %1342 = vmatpush1.msra.mxu1 %v485_v31  ;;  %1274 = vmatprep.subr.mxu0 %v482_v32  ;;  %v541_v49 = vld [vmem:[%s4026_s2 + $0xfd0] sm:$0xff]  ;;  %v474_v50 = vld [vmem:[%s4026_s2 + $0xdb8] sm:$0xff]  ;;  %v540_v51 = vld [vmem:[%s4026_s2 + $0xfc8] sm:$0xff] }
  0xe8   :  { %1343 = vmatprep.subr.mxu1 %v484_v33  ;;  %1275 = vmatpush2.msra.mxu0 %v481_v34  ;;  %v473_v52 = vld [vmem:[%s4026_s2 + $0xdb0] sm:$0xff]  ;;  %v539_v53 = vld [vmem:[%s4026_s2 + $0xfc0] sm:$0xff]  ;;  %v472_v54 = vld [vmem:[%s4026_s2 + $0xda8] sm:$0xff] }
  0xe9   :  { %1344 = vmatpush1.msra.mxu1 %v483_v35  ;;  %1276 = vmatprep.subr.mxu0 %v480_v36  ;;  %v538_v55 = vld [vmem:[%s4026_s2 + $0xfb8] sm:$0xff]  ;;  %v471_v56 = vld [vmem:[%s4026_s2 + $0xda0] sm:$0xff]  ;;  %v537_v57 = vld [vmem:[%s4026_s2 + $0xfb0] sm:$0xff] }
  0xea   :  { %1345 = vmatprep.subr.mxu1 %v546_v37  ;;  %1277 = vmatpush2.msra.mxu0 %v479_v39  ;;  %v470_v58 = vld [vmem:[%s4026_s2 + $0xd98] sm:$0xff]  ;;  %v536_v59 = vld [vmem:[%s4026_s2 + $0xfa8] sm:$0xff]  ;;  %v469_v60 = vld [vmem:[%s4026_s2 + $0xd90] sm:$0xff] }
  0xeb   :  { %1346 = vmatpush2.msra.mxu1 %v545_v40  ;;  %1278 = vmatprep.subr.mxu0 %v478_v41  ;;  %v535_v61 = vld [vmem:[%s4026_s2 + $0xfa0] sm:$0xff]  ;;  %v468_v62 = vld [vmem:[%s4026_s2 + $0xd88] sm:$0xff]  ;;  %v534_v63 = vld [vmem:[%s4026_s2 + $0xf98] sm:$0xff] }
  0xec   :  { %1347 = vmatprep.subr.mxu1 %v544_v42  ;;  %1279 = vmatpush2.msra.mxu0 %v477_v43  ;;  %v467_v0 = vld [vmem:[%s4026_s2 + $0xd80] sm:$0xff]  ;;  %v533_v1 = vld [vmem:[%s4026_s2 + $0xf90] sm:$0xff]  ;;  %v466_v2 = vld [vmem:[%s4026_s2 + $0xd78] sm:$0xff] }
  0xed   :  { %1348 = vmatpush2.msra.mxu1 %v543_v44  ;;  %1280 = vmatprep.subr.mxu0 %v476_v45  ;;  %v532_v3 = vld [vmem:[%s4026_s2 + $0xf88] sm:$0xff]  ;;  %v465_v4 = vld [vmem:[%s4026_s2 + $0xd70] sm:$0xff]  ;;  %v531_v5 = vld [vmem:[%s4026_s2 + $0xf80] sm:$0xff] }
  0xee   :  { %1349 = vmatprep.subr.mxu1 %v542_v46  ;;  %1281 = vmatpush2.msra.mxu0 %v475_v47  ;;  %v464_v6 = vld [vmem:[%s4026_s2 + $0xd68] sm:$0xff]  ;;  %v530_v7 = vld [vmem:[%s4026_s2 + $0xf78] sm:$0xff]  ;;  %v463_v8 = vld [vmem:[%s4026_s2 + $0xd60] sm:$0xff] }
  0xef   :  { %1350 = vmatpush2.msra.mxu1 %v541_v49  ;;  %1282 = vmatprep.subr.mxu0 %v474_v50  ;;  %v529_v9 = vld [vmem:[%s4026_s2 + $0xf70] sm:$0xff]  ;;  %v462_v10 = vld [vmem:[%s4026_s2 + $0xd58] sm:$0xff]  ;;  %v528_v11 = vld [vmem:[%s4026_s2 + $0xf68] sm:$0xff] }
  0xf0   :  { %1351 = vmatprep.subr.mxu1 %v540_v51  ;;  %1283 = vmatpush2.msra.mxu0 %v473_v52  ;;  %v461_v12 = vld [vmem:[%s4026_s2 + $0xd50] sm:$0xff]  ;;  %v527_v13 = vld [vmem:[%s4026_s2 + $0xf60] sm:$0xff]  ;;  %v460_v14 = vld [vmem:[%s4026_s2 + $0xd48] sm:$0xff] }
  0xf1   :  { %1352 = vmatpush2.msra.mxu1 %v539_v53  ;;  %1284 = vmatprep.subr.mxu0 %v472_v54  ;;  %v526_v15 = vld [vmem:[%s4026_s2 + $0xf58] sm:$0xff]  ;;  %v459_v16 = vld [vmem:[%s4026_s2 + $0xd40] sm:$0xff]  ;;  %v525_v18 = vld [vmem:[%s4026_s2 + $0xf50] sm:$0xff] }
  0xf2   :  { %1353 = vmatprep.subr.mxu1 %v538_v55  ;;  %1285 = vmatpush2.msra.mxu0 %v471_v56  ;;  %v32_v17 = vld [vmem:[%s4025_s1 + $0x18] sm:$0xff]  ;;  %v524_v20 = vld [vmem:[%s4026_s2 + $0xf48] sm:$0xff]  ;;  %v457_v21 = vld [vmem:[%s4026_s2 + $0xd30] sm:$0xff] }
  0xf3   :  { %1354 = vmatpush2.msra.mxu1 %v537_v57  ;;  %1286 = vmatprep.subr.mxu0 %v470_v58  ;;  %v458_v19 = vld [vmem:[%s4026_s2 + $0xd38] sm:$0xff]  ;;  %v523_v22 = vld [vmem:[%s4026_s2 + $0xf40] sm:$0xff]  ;;  %v456_v23 = vld [vmem:[%s4026_s2 + $0xd28] sm:$0xff]  ;;  %v752_v24 = vcombine.high %v32_v17, %v32_v17  ;;  %v759_v27 = vrot.slane %v32_v17, %v2250_v48 }
  0xf4   :  { %1355 = vmatprep.subr.mxu1 %v536_v59  ;;  %1287 = vmatpush2.msra.mxu0 %v469_v60  ;;  %v522_v25 = vld [vmem:[%s4026_s2 + $0xf38] sm:$0xff]  ;;  %v455_v26 = vld [vmem:[%s4026_s2 + $0xd20] sm:$0xff]  ;;  %v521_v28 = vld [vmem:[%s4026_s2 + $0xf30] sm:$0xff] }
  0xf5   :  { %1356 = vmatpush2.msra.mxu1 %v535_v61  ;;  %1288 = vmatprep.subr.mxu0 %v468_v62  ;;  %v454_v29 = vld [vmem:[%s4026_s2 + $0xd18] sm:$0xff]  ;;  %v520_v30 = vld [vmem:[%s4026_s2 + $0xf28] sm:$0xff]  ;;  %v453_v31 = vld [vmem:[%s4026_s2 + $0xd10] sm:$0xff]  ;;  %v766_v34 = vrot.slane %v752_v24, %v2250_v48  ;;  %v767_v37 = vcombine.high %v759_v27, %v759_v27 }
  0xf6   :  { %1357 = vmatprep.subr.mxu1 %v534_v63  ;;  %1289 = vmatpush2.msra.mxu0 %v467_v0  ;;  %v519_v32 = vld [vmem:[%s4026_s2 + $0xf20] sm:$0xff]  ;;  %v452_v33 = vld [vmem:[%s4026_s2 + $0xd08] sm:$0xff]  ;;  %v518_v35 = vld [vmem:[%s4026_s2 + $0xf18] sm:$0xff] }
  0xf7   :  { %1358 = vmatpush2.msra.mxu1 %v533_v1  ;;  %1290 = vmatprep.subr.mxu0 %v466_v2  ;;  %v451_v36 = vld [vmem:[%s4026_s2 + $0xd00] sm:$0xff]  ;;  %v517_v39 = vld [vmem:[%s4026_s2 + $0xf10] sm:$0xff]  ;;  %v516_v40 = vld [vmem:[%s4026_s2 + $0xf08] sm:$0xff]  ;;  %v768_v43 = vcombine.high %v766_v34, %v766_v34 }
  0xf8   :  { %1359 = vmatprep.subr.mxu1 %v532_v3  ;;  %1291 = vmatpush2.msra.mxu0 %v465_v4  ;;  %v578_v41 = vld [vmem:[%s4026_s2 + $0x10f8] sm:$0xff]  ;;  %v515_v42 = vld [vmem:[%s4026_s2 + $0xf00] sm:$0xff]  ;;  %v577_v44 = vld [vmem:[%s4026_s2 + $0x10f0] sm:$0xff] }
  0xf9   :  { %1360 = vmatpush2.msra.mxu1 %v531_v5  ;;  %1292 = vmatprep.subr.mxu0 %v464_v6  ;;  %v576_v45 = vld [vmem:[%s4026_s2 + $0x10e8] sm:$0xff]  ;;  %v642_v46 = vld [vmem:[%s4026_s2 + $0x12f8] sm:$0xff]  ;;  %v575_v47 = vld [vmem:[%s4026_s2 + $0x10e0] sm:$0xff] }
  0xfa   :  { %1361 = vmatprep.subr.mxu1 %v530_v7  ;;  %1293 = vmatpush2.msra.mxu0 %v463_v8  ;;  %v641_v49 = vld [vmem:[%s4026_s2 + $0x12f0] sm:$0xff]  ;;  %v574_v50 = vld [vmem:[%s4026_s2 + $0x10d8] sm:$0xff]  ;;  %v640_v51 = vld [vmem:[%s4026_s2 + $0x12e8] sm:$0xff] }
  0xfb   :  { %1362 = vmatpush2.msra.mxu1 %v529_v9  ;;  %1294 = vmatprep.subr.mxu0 %v462_v10  ;;  %v573_v52 = vld [vmem:[%s4026_s2 + $0x10d0] sm:$0xff]  ;;  %v639_v53 = vld [vmem:[%s4026_s2 + $0x12e0] sm:$0xff]  ;;  %v572_v54 = vld [vmem:[%s4026_s2 + $0x10c8] sm:$0xff] }
  0xfc   :  { %1363 = vmatprep.subr.mxu1 %v528_v11  ;;  %1295 = vmatpush2.msra.mxu0 %v461_v12  ;;  %v638_v55 = vld [vmem:[%s4026_s2 + $0x12d8] sm:$0xff]  ;;  %v571_v56 = vld [vmem:[%s4026_s2 + $0x10c0] sm:$0xff]  ;;  %v637_v57 = vld [vmem:[%s4026_s2 + $0x12d0] sm:$0xff] }
  0xfd   :  { %1364 = vmatpush2.msra.mxu1 %v527_v13  ;;  %1296 = vmatprep.subr.mxu0 %v460_v14  ;;  %v570_v58 = vld [vmem:[%s4026_s2 + $0x10b8] sm:$0xff]  ;;  %v636_v59 = vld [vmem:[%s4026_s2 + $0x12c8] sm:$0xff]  ;;  %v569_v60 = vld [vmem:[%s4026_s2 + $0x10b0] sm:$0xff] }
  0xfe   :  { %1365 = vmatprep.subr.mxu1 %v526_v15  ;;  %1297 = vmatpush2.msra.mxu0 %v459_v16  ;;  %v635_v61 = vld [vmem:[%s4026_s2 + $0x12c0] sm:$0xff]  ;;  %v568_v62 = vld [vmem:[%s4026_s2 + $0x10a8] sm:$0xff]  ;;  %v634_v63 = vld [vmem:[%s4026_s2 + $0x12b8] sm:$0xff] }
  0xff   :  { %1366 = vmatpush2.msra.mxu1 %v525_v18  ;;  %1298 = vmatprep.subr.mxu0 %v458_v19  ;;  %v567_v0 = vld [vmem:[%s4026_s2 + $0x10a0] sm:$0xff]  ;;  %v633_v1 = vld [vmem:[%s4026_s2 + $0x12b0] sm:$0xff]  ;;  %v566_v2 = vld [vmem:[%s4026_s2 + $0x1098] sm:$0xff] }
 0x100   :  { %1367 = vmatprep.subr.mxu1 %v524_v20  ;;  %1299 = vmatpush2.msra.mxu0 %v457_v21  ;;  %v632_v3 = vld [vmem:[%s4026_s2 + $0x12a8] sm:$0xff]  ;;  %v565_v4 = vld [vmem:[%s4026_s2 + $0x1090] sm:$0xff]  ;;  %v631_v5 = vld [vmem:[%s4026_s2 + $0x12a0] sm:$0xff] }
 0x101   :  { %1368 = vmatpush2.msra.mxu1 %v523_v22  ;;  %1300 = vmatprep.subr.mxu0 %v456_v23  ;;  %v564_v6 = vld [vmem:[%s4026_s2 + $0x1088] sm:$0xff]  ;;  %v630_v7 = vld [vmem:[%s4026_s2 + $0x1298] sm:$0xff]  ;;  %v563_v8 = vld [vmem:[%s4026_s2 + $0x1080] sm:$0xff] }
 0x102   :  { %1369 = vmatprep.subr.mxu1 %v522_v25  ;;  %1301 = vmatpush2.msra.mxu0 %v455_v26  ;;  %v629_v9 = vld [vmem:[%s4026_s2 + $0x1290] sm:$0xff]  ;;  %v562_v10 = vld [vmem:[%s4026_s2 + $0x1078] sm:$0xff]  ;;  %v628_v11 = vld [vmem:[%s4026_s2 + $0x1288] sm:$0xff] }
 0x103   :  { %1370 = vmatpush2.msra.mxu1 %v521_v28  ;;  %1302 = vmatprep.subr.mxu0 %v454_v29  ;;  %v561_v12 = vld [vmem:[%s4026_s2 + $0x1070] sm:$0xff]  ;;  %v627_v13 = vld [vmem:[%s4026_s2 + $0x1280] sm:$0xff]  ;;  %v560_v14 = vld [vmem:[%s4026_s2 + $0x1068] sm:$0xff] }
 0x104   :  { %1371 = vmatprep.subr.mxu1 %v520_v30  ;;  %1303 = vmatpush2.msra.mxu0 %v453_v31  ;;  %v626_v15 = vld [vmem:[%s4026_s2 + $0x1278] sm:$0xff]  ;;  %v559_v16 = vld [vmem:[%s4026_s2 + $0x1060] sm:$0xff]  ;;  %v625_v17 = vld [vmem:[%s4026_s2 + $0x1270] sm:$0xff] }
 0x105   :  { %1372 = vmatpush2.msra.mxu1 %v519_v32  ;;  %1304 = vmatprep.subr.mxu0 %v452_v33  ;;  %v558_v18 = vld [vmem:[%s4026_s2 + $0x1058] sm:$0xff]  ;;  %v624_v19 = vld [vmem:[%s4026_s2 + $0x1268] sm:$0xff]  ;;  %v557_v20 = vld [vmem:[%s4026_s2 + $0x1050] sm:$0xff] }
 0x106   :  { %1373 = vmatprep.subr.mxu1 %v518_v35  ;;  %1305 = vmatpush2.msra.mxu0 %v451_v36  ;;  %v623_v21 = vld [vmem:[%s4026_s2 + $0x1260] sm:$0xff]  ;;  %v556_v22 = vld [vmem:[%s4026_s2 + $0x1048] sm:$0xff]  ;;  %v622_v23 = vld [vmem:[%s4026_s2 + $0x1258] sm:$0xff] }
 0x107   :  { %1306 = vmatprep.mubr.f32.mxu0 %v767_v37  ;;  %1374 = vmatpush2.msra.mxu1 %v517_v39  ;;  %v555_v24 = vld [vmem:[%s4026_s2 + $0x1040] sm:$0xff]  ;;  %v621_v25 = vld [vmem:[%s4026_s2 + $0x1250] sm:$0xff]  ;;  %v554_v26 = vld [vmem:[%s4026_s2 + $0x1038] sm:$0xff] }
 0x108   :  { %1307 = vmatmul.mubr.f32.vlgmr.msra.gmra.mxu0 %v759_v27  ;;  %1375 = vmatprep.subr.mxu1 %v516_v40  ;;  %v620_v27 = vld [vmem:[%s4026_s2 + $0x1248] sm:$0xff]  ;;  %v553_v28 = vld [vmem:[%s4026_s2 + $0x1030] sm:$0xff]  ;;  %v619_v29 = vld [vmem:[%s4026_s2 + $0x1240] sm:$0xff] }
 0x109   :  { %1384 = vmatprep.subr.mxu0 %v578_v41  ;;  %1376 = vmatpush2.msra.mxu1 %v515_v42  ;;  %v552_v30 = vld [vmem:[%s4026_s2 + $0x1028] sm:$0xff]  ;;  %v618_v31 = vld [vmem:[%s4026_s2 + $0x1238] sm:$0xff]  ;;  %v551_v32 = vld [vmem:[%s4026_s2 + $0x1020] sm:$0xff] }
 0x10a   :  { %1377 = vmatprep.mubr.f32.mxu1 %v768_v43  ;;  %1385 = vmatpush1.msra.mxu0 %v577_v44  ;;  %v617_v33 = vld [vmem:[%s4026_s2 + $0x1230] sm:$0xff]  ;;  %v616_v35 = vld [vmem:[%s4026_s2 + $0x1228] sm:$0xff]  ;;  %v615_v37 = vld [vmem:[%s4026_s2 + $0x1220] sm:$0xff] }
 0x10b   :  { %1378 = vmatmul.mubr.f32.vlgmr.msra.gmra.mxu1 %v766_v34  ;;  %1386 = vmatprep.subr.mxu0 %v576_v45  ;;  %v550_v34 = vld [vmem:[%s4026_s2 + $0x1018] sm:$0xff]  ;;  %v549_v36 = vld [vmem:[%s4026_s2 + $0x1010] sm:$0xff]  ;;  %v548_v39 = vld [vmem:[%s4026_s2 + $0x1008] sm:$0xff] }
 0x10c   :  { %1455 = vmatprep.subr.mxu1 %v642_v46  ;;  %1387 = vmatpush1.msra.mxu0 %v575_v47  ;;  %v614_v40 = vld [vmem:[%s4026_s2 + $0x1218] sm:$0xff]  ;;  %v547_v41 = vld [vmem:[%s4026_s2 + $0x1000] sm:$0xff]  ;;  %v613_v42 = vld [vmem:[%s4026_s2 + $0x1210] sm:$0xff] }
 0x10d   :  { %1456 = vmatpush1.msra.mxu1 %v641_v49  ;;  %1388 = vmatprep.subr.mxu0 %v574_v50  ;;  %v610_v43 = vld [vmem:[%s4026_s2 + $0x11f8] sm:$0xff]  ;;  %v612_v44 = vld [vmem:[%s4026_s2 + $0x1208] sm:$0xff]  ;;  %v609_v45 = vld [vmem:[%s4026_s2 + $0x11f0] sm:$0xff] }
 0x10e   :  { %1457 = vmatprep.subr.mxu1 %v640_v51  ;;  %1389 = vmatpush1.msra.mxu0 %v573_v52  ;;  %v611_v46 = vld [vmem:[%s4026_s2 + $0x1200] sm:$0xff]  ;;  %v608_v47 = vld [vmem:[%s4026_s2 + $0x11e8] sm:$0xff]  ;;  %v674_v49 = vld [vmem:[%s4026_s2 + $0x13f8] sm:$0xff] }
 0x10f   :  { %1458 = vmatpush1.msra.mxu1 %v639_v53  ;;  %1390 = vmatprep.subr.mxu0 %v572_v54  ;;  %v607_v50 = vld [vmem:[%s4026_s2 + $0x11e0] sm:$0xff]  ;;  %v673_v51 = vld [vmem:[%s4026_s2 + $0x13f0] sm:$0xff]  ;;  %v606_v52 = vld [vmem:[%s4026_s2 + $0x11d8] sm:$0xff] }
 0x110   :  { %1459 = vmatprep.subr.mxu1 %v638_v55  ;;  %1391 = vmatpush1.msra.mxu0 %v571_v56  ;;  %v672_v53 = vld [vmem:[%s4026_s2 + $0x13e8] sm:$0xff]  ;;  %v605_v54 = vld [vmem:[%s4026_s2 + $0x11d0] sm:$0xff]  ;;  %v671_v55 = vld [vmem:[%s4026_s2 + $0x13e0] sm:$0xff] }
 0x111   :  { %1460 = vmatpush1.msra.mxu1 %v637_v57  ;;  %1392 = vmatprep.subr.mxu0 %v570_v58  ;;  %v604_v56 = vld [vmem:[%s4026_s2 + $0x11c8] sm:$0xff]  ;;  %v670_v57 = vld [vmem:[%s4026_s2 + $0x13d8] sm:$0xff]  ;;  %v603_v58 = vld [vmem:[%s4026_s2 + $0x11c0] sm:$0xff] }
 0x112   :  { %1461 = vmatprep.subr.mxu1 %v636_v59  ;;  %1393 = vmatpush1.msra.mxu0 %v569_v60  ;;  %v669_v59 = vld [vmem:[%s4026_s2 + $0x13d0] sm:$0xff]  ;;  %v602_v60 = vld [vmem:[%s4026_s2 + $0x11b8] sm:$0xff] }
 0x113   :  { %1462 = vmatpush1.msra.mxu1 %v635_v61  ;;  %1394 = vmatprep.subr.mxu0 %v568_v62  ;;  %v668_v61 = vld [vmem:[%s4026_s2 + $0x13c8] sm:$0xff]  ;;  %v601_v62 = vld [vmem:[%s4026_s2 + $0x11b0] sm:$0xff] }
 0x114   :  { %1463 = vmatprep.subr.mxu1 %v634_v63  ;;  %1395 = vmatpush1.msra.mxu0 %v567_v0  ;;  %v667_v63 = vld [vmem:[%s4026_s2 + $0x13c0] sm:$0xff]  ;;  %v600_v0 = vld [vmem:[%s4026_s2 + $0x11a8] sm:$0xff] }
 0x115   :  { %1464 = vmatpush1.msra.mxu1 %v633_v1  ;;  %1396 = vmatprep.subr.mxu0 %v566_v2  ;;  %v666_v1 = vld [vmem:[%s4026_s2 + $0x13b8] sm:$0xff]  ;;  %v599_v2 = vld [vmem:[%s4026_s2 + $0x11a0] sm:$0xff] }
 0x116   :  { %1465 = vmatprep.subr.mxu1 %v632_v3  ;;  %1397 = vmatpush1.msra.mxu0 %v565_v4  ;;  %v665_v3 = vld [vmem:[%s4026_s2 + $0x13b0] sm:$0xff]  ;;  %v598_v4 = vld [vmem:[%s4026_s2 + $0x1198] sm:$0xff] }
 0x117   :  { %1466 = vmatpush1.msra.mxu1 %v631_v5  ;;  %1398 = vmatprep.subr.mxu0 %v564_v6  ;;  %v664_v5 = vld [vmem:[%s4026_s2 + $0x13a8] sm:$0xff]  ;;  %v597_v6 = vld [vmem:[%s4026_s2 + $0x1190] sm:$0xff] }
 0x118   :  { %1467 = vmatprep.subr.mxu1 %v630_v7  ;;  %1399 = vmatpush1.msra.mxu0 %v563_v8  ;;  %v663_v7 = vld [vmem:[%s4026_s2 + $0x13a0] sm:$0xff]  ;;  %v596_v8 = vld [vmem:[%s4026_s2 + $0x1188] sm:$0xff] }
 0x119   :  { %1468 = vmatpush1.msra.mxu1 %v629_v9  ;;  %1400 = vmatprep.subr.mxu0 %v562_v10  ;;  %v662_v9 = vld [vmem:[%s4026_s2 + $0x1398] sm:$0xff]  ;;  %v595_v10 = vld [vmem:[%s4026_s2 + $0x1180] sm:$0xff] }
 0x11a   :  { %1469 = vmatprep.subr.mxu1 %v628_v11  ;;  %1401 = vmatpush1.msra.mxu0 %v561_v12  ;;  %v661_v11 = vld [vmem:[%s4026_s2 + $0x1390] sm:$0xff]  ;;  %v594_v12 = vld [vmem:[%s4026_s2 + $0x1178] sm:$0xff] }
 0x11b   :  { %1470 = vmatpush1.msra.mxu1 %v627_v13  ;;  %1402 = vmatprep.subr.mxu0 %v560_v14  ;;  %v660_v13 = vld [vmem:[%s4026_s2 + $0x1388] sm:$0xff]  ;;  %v593_v14 = vld [vmem:[%s4026_s2 + $0x1170] sm:$0xff] }
 0x11c   :  { %1471 = vmatprep.subr.mxu1 %v626_v15  ;;  %1403 = vmatpush1.msra.mxu0 %v559_v16  ;;  %v659_v15 = vld [vmem:[%s4026_s2 + $0x1380] sm:$0xff]  ;;  %v592_v16 = vld [vmem:[%s4026_s2 + $0x1168] sm:$0xff] }
 0x11d   :  { %1472 = vmatpush1.msra.mxu1 %v625_v17  ;;  %1404 = vmatprep.subr.mxu0 %v558_v18  ;;  %v658_v17 = vld [vmem:[%s4026_s2 + $0x1378] sm:$0xff]  ;;  %v591_v18 = vld [vmem:[%s4026_s2 + $0x1160] sm:$0xff] }
 0x11e   :  { %1473 = vmatprep.subr.mxu1 %v624_v19  ;;  %1405 = vmatpush1.msra.mxu0 %v557_v20  ;;  %v657_v19 = vld [vmem:[%s4026_s2 + $0x1370] sm:$0xff]  ;;  %v590_v20 = vld [vmem:[%s4026_s2 + $0x1158] sm:$0xff] }
 0x11f   :  { %1474 = vmatpush1.msra.mxu1 %v623_v21  ;;  %1406 = vmatprep.subr.mxu0 %v556_v22  ;;  %v656_v21 = vld [vmem:[%s4026_s2 + $0x1368] sm:$0xff]  ;;  %v589_v22 = vld [vmem:[%s4026_s2 + $0x1150] sm:$0xff] }
 0x120   :  { %1475 = vmatprep.subr.mxu1 %v622_v23  ;;  %1407 = vmatpush1.msra.mxu0 %v555_v24  ;;  %v655_v23 = vld [vmem:[%s4026_s2 + $0x1360] sm:$0xff]  ;;  %v588_v24 = vld [vmem:[%s4026_s2 + $0x1148] sm:$0xff] }
 0x121   :  { %1476 = vmatpush1.msra.mxu1 %v621_v25  ;;  %1408 = vmatprep.subr.mxu0 %v554_v26  ;;  %v654_v25 = vld [vmem:[%s4026_s2 + $0x1358] sm:$0xff]  ;;  %v587_v26 = vld [vmem:[%s4026_s2 + $0x1140] sm:$0xff] }
 0x122   :  { %1477 = vmatprep.subr.mxu1 %v620_v27  ;;  %1409 = vmatpush1.msra.mxu0 %v553_v28  ;;  %v33_v27 = vld [vmem:[%s4025_s1 + $0x20] sm:$0xff]  ;;  %v653_v28 = vld [vmem:[%s4026_s2 + $0x1350] sm:$0xff] }
 0x123   :  { %1478 = vmatpush1.msra.mxu1 %v619_v29  ;;  %1410 = vmatprep.subr.mxu0 %v552_v30  ;;  %v586_v29 = vld [vmem:[%s4026_s2 + $0x1138] sm:$0xff]  ;;  %v652_v30 = vld [vmem:[%s4026_s2 + $0x1348] sm:$0xff] }
 0x124   :  { %1479 = vmatprep.subr.mxu1 %v618_v31  ;;  %1411 = vmatpush1.msra.mxu0 %v551_v32  ;;  %v585_v31 = vld [vmem:[%s4026_s2 + $0x1130] sm:$0xff]  ;;  %v651_v32 = vld [vmem:[%s4026_s2 + $0x1340] sm:$0xff] }
 0x125   :  { %1480 = vmatpush1.msra.mxu1 %v617_v33  ;;  %1412 = vmatprep.subr.mxu0 %v550_v34  ;;  %v584_v33 = vld [vmem:[%s4026_s2 + $0x1128] sm:$0xff]  ;;  %v769_v34 = vcombine.high %v33_v27, %v33_v27 }
 0x126   :  { %1481 = vmatprep.subr.mxu1 %v616_v35  ;;  %1413 = vmatpush1.msra.mxu0 %v549_v36  ;;  %v650_v35 = vld [vmem:[%s4026_s2 + $0x1338] sm:$0xff]  ;;  %v583_v36 = vld [vmem:[%s4026_s2 + $0x1120] sm:$0xff] }
 0x127   :  { %1482 = vmatpush1.msra.mxu1 %v615_v37  ;;  %1414 = vmatprep.subr.mxu0 %v548_v39  ;;  %v776_v37 = vrot.slane %v33_v27, %v2250_v48  ;;  %v649_v39 = vld [vmem:[%s4026_s2 + $0x1330] sm:$0xff]  ;;  %v1614_v27 = vld [vmem:[%s4028_s4 + $0x88] sm:$0xff] }
 0x128   :  { %1483 = vmatprep.subr.mxu1 %v614_v40  ;;  %1415 = vmatpush1.msra.mxu0 %v547_v41  ;;  %v582_v40 = vld [vmem:[%s4026_s2 + $0x1118] sm:$0xff]  ;;  %v648_v41 = vld [vmem:[%s4026_s2 + $0x1328] sm:$0xff] }
 0x129   :  { %1484 = vmatpush1.msra.mxu1 %v613_v42  ;;  %1416 = vmatprep.subr.mxu0 %v610_v43  ;;  %v581_v42 = vld [vmem:[%s4026_s2 + $0x1110] sm:$0xff]  ;;  %v647_v43 = vld [vmem:[%s4026_s2 + $0x1320] sm:$0xff] }
 0x12a   :  { %1485 = vmatprep.subr.mxu1 %v612_v44  ;;  %1417 = vmatpush2.msra.mxu0 %v609_v45  ;;  %v580_v44 = vld [vmem:[%s4026_s2 + $0x1108] sm:$0xff]  ;;  %v783_v45 = vrot.slane %v769_v34, %v2250_v48  ;;  %v882_v34 = vpop.f32.mrf.mxu0 }
 0x12b   :  { %1486 = vmatpush1.msra.mxu1 %v611_v46  ;;  %1418 = vmatprep.subr.mxu0 %v608_v47  ;;  %v646_v46 = vld [vmem:[%s4026_s2 + $0x1318] sm:$0xff]  ;;  %v579_v47 = vld [vmem:[%s4026_s2 + $0x1100] sm:$0xff]  ;;  %v644_v48 = vld [vmem:[%s4026_s2 + $0x1308] sm:$0xff] }
 0x12c   :  { %1487 = vmatprep.subr.mxu1 %v674_v49  ;;  %1419 = vmatpush2.msra.mxu0 %v607_v50  ;;  %v784_v49 = vcombine.high %v776_v37, %v776_v37  ;;  %v645_v50 = vld [vmem:[%s4026_s2 + $0x1310] sm:$0xff] }
 0x12d   :  { %1488 = vmatpush2.msra.mxu1 %v673_v51  ;;  %1420 = vmatprep.subr.mxu0 %v606_v52  ;;  %v682_v51 = vld [vmem:[%s4026_s2 + $0x1438] sm:$0xff]  ;;  %v643_v52 = vld [vmem:[%s4026_s2 + $0x1300] sm:$0xff] }
 0x12e   :  { %1489 = vmatprep.subr.mxu1 %v672_v53  ;;  %1421 = vmatpush2.msra.mxu0 %v605_v54  ;;  %v785_v53 = vcombine.high %v783_v45, %v783_v45  ;;  %v681_v54 = vld [vmem:[%s4026_s2 + $0x1430] sm:$0xff] }
 0x12f   :  { %1490 = vmatpush2.msra.mxu1 %v671_v55  ;;  %1422 = vmatprep.subr.mxu0 %v604_v56  ;;  %v680_v55 = vld [vmem:[%s4026_s2 + $0x1428] sm:$0xff]  ;;  %v679_v56 = vld [vmem:[%s4026_s2 + $0x1420] sm:$0xff] }
 0x130   :  { %1491 = vmatprep.subr.mxu1 %v670_v57  ;;  %1423 = vmatpush2.msra.mxu0 %v603_v58  ;;  %v678_v57 = vld [vmem:[%s4026_s2 + $0x1418] sm:$0xff]  ;;  %v677_v58 = vld [vmem:[%s4026_s2 + $0x1410] sm:$0xff] }
 0x131   :  { %1492 = vmatpush2.msra.mxu1 %v669_v59  ;;  %1424 = vmatprep.subr.mxu0 %v602_v60  ;;  %v676_v59 = vld [vmem:[%s4026_s2 + $0x1408] sm:$0xff]  ;;  %v1877_v60 = vmov 0.0  }
 0x132   :  { %1493 = vmatprep.subr.mxu1 %v668_v61  ;;  %1425 = vmatpush2.msra.mxu0 %v601_v62  ;;  %v1628_v61 = vld [vmem:[%s4028_s4 + $0xf8] sm:$0xff] }
 0x133   :  { %1494 = vmatpush2.msra.mxu1 %v667_v63  ;;  %1426 = vmatprep.subr.mxu0 %v600_v0  ;;  %v1612_v62 = vld [vmem:[%s4028_s4 + $0x78] sm:$0xff]  ;;  %v1627_v63 = vld [vmem:[%s4028_s4 + $0xf0] sm:$0xff]  ;;  %v675_v0 = vld [vmem:[%s4026_s2 + $0x1400] sm:$0xff] }
 0x134   :  { %1495 = vmatprep.subr.mxu1 %v666_v1  ;;  %1427 = vmatpush2.msra.mxu0 %v599_v2  ;;  %v1611_v1 = vld [vmem:[%s4028_s4 + $0x70] sm:$0xff]  ;;  %v1772_v2 = vld.sshfl [vmem:[%s4025_s1 + $0x28] sm:$0x3 pattern:$0x76325410] }
 0x135   :  { %1496 = vmatpush2.msra.mxu1 %v665_v3  ;;  %1428 = vmatprep.subr.mxu0 %v598_v4  ;;  %v1626_v3 = vld [vmem:[%s4028_s4 + $0xe8] sm:$0xff] }
 0x136   :  { %1497 = vmatprep.subr.mxu1 %v664_v5  ;;  %1429 = vmatpush2.msra.mxu0 %v597_v6  ;;  %v1610_v4 = vld [vmem:[%s4028_s4 + $0x68] sm:$0xff]  ;;  %v1625_v5 = vld [vmem:[%s4028_s4 + $0xe0] sm:$0xff] }
 0x137   :  { %1498 = vmatpush2.msra.mxu1 %v663_v7  ;;  %1430 = vmatprep.subr.mxu0 %v596_v8  ;;  %v1609_v6 = vld [vmem:[%s4028_s4 + $0x60] sm:$0xff]  ;;  %v1624_v7 = vld [vmem:[%s4028_s4 + $0xd8] sm:$0xff] }
 0x138   :  { %1499 = vmatprep.subr.mxu1 %v662_v9  ;;  %1431 = vmatpush2.msra.mxu0 %v595_v10  ;;  %v1608_v8 = vld [vmem:[%s4028_s4 + $0x58] sm:$0xff]  ;;  %v1623_v9 = vld [vmem:[%s4028_s4 + $0xd0] sm:$0xff] }
 0x139   :  { %1500 = vmatpush2.msra.mxu1 %v661_v11  ;;  %1432 = vmatprep.subr.mxu0 %v594_v12  ;;  %v1607_v10 = vld [vmem:[%s4028_s4 + $0x50] sm:$0xff]  ;;  %v1622_v11 = vld [vmem:[%s4028_s4 + $0xc8] sm:$0xff] }
 0x13a   :  { %1501 = vmatprep.subr.mxu1 %v660_v13  ;;  %1433 = vmatpush2.msra.mxu0 %v593_v14  ;;  %v1606_v12 = vld [vmem:[%s4028_s4 + $0x48] sm:$0xff]  ;;  %v1621_v13 = vld [vmem:[%s4028_s4 + $0xc0] sm:$0xff] }
 0x13b   :  { %1502 = vmatpush2.msra.mxu1 %v659_v15  ;;  %1434 = vmatprep.subr.mxu0 %v592_v16  ;;  %v1605_v14 = vld [vmem:[%s4028_s4 + $0x40] sm:$0xff]  ;;  %v1620_v15 = vld [vmem:[%s4028_s4 + $0xb8] sm:$0xff] }
 0x13c   :  { %1503 = vmatprep.subr.mxu1 %v658_v17  ;;  %1435 = vmatpush2.msra.mxu0 %v591_v18  ;;  %v1604_v16 = vld [vmem:[%s4028_s4 + $0x38] sm:$0xff]  ;;  %v1619_v17 = vld [vmem:[%s4028_s4 + $0xb0] sm:$0xff] }
 0x13d   :  { %1504 = vmatpush2.msra.mxu1 %v657_v19  ;;  %1436 = vmatprep.subr.mxu0 %v590_v20  ;;  %v1603_v18 = vld [vmem:[%s4028_s4 + $0x30] sm:$0xff]  ;;  %v1618_v19 = vld [vmem:[%s4028_s4 + $0xa8] sm:$0xff] }
 0x13e   :  { %1505 = vmatprep.subr.mxu1 %v656_v21  ;;  %1437 = vmatpush2.msra.mxu0 %v589_v22  ;;  %v1602_v20 = vld [vmem:[%s4028_s4 + $0x28] sm:$0xff]  ;;  %v1617_v21 = vld [vmem:[%s4028_s4 + $0xa0] sm:$0xff] }
 0x13f   :  { %1506 = vmatpush2.msra.mxu1 %v655_v23  ;;  %1438 = vmatprep.subr.mxu0 %v588_v24  ;;  %v1601_v22 = vld [vmem:[%s4028_s4 + $0x20] sm:$0xff]  ;;  %v1616_v23 = vld [vmem:[%s4028_s4 + $0x98] sm:$0xff] }
 0x140   :  { %1507 = vmatprep.subr.mxu1 %v654_v25  ;;  %1439 = vmatpush2.msra.mxu0 %v587_v26  ;;  %v1600_v24 = vld [vmem:[%s4028_s4 + $0x18] sm:$0xff]  ;;  %v1615_v25 = vld [vmem:[%s4028_s4 + $0x90] sm:$0xff] }
 0x141   :  { %1508 = vmatpush2.msra.mxu1 %v653_v28  ;;  %1440 = vmatprep.subr.mxu0 %v586_v29  ;;  %v1599_v26 = vld [vmem:[%s4028_s4 + $0x10] sm:$0xff]  ;;  %v1598_v28 = vld [vmem:[%s4028_s4 + $0x8] sm:$0xff]  ;;  %v1613_v29 = vld [vmem:[%s4028_s4 + $0x80] sm:$0xff] }
 0x142   :  { %1509 = vmatprep.subr.mxu1 %v652_v30  ;;  %1441 = vmatpush2.msra.mxu0 %v585_v31  ;;  %v1597_v30 = vld [vmem:[%s4028_s4] sm:$0xff]  ;;  %v691_v31 = vsub.s32 1, %v2223_v38 }
 0x143   :  { %1510 = vmatpush2.msra.mxu1 %v651_v32  ;;  %1442 = vmatprep.subr.mxu0 %v584_v33  ;;  %v683_v32 = vld [vmem:[%s4027_s3] sm:$0x3]  ;;  %v687_v33 = vsub.s32 0, %v2223_v38 }
 0x144   :  { %1511 = vmatprep.subr.mxu1 %v650_v35  ;;  %1443 = vmatpush2.msra.mxu0 %v583_v36  ;;  %v692_v35 = vrot.slane %v683_v32, %v691_v31 }
 0x145   :  { %1512 = vmatpush2.msra.mxu1 %v649_v39  ;;  %1444 = vmatprep.subr.mxu0 %v582_v40  ;;  %v688_v36 = vrot.slane %v683_v32, %v687_v33  ;;  %v953_v39 = vpop.f32.mrf.mxu1 }
 0x146   :  { %1513 = vmatprep.subr.mxu1 %v648_v41  ;;  %1445 = vmatpush2.msra.mxu0 %v581_v42 }
 0x147   :  { %1514 = vmatpush2.msra.mxu1 %v647_v43  ;;  %1446 = vmatprep.subr.mxu0 %v580_v44  ;;  %v883_v42 = vadd.f32 %v882_v34, %v688_v36  ;;  %v955_v43 = vpop.f32.mrf.mxu1 }
 0x148   :  { %1515 = vmatprep.subr.mxu1 %v646_v46  ;;  %1447 = vmatpush2.msra.mxu0 %v579_v47 }
 0x149   :  { %1448 = vmatprep.mubr.f32.mxu0 %v784_v49  ;;  %1516 = vmatpush2.msra.mxu1 %v645_v50  ;;  %v954_v47 = vadd.f32 %v953_v39, %v883_v42 }
 0x14a   :  { %1449 = vmatmul.mubr.f32.vlgmr.msra.gmra.mxu0 %v776_v37  ;;  %1517 = vmatprep.subr.mxu1 %v644_v48  ;;  %v884_v37 = vpop.f32.mrf.mxu0 }
 0x14b   :  { %1550 = vmatprep.subr.mxu0 %v682_v51  ;;  %1518 = vmatpush2.msra.mxu1 %v643_v52  ;;  %v885_v41 = vadd.f32 %v884_v37, %v692_v35 }
 0x14c   :  { %1519 = vmatprep.mubr.f32.mxu1 %v785_v53  ;;  %1551 = vmatpush1.msra.mxu0 %v681_v54  ;;  %v1024_v40 = vpop.f32.mrf.mxu0 }
 0x14d   :  { %1520 = vmatmul.mubr.f32.vlgmr.msra.gmra.mxu1 %v783_v45  ;;  %1552 = vmatprep.subr.mxu0 %v680_v55  ;;  %v1095_v45 = vpop.f32.mrf.mxu1  ;;  %v956_v46 = vadd.f32 %v955_v43, %v885_v41  ;;  %v1025_v48 = vadd.f32 %v1024_v40, %v954_v47 }
 0x14e   :  { %1553 = vmatpush1.msra.mxu0 %v679_v56  ;;  %1590 = vmatprep.mubr.f32.mxu0 %v1877_v60  ;;  %v1026_v44 = vpop.f32.mrf.mxu0 }
 0x14f   :  { %1554 = vmatprep.subr.mxu0 %v678_v57  ;;  %1775 = vmatprep.subr.mxu1 %v1628_v61  ;;  %v1027_v50 = vadd.f32 %v1026_v44, %v956_v46  ;;  %v1097_v51 = vpop.f32.mrf.mxu1  ;;  %v1096_v54 = vadd.f32 %v1095_v45, %v1025_v48 }
 0x150   :  { %1555 = vmatpush1.msra.mxu0 %v677_v58  ;;  %1776 = vmatpush3.msra.mxu1 %v1612_v62 }
 0x151   :  { %1556 = vmatprep.subr.mxu0 %v676_v59  ;;  %1777 = vmatprep.subr.mxu1 %v1627_v63  ;;  %v1098_v38 = vadd.f32 %v1097_v51, %v1027_v50 }
 0x152   :  { %1557 = vmatpush1.msra.mxu0 %v675_v0  ;;  %1778 = vmatpush3.msra.mxu1 %v1611_v1 }
 0x153   :  { %1773 = vmatmul.mubr.msk.f32.vlgmr.msra.gmra.mxu0 %vm813_vm0, %v1772_v2  ;;  %1779 = vmatprep.subr.mxu1 %v1626_v3 }
 0x154   :  { %1780 = vmatpush3.msra.mxu1 %v1610_v4 }
 0x155   :  { %1781 = vmatprep.subr.mxu1 %v1625_v5 }
 0x156   :  { %1782 = vmatpush3.msra.mxu1 %v1609_v6 }
 0x157   :  { %1783 = vmatprep.subr.mxu1 %v1624_v7 }
 0x158   :  { %1784 = vmatpush3.msra.mxu1 %v1608_v8 }
 0x159   :  { %1785 = vmatprep.subr.mxu1 %v1623_v9 }
 0x15a   :  { %1786 = vmatpush3.msra.mxu1 %v1607_v10 }
 0x15b   :  { %1787 = vmatprep.subr.mxu1 %v1622_v11 }
 0x15c   :  { %1788 = vmatpush3.msra.mxu1 %v1606_v12 }
 0x15d   :  { %1789 = vmatprep.subr.mxu1 %v1621_v13 }
 0x15e   :  { %1790 = vmatpush3.msra.mxu1 %v1605_v14 }
 0x15f   :  { %1791 = vmatprep.subr.mxu1 %v1620_v15 }
 0x160   :  { %1792 = vmatpush3.msra.mxu1 %v1604_v16  ;;  %v1727_v16 = vstv %s4024_s0  ;;  %s1878_s0 = smov 122  }
 0x161   :  { %1793 = vmatprep.subr.mxu1 %v1619_v17  ;;  %1822 = vrcp.f32 %v1727_v16 }
 0x162   :  { %1794 = vmatpush3.msra.mxu1 %v1603_v18 }
 0x163   :  { %1795 = vmatprep.subr.mxu1 %v1618_v19  ;;  %v1774_v19 = vld [vmem:[%s4029_s5] ss:$0 sm:$0xff] }
 0x164   :  { %1796 = vmatpush3.msra.mxu1 %v1602_v20 }
 0x165   :  { %1797 = vmatprep.subr.mxu1 %v1617_v21 }
 0x166   :  { %1798 = vmatpush3.msra.mxu1 %v1601_v22 }
 0x167   :  { %1799 = vmatprep.subr.mxu1 %v1616_v23 }
 0x168   :  { %1800 = vmatpush3.msra.mxu1 %v1600_v24 }
 0x169   :  { %1801 = vmatprep.subr.mxu1 %v1615_v25 }
 0x16a   :  { %1802 = vmatpush3.msra.mxu1 %v1599_v26 }
 0x16b   :  { %1803 = vmatprep.subr.mxu1 %v1614_v27 }
 0x16c   :  { %1804 = vmatpush3.msra.mxu1 %v1598_v28 }
 0x16d   :  { %1805 = vmatprep.subr.mxu1 %v1613_v29 }
 0x16e   :  { %1806 = vmatpush3.msra.mxu1 %v1597_v30  ;;  %v1823_v17 = vpop.eup %1822 }
 0x16f   :  { %1810 = vpush %v1823_v17 }
 0x186   :  { %v1166_v49 = vpop.f32.mrf.mxu0 }
 0x187   :  { %v1167_v57 = vadd.f32 %v1166_v49, %v1096_v54 }
 0x188   :  { %v1168_v52 = vpop.f32.mrf.mxu0 }
 0x189   :  { %v1237_v53 = vpop.f32.mrf.mxu1  ;;  %v1169_v56 = vadd.f32 %v1168_v52, %v1098_v38 }
 0x18a   :  { %v1238_v62 = vadd.f32 %v1237_v53, %v1167_v57 }
 0x18b   :  { %v1239_v58 = vpop.f32.mrf.mxu1 }
 0x18c   :  { %v1240_v61 = vadd.f32 %v1239_v58, %v1169_v56 }
 0x1a0   :  { %s1811_s11 = spop %1810 }
 0x1a1   :  { %v1730_v25 = vstv %s1811_s11 }
 0x1c8   :  { %v1308_v55 = vpop.f32.mrf.mxu0 }
 0x1c9   :  { %v1309_v1 = vadd.f32 %v1308_v55, %v1238_v62 }
 0x1ca   :  { %v1310_v59 = vpop.f32.mrf.mxu0 }
 0x1cb   :  { %v1379_v60 = vpop.f32.mrf.mxu1  ;;  %v1311_v63 = vadd.f32 %v1310_v59, %v1240_v61 }
 0x1cc   :  { %v1380_v6 = vadd.f32 %v1379_v60, %v1309_v1 }
 0x1cd   :  { %v1381_v2 = vpop.f32.mrf.mxu1 }
 0x1ce   :  { %v1382_v5 = vadd.f32 %v1381_v2, %v1311_v63 }
 0x20a   :  { %v1450_v0 = vpop.f32.mrf.mxu0 }
 0x20b   :  { %v1451_v8 = vadd.f32 %v1450_v0, %v1380_v6 }
 0x20c   :  { %v1452_v3 = vpop.f32.mrf.mxu0 }
 0x20d   :  { %v1521_v4 = vpop.f32.mrf.mxu1  ;;  %v1453_v7 = vadd.f32 %v1452_v3, %v1382_v5 }
 0x20e   :  { %v1522_v12 = vadd.f32 %v1521_v4, %v1451_v8 }
 0x20f   :  { %v1523_v9 = vpop.f32.mrf.mxu1 }
 0x210   :  { %v1524_v11 = vadd.f32 %v1523_v9, %v1453_v7 }
 0x213   :  { %v1592_v10 = vpop.f32.mrf.mxu0 }
 0x214   :  { %v1593_v15 = vadd.f32 %v1592_v10, %v1522_v12 }
 0x215   :  { %v1594_v13 = vpop.f32.mrf.mxu0 }
 0x216   :  { %v1595_v14 = vadd.f32 %v1594_v13, %v1524_v11 }
 0x218   :  { %1700 = vmatprep.mubr.f32.mxu1 %v1595_v14 }
 0x219   :  { %1701 = vmatmul.mubr.f32.vlgmr.msra.gmra.mxu1 %v1593_v15 }
 0x2d9   :  { %v1807_v18 = vpop.f32.mrf.mxu1 }
 0x2db   :  { %v1808_v20 = vpop.f32.mrf.mxu1 }
 0x2dc   :  { %v1809_v21 = vadd.f32 %v1808_v20, %v1807_v18 }
 0x2de   :  { %v1703_v22 = vadd.f32 %v1809_v21, %v1774_v19 }
 0x2e0   :  { %v1713_v23 = vsel %vm1712_vm1, %v1703_v22, -inf }
 0x2e1   :  { %1714 = vmax.xlane.f32.xlu0 %v1713_v23 }
 0x36a   :  { %v1715_v24 = vpop.xlane.xlu0 %1714 }
 0x36b   :  { %v1716_v26 = vsub.f32 %v1703_v22, %v1715_v24 }
 0x36d   :  { %v1717_v27 = vmul.f32 1.442695, %v1716_v26  ;;  %v1731_v28 = vmul.f32 %v1730_v25, %v1716_v26 }
 0x36f   :  { %1824 = vpow2.f32 %v1717_v27  ;;  %v1732_v29 = vmul.f32 1.442695, %v1731_v28 }
 0x371   :  { %1826 = vpow2.f32 %v1732_v29 }
 0x37c   :  { %v1825_v30 = vpop.eup %1824 }
 0x37d   :  { %v1719_v31 = vsel %vm1712_vm1, %v1825_v30, 0.0 }
 0x37e   :  { %v1827_v32 = vpop.eup %1826  ;;  %1720 = vadd.xlane.f32.xlu0 %v1719_v31 }
 0x37f   :  { %v1734_v33 = vsel %vm1712_vm1, %v1827_v32, 0.0 }
 0x380   :  { %1735 = vadd.xlane.f32.xlu1 %v1734_v33 }
 0x391   :  { %1707 = vrot.lane.b32.xlu1 %v1703_v22, %s1878_s0 }
 0x407   :  { %v1721_v34 = vpop.xlane.xlu0 %1720 }
 0x408   :  { %1828 = vlog2.f32 %v1721_v34 }
 0x409   :  { %v1736_v35 = vpop.xlane.xlu1 %1735 }
 0x40a   :  { %1830 = vrcp.f32 %v1736_v35 }
 0x40d   :  { %v1708_v36 = vpop.permute.xlu1 %1707 }
 0x40e   :  { %1711 = vst.msk [vmem:[%s4032_s8] sm:$0x3] %vm1710_vm2, %v1708_v36 }
 0x415   :  { %v1829_v37 = vpop.eup %1828 }
 0x416   :  { %v1723_v39 = vmul.f32 0.6931472, %v1829_v37 }
 0x417   :  { %v1831_v40 = vpop.eup %1830 }
 0x418   :  { %v1738_v41 = vmul.f32 %v1831_v40, %v1827_v32  ;;  %v1724_v42 = vsub.f32 %v1716_v26, %v1723_v39 }
 0x41a   :  { %1739 = vst.msk [vmem:[#allocation3] sm:$0x3] %vm1712_vm1, %v1738_v41  ;;  %1725 = vst.msk [vmem:[#allocation5] sm:$0x3] %vm1712_vm1, %v1724_v42 }
 0x41b   :  { %1843 = shalt.err (!%p1840_p4)
}
 0x41c   :  { %1749 = dma.vmem_to_hbm [thread:$0]  %s1747_s14, 32, %s4030_s6, [#allocation4]  }
 0x41d   :  { %s1852_s19 = scalar_lea.vmem %s1757_s16, 32  ;;  %p1857_p6 = scmp.lt.s32.totalorder %s1757_s16, %s1757_s16 }
 0x41e   :  { %p1853_p5 = scmp.ne.s32.totalorder %s1757_s16, %s1852_s19  ;;  %p1858_p7 = scmp.lt.s32.totalorder %s1852_s19, %s1852_s19 }
 0x420   :  { %p1859_p8 = por %p1858_p7, %p1857_p6 }
 0x422   :  { %p1860_p9 = pnand %p1859_p8, %p1853_p5 }
 0x424   :  { %1863 = shalt.err (!%p1860_p9)
}
 0x425   :  { %1759 = dma.vmem_to_hbm [thread:$0]  %s1757_s16, 32, %s4031_s7, [#allocation6]  }
 0x426   :  { %1872 = dma.done.wait [#allocation4], 32  }
 0x427   :  { %1873 = vsyncadd [#allocation4], 4294967264 }
 0x428   :  { %1874 = dma.done.wait [#allocation6], 32  }
 0x429   :  { %1875 = vsyncadd [#allocation6], 4294967264 }
 0x42a   :  { %1770 = vsyncpa [#allocation4], 1 }
 0x42b   :  { %1771 = vsyncpa [#allocation6], 1 }

</bundles_post_ra>
